<compile_context>
chip_gen: v7x
topology: tpu7x:2x2x1
jax: 0.10.0
libtpu: 0.0.40
codegen_flags: <defaults>
</compile_context>

<pallas_src>
import math
import jax
import jax.numpy as jnp
from jax.experimental import pallas as pl
from jax.experimental.pallas import tpu as pltpu

P_DROP = 0.3
LEAKY_SLOPE = 0.2


def _leaky_relu(h, slope=LEAKY_SLOPE):
    return jnp.where(h >= 0.0, h, slope * h)


def disc_kernel(x_ref,                       # (TB, D)        bf16
                m1_ref, m2_ref, m3_ref,      # (TB, 1024/512/256) bf16 scaled keep-masks
                w1_ref, b1_ref,              # (D, 1024) bf16, (1, 1024) f32
                w2_ref, b2_ref,              # (1024, 512) bf16, (1, 512) f32
                w3_ref, b3_ref,              # (512, 256) bf16, (1, 256) f32
                w4_ref, b4_ref,              # (1, 256) f32 row, (1, 1) f32
                o_ref):                      # (TB, 1) f32
    # fc1 -> leaky_relu -> dropout
    h = jnp.dot(x_ref[...], w1_ref[...], preferred_element_type=jnp.float32)
    h = _leaky_relu(h + b1_ref[...])
    h = h * m1_ref[...]                      # bf16 mask * f32 -> f32

    # fc2 -> leaky_relu -> dropout
    h = jnp.dot(h.astype(jnp.bfloat16), w2_ref[...],
                preferred_element_type=jnp.float32)
    h = _leaky_relu(h + b2_ref[...])
    h = h * m2_ref[...]

    # fc3 -> leaky_relu -> dropout
    h = jnp.dot(h.astype(jnp.bfloat16), w3_ref[...],
                preferred_element_type=jnp.float32)
    h = _leaky_relu(h + b3_ref[...])
    h = h * m3_ref[...]

    # fc4 (256 -> 1): lane-wise multiply + reduce on VPU/XLU, not the MXU.
    logits = jnp.sum(h * w4_ref[...], axis=-1, keepdims=True) + b4_ref[...]
    o_ref[...] = jax.nn.sigmoid(logits)


def mnist_discriminator(x, params, key, *, tb=128):
    """x: (B, D) float32.
    params: dict with w_i stored as (in, out) and b_i as (1, out), float32.
    key: jax PRNG key used for the dropout masks (training-mode dropout).
    tb: batch tile (128 fills v5e's 128-row MXU; use 256 on v6e/v7x).
    """
    B, D = x.shape
    tb = min(tb, B)
    assert B % tb == 0, "batch must be a multiple of the batch tile"
    grid = (B // tb,)

    # ---- host-side prep -------------------------------------------------
    scale = 1.0 / (1.0 - P_DROP)
    k1, k2, k3 = jax.random.split(key, 3)

    def make_mask(k, n):
        keep = jax.random.uniform(k, (B, n), dtype=jnp.float32) >= P_DROP
        return (keep.astype(jnp.float32) * scale).astype(jnp.bfloat16)

    m1 = make_mask(k1, 1024)
    m2 = make_mask(k2, 512)
    m3 = make_mask(k3, 256)

    x_bf = x.astype(jnp.bfloat16)
    w1 = params["w1"].astype(jnp.bfloat16)
    w2 = params["w2"].astype(jnp.bfloat16)
    w3 = params["w3"].astype(jnp.bfloat16)
    # fc4 weight as a (1, 256) f32 row for the VPU/XLU reduction.
    w4_row = params["w4"].reshape(1, -1).astype(jnp.float32)
    b1 = params["b1"].astype(jnp.float32)
    b2 = params["b2"].astype(jnp.float32)
    b3 = params["b3"].astype(jnp.float32)
    b4 = params["b4"].astype(jnp.float32)

    # ---- block specs -----------------------------------------------------
    def tiled(shape):     # batch-tiled operands: x, masks, output
        return pl.BlockSpec((tb, shape[1]), lambda i: (i, 0))

    def resident(shape):  # weights / biases: same block every step -> stays in VMEM
        return pl.BlockSpec(shape, lambda i: (0, 0))

    grid_spec = pltpu.PrefetchScalarGridSpec(
        num_scalar_prefetch=0,
        grid=grid,
        in_specs=[
            tiled(x_bf.shape),
            tiled(m1.shape), tiled(m2.shape), tiled(m3.shape),
            resident(w1.shape), resident(b1.shape),
            resident(w2.shape), resident(b2.shape),
            resident(w3.shape), resident(b3.shape),
            resident(w4_row.shape), resident(b4.shape),
        ],
        out_specs=pl.BlockSpec((tb, 1), lambda i: (i, 0)),
    )

    return pl.pallas_call(
        disc_kernel,
        out_shape=jax.ShapeDtypeStruct((B, 1), jnp.float32),
        grid_spec=grid_spec,
        compiler_params=pltpu.CompilerParams(
            dimension_semantics=("parallel",),   # megacore split on v7x
        ),
    )(x_bf, m1, m2, m3, w1, b1, w2, b2, w3, b3, w4_row, b4)


def init_params(key, d_input_dim):
    """nn.Linear-style init: U(-1/sqrt(fan_in), +1/sqrt(fan_in)), w as (in, out)."""
    dims = [d_input_dim, 1024, 1024 // 2, 1024 // 4, 1]
    params = {}
    keys = jax.random.split(key, 8)
    for idx in range(4):
        fan_in, fan_out = dims[idx], dims[idx + 1]
        bound = 1.0 / math.sqrt(fan_in)
        params[f"w{idx + 1}"] = jax.random.uniform(
            keys[2 * idx], (fan_in, fan_out),
            minval=-bound, maxval=bound, dtype=jnp.float32)
        params[f"b{idx + 1}"] = jax.random.uniform(
            keys[2 * idx + 1], (1, fan_out),
            minval=-bound, maxval=bound, dtype=jnp.float32)
    return params


if __name__ == "__main__":
    key = jax.random.PRNGKey(0)
    k_param, k_x, k_drop = jax.random.split(key, 3)

    B = 128          # batch (multiple of the batch tile)
    D_INPUT = 256    # d_input_dim (lane-aligned; 784 also works: full-dim block)
    TB = 64          # small batch tile so the demo exercises a multi-step grid

    params = init_params(k_param, D_INPUT)
    x = jax.random.normal(k_x, (B, D_INPUT), dtype=jnp.float32)

    out = mnist_discriminator(x, params, k_drop, tb=TB)
    out = jax.block_until_ready(out)

    assert out.shape == (B, 1)
    assert out.dtype == jnp.float32
    assert bool(jnp.all(jnp.isfinite(out)))
    assert bool(jnp.all((out >= 0.0) & (out <= 1.0)))
    print("KERNEL_OK")
</pallas_src>

<mosaic_0001>
module attributes {stable_mosaic.version = 11 : i64} {
  func.func @disc_kernel(%arg0: i32, %arg1: memref<64x256xbf16, #tpu.memory_space<vmem>>, %arg2: memref<64x1024xbf16, #tpu.memory_space<vmem>>, %arg3: memref<64x512xbf16, #tpu.memory_space<vmem>>, %arg4: memref<64x256xbf16, #tpu.memory_space<vmem>>, %arg5: memref<256x1024xbf16, #tpu.memory_space<vmem>>, %arg6: memref<1x1024xf32, #tpu.memory_space<vmem>>, %arg7: memref<1024x512xbf16, #tpu.memory_space<vmem>>, %arg8: memref<1x512xf32, #tpu.memory_space<vmem>>, %arg9: memref<512x256xbf16, #tpu.memory_space<vmem>>, %arg10: memref<1x256xf32, #tpu.memory_space<vmem>>, %arg11: memref<1x256xf32, #tpu.memory_space<vmem>>, %arg12: memref<1x1xf32, #tpu.memory_space<vmem>>, %arg13: memref<64x1xf32, #tpu.memory_space<vmem>>) attributes {dimension_semantics = [#tpu.dimension_semantics<parallel>], iteration_bounds = array<i64: 2>, scalar_prefetch = 0 : i64, scratch_operands = 0 : i64, tpu.core_type = #tpu.core_type<tc>, window_params = [{transform_indices = @transform_0, window_bounds = array<i64: 64, 256>}, {transform_indices = @transform_1, window_bounds = array<i64: 64, 1024>}, {transform_indices = @transform_2, window_bounds = array<i64: 64, 512>}, {transform_indices = @transform_3, window_bounds = array<i64: 64, 256>}, {pipeline_mode = #tpu.pipeline_mode<synchronous>, transform_indices = @transform_4, window_bounds = array<i64: 256, 1024>}, {pipeline_mode = #tpu.pipeline_mode<synchronous>, transform_indices = @transform_5, window_bounds = array<i64: 1, 1024>}, {pipeline_mode = #tpu.pipeline_mode<synchronous>, transform_indices = @transform_6, window_bounds = array<i64: 1024, 512>}, {pipeline_mode = #tpu.pipeline_mode<synchronous>, transform_indices = @transform_7, window_bounds = array<i64: 1, 512>}, {pipeline_mode = #tpu.pipeline_mode<synchronous>, transform_indices = @transform_8, window_bounds = array<i64: 512, 256>}, {pipeline_mode = #tpu.pipeline_mode<synchronous>, transform_indices = @transform_9, window_bounds = array<i64: 1, 256>}, {pipeline_mode = #tpu.pipeline_mode<synchronous>, transform_indices = @transform_10, window_bounds = array<i64: 1, 256>}, {pipeline_mode = #tpu.pipeline_mode<synchronous>, transform_indices = @transform_11, window_bounds = array<i64: 1, 1>}, {transform_indices = @transform_12, window_bounds = array<i64: 64, 1>}]} {
    %c0 = arith.constant 0 : index
    %c0_0 = arith.constant 0 : index
    %0 = vector.load %arg1[%c0, %c0_0] : memref<64x256xbf16, #tpu.memory_space<vmem>>, vector<64x256xbf16>
    %c0_1 = arith.constant 0 : index
    %c0_2 = arith.constant 0 : index
    %1 = vector.load %arg5[%c0_1, %c0_2] : memref<256x1024xbf16, #tpu.memory_space<vmem>>, vector<256x1024xbf16>
    %cst = arith.constant dense<0.000000e+00> : vector<64x1024xf32>
    %2 = tpu.matmul %0, %1, %cst {dimension_numbers = #tpu.dot_dimension_numbers<[1], [0], [0], [1], [0, 0, 1, 1], [], []>} : vector<64x256xbf16>, vector<256x1024xbf16>, vector<64x1024xf32> -> vector<64x1024xf32>
    %c0_3 = arith.constant 0 : index
    %c0_4 = arith.constant 0 : index
    %3 = vector.load %arg6[%c0_3, %c0_4] : memref<1x1024xf32, #tpu.memory_space<vmem>>, vector<1x1024xf32>
    %4 = vector.broadcast %3 : vector<1x1024xf32> to vector<64x1024xf32>
    %5 = arith.addf %2, %4 : vector<64x1024xf32>
    %cst_5 = arith.constant 0.000000e+00 : f32
    %6 = vector.broadcast %cst_5 : f32 to vector<64x1024xf32>
    %7 = arith.cmpf oge, %5, %6 : vector<64x1024xf32>
    %cst_6 = arith.constant 2.000000e-01 : f32
    %8 = vector.broadcast %cst_6 : f32 to vector<64x1024xf32>
    %9 = arith.mulf %8, %5 : vector<64x1024xf32>
    %10 = arith.select %7, %5, %9 : vector<64x1024xi1>, vector<64x1024xf32>
    %c0_7 = arith.constant 0 : index
    %c0_8 = arith.constant 0 : index
    %11 = vector.load %arg2[%c0_7, %c0_8] : memref<64x1024xbf16, #tpu.memory_space<vmem>>, vector<64x1024xbf16>
    %12 = arith.extf %11 : vector<64x1024xbf16> to vector<64x1024xf32>
    %13 = arith.mulf %10, %12 : vector<64x1024xf32>
    %14 = arith.truncf %13 : vector<64x1024xf32> to vector<64x1024xbf16>
    %c0_9 = arith.constant 0 : index
    %c0_10 = arith.constant 0 : index
    %15 = vector.load %arg7[%c0_9, %c0_10] : memref<1024x512xbf16, #tpu.memory_space<vmem>>, vector<1024x512xbf16>
    %cst_11 = arith.constant dense<0.000000e+00> : vector<64x512xf32>
    %16 = tpu.matmul %14, %15, %cst_11 {dimension_numbers = #tpu.dot_dimension_numbers<[1], [0], [0], [1], [0, 0, 1, 1], [], []>} : vector<64x1024xbf16>, vector<1024x512xbf16>, vector<64x512xf32> -> vector<64x512xf32>
    %c0_12 = arith.constant 0 : index
    %c0_13 = arith.constant 0 : index
    %17 = vector.load %arg8[%c0_12, %c0_13] : memref<1x512xf32, #tpu.memory_space<vmem>>, vector<1x512xf32>
    %18 = vector.broadcast %17 : vector<1x512xf32> to vector<64x512xf32>
    %19 = arith.addf %16, %18 : vector<64x512xf32>
    %cst_14 = arith.constant 0.000000e+00 : f32
    %20 = vector.broadcast %cst_14 : f32 to vector<64x512xf32>
    %21 = arith.cmpf oge, %19, %20 : vector<64x512xf32>
    %cst_15 = arith.constant 2.000000e-01 : f32
    %22 = vector.broadcast %cst_15 : f32 to vector<64x512xf32>
    %23 = arith.mulf %22, %19 : vector<64x512xf32>
    %24 = arith.select %21, %19, %23 : vector<64x512xi1>, vector<64x512xf32>
    %c0_16 = arith.constant 0 : index
    %c0_17 = arith.constant 0 : index
    %25 = vector.load %arg3[%c0_16, %c0_17] : memref<64x512xbf16, #tpu.memory_space<vmem>>, vector<64x512xbf16>
    %26 = arith.extf %25 : vector<64x512xbf16> to vector<64x512xf32>
    %27 = arith.mulf %24, %26 : vector<64x512xf32>
    %28 = arith.truncf %27 : vector<64x512xf32> to vector<64x512xbf16>
    %c0_18 = arith.constant 0 : index
    %c0_19 = arith.constant 0 : index
    %29 = vector.load %arg9[%c0_18, %c0_19] : memref<512x256xbf16, #tpu.memory_space<vmem>>, vector<512x256xbf16>
    %cst_20 = arith.constant dense<0.000000e+00> : vector<64x256xf32>
    %30 = tpu.matmul %28, %29, %cst_20 {dimension_numbers = #tpu.dot_dimension_numbers<[1], [0], [0], [1], [0, 0, 1, 1], [], []>} : vector<64x512xbf16>, vector<512x256xbf16>, vector<64x256xf32> -> vector<64x256xf32>
    %c0_21 = arith.constant 0 : index
    %c0_22 = arith.constant 0 : index
    %31 = vector.load %arg10[%c0_21, %c0_22] : memref<1x256xf32, #tpu.memory_space<vmem>>, vector<1x256xf32>
    %32 = vector.broadcast %31 : vector<1x256xf32> to vector<64x256xf32>
    %33 = arith.addf %30, %32 : vector<64x256xf32>
    %cst_23 = arith.constant 0.000000e+00 : f32
    %34 = vector.broadcast %cst_23 : f32 to vector<64x256xf32>
    %35 = arith.cmpf oge, %33, %34 : vector<64x256xf32>
    %cst_24 = arith.constant 2.000000e-01 : f32
    %36 = vector.broadcast %cst_24 : f32 to vector<64x256xf32>
    %37 = arith.mulf %36, %33 : vector<64x256xf32>
    %38 = arith.select %35, %33, %37 : vector<64x256xi1>, vector<64x256xf32>
    %c0_25 = arith.constant 0 : index
    %c0_26 = arith.constant 0 : index
    %39 = vector.load %arg4[%c0_25, %c0_26] : memref<64x256xbf16, #tpu.memory_space<vmem>>, vector<64x256xbf16>
    %40 = arith.extf %39 : vector<64x256xbf16> to vector<64x256xf32>
    %41 = arith.mulf %38, %40 : vector<64x256xf32>
    %c0_27 = arith.constant 0 : index
    %c0_28 = arith.constant 0 : index
    %42 = vector.load %arg11[%c0_27, %c0_28] : memref<1x256xf32, #tpu.memory_space<vmem>>, vector<1x256xf32>
    %43 = vector.broadcast %42 : vector<1x256xf32> to vector<64x256xf32>
    %44 = arith.mulf %41, %43 : vector<64x256xf32>
    %cst_29 = arith.constant dense<0.000000e+00> : vector<64xf32>
    %45 = vector.multi_reduction <add>, %44, %cst_29 [1] : vector<64x256xf32> to vector<64xf32>
    %46 = vector.shape_cast %45 : vector<64xf32> to vector<64x1xf32>
    %c0_30 = arith.constant 0 : index
    %c0_31 = arith.constant 0 : index
    %47 = vector.load %arg12[%c0_30, %c0_31] : memref<1x1xf32, #tpu.memory_space<vmem>>, vector<1x1xf32>
    %48 = vector.broadcast %47 : vector<1x1xf32> to vector<64x1xf32>
    %49 = arith.addf %46, %48 : vector<64x1xf32>
    %50 = arith.negf %49 : vector<64x1xf32>
    %51 = math.exp %50 : vector<64x1xf32>
    %cst_32 = arith.constant 1.000000e+00 : f32
    %52 = vector.broadcast %cst_32 : f32 to vector<64x1xf32>
    %53 = arith.addf %52, %51 : vector<64x1xf32>
    %54 = arith.divf %52, %53 : vector<64x1xf32>
    %c0_33 = arith.constant 0 : index
    %c0_34 = arith.constant 0 : index
    %55 = vector.load %arg13[%c0_33, %c0_34] : memref<64x1xf32, #tpu.memory_space<vmem>>, vector<64x1xf32>
    tpu.vector_store %arg13[%c0_33, %c0_34], %54 {strides = array<i32>} : memref<64x1xf32, #tpu.memory_space<vmem>>, vector<64x1xf32>,
    return
  }
  func.func @transform_0(%arg0: i32) -> (i32, i32) {
    %c0_i32 = arith.constant 0 : i32
    %c0_i32_0 = arith.constant 0 : i32
    return %arg0, %c0_i32 : i32, i32
  }
  func.func @transform_1(%arg0: i32) -> (i32, i32) {
    %c0_i32 = arith.constant 0 : i32
    %c0_i32_0 = arith.constant 0 : i32
    return %arg0, %c0_i32 : i32, i32
  }
  func.func @transform_2(%arg0: i32) -> (i32, i32) {
    %c0_i32 = arith.constant 0 : i32
    %c0_i32_0 = arith.constant 0 : i32
    return %arg0, %c0_i32 : i32, i32
  }
  func.func @transform_3(%arg0: i32) -> (i32, i32) {
    %c0_i32 = arith.constant 0 : i32
    %c0_i32_0 = arith.constant 0 : i32
    return %arg0, %c0_i32 : i32, i32
  }
  func.func @transform_4(%arg0: i32) -> (i32, i32) {
    %c0_i32 = arith.constant 0 : i32
    %c0_i32_0 = arith.constant 0 : i32
    %c0_i32_1 = arith.constant 0 : i32
    return %c0_i32, %c0_i32_0 : i32, i32
  }
  func.func @transform_5(%arg0: i32) -> (i32, i32) {
    %c0_i32 = arith.constant 0 : i32
    %c0_i32_0 = arith.constant 0 : i32
    %c0_i32_1 = arith.constant 0 : i32
    return %c0_i32, %c0_i32_0 : i32, i32
  }
  func.func @transform_6(%arg0: i32) -> (i32, i32) {
    %c0_i32 = arith.constant 0 : i32
    %c0_i32_0 = arith.constant 0 : i32
    %c0_i32_1 = arith.constant 0 : i32
    return %c0_i32, %c0_i32_0 : i32, i32
  }
  func.func @transform_7(%arg0: i32) -> (i32, i32) {
    %c0_i32 = arith.constant 0 : i32
    %c0_i32_0 = arith.constant 0 : i32
    %c0_i32_1 = arith.constant 0 : i32
    return %c0_i32, %c0_i32_0 : i32, i32
  }
  func.func @transform_8(%arg0: i32) -> (i32, i32) {
    %c0_i32 = arith.constant 0 : i32
    %c0_i32_0 = arith.constant 0 : i32
    %c0_i32_1 = arith.constant 0 : i32
    return %c0_i32, %c0_i32_0 : i32, i32
  }
  func.func @transform_9(%arg0: i32) -> (i32, i32) {
    %c0_i32 = arith.constant 0 : i32
    %c0_i32_0 = arith.constant 0 : i32
    %c0_i32_1 = arith.constant 0 : i32
    return %c0_i32, %c0_i32_0 : i32, i32
  }
  func.func @transform_10(%arg0: i32) -> (i32, i32) {
    %c0_i32 = arith.constant 0 : i32
    %c0_i32_0 = arith.constant 0 : i32
    %c0_i32_1 = arith.constant 0 : i32
    return %c0_i32, %c0_i32_0 : i32, i32
  }
  func.func @transform_11(%arg0: i32) -> (i32, i32) {
    %c0_i32 = arith.constant 0 : i32
    %c0_i32_0 = arith.constant 0 : i32
    %c0_i32_1 = arith.constant 0 : i32
    return %c0_i32, %c0_i32_0 : i32, i32
  }
  func.func @transform_12(%arg0: i32) -> (i32, i32) {
    %c0_i32 = arith.constant 0 : i32
    %c0_i32_0 = arith.constant 0 : i32
    return %arg0, %c0_i32 : i32, i32
  }
}

</mosaic_0001>

<bundles_post_ra>
// kernel: tpu_custom_call.1
= control target key start
LH: loop header
LB: loop body
LE: loop exit
PB: predicated region body
PF: predicated region fallthrough
CT: control target
= control target key end

     0   :  { %s8014_s0 = inlined_call_operand.hbm [shape: bf16[128,256], index: 0, kind: input, shape index: {}]   ;;  %s8015_s1 = inlined_call_operand.hbm [shape: bf16[128,1024], index: 1, kind: input, shape index: {}]   ;;  %s8016_s2 = inlined_call_operand.hbm [shape: bf16[128,512], index: 2, kind: input, shape index: {}]   ;;  %s8017_s3 = inlined_call_operand.hbm [shape: bf16[128,256], index: 3, kind: input, shape index: {}]   ;;  %s8018_s4 = inlined_call_operand.hbm [shape: bf16[256,1024], index: 4, kind: input, shape index: {}]   ;;  %s8019_s5 = inlined_call_operand.vmem [shape: f32[1,1024], index: 5, kind: input, shape index: {}]   ;;  %s8020_s6 = inlined_call_operand.hbm [shape: bf16[1024,512], index: 6, kind: input, shape index: {}]   ;;  %s8021_s7 = inlined_call_operand.vmem [shape: f32[1,512], index: 7, kind: input, shape index: {}]   ;;  %s8022_s8 = inlined_call_operand.hbm [shape: bf16[512,256], index: 8, kind: input, shape index: {}]   ;;  %s8023_s9 = inlined_call_operand.vmem [shape: f32[1,256], index: 9, kind: input, shape index: {}]   ;;  %s8024_s10 = inlined_call_operand.vmem [shape: f32[1,256], index: 10, kind: input, shape index: {}]   ;;  %s8025_s11 = inlined_call_operand.<no memory space> [shape: f32[1,1], index: 11, kind: input, shape index: {}]   ;;  %s8026_s12 = inlined_call_operand.vmem [shape: f32[128,1], index: 12, kind: output, shape index: {}]  }
   0x1   :  { %8045 = sst [smem:[#allocation21_spill]] %s8014_s0  ;;  %v17_v0 = vstv %s8025_s11 }
   0x2   :  { %8046 = sst [smem:[#allocation22_spill]] %s8015_s1  ;;  %18 = vst [vmem:[#allocation2] sm:$0x1] %v17_v0 }
   0x3   :  { %8047 = sst [smem:[#allocation23_spill]] %s8018_s4 }
   0x4   :  { %8048 = sst [smem:[#allocation24_spill]] %s8020_s6 }
   0x5   :  { %8049 = sst [smem:[#allocation25_spill]] %s8023_s9 }
   0x6   :  { %8050 = sst [smem:[#allocation26_spill]] %s8024_s10 }
   0x7   :  { %8051 = sst [smem:[#allocation27_spill]] %s8026_s12 }
   0x8   :  { %19 = vsyncpa [#allocation4], 0 }
   0x9   :  { %21 = vsyncpa [#allocation4 + $0x1], 0 }
   0xa   :  { %22 = vsyncpa [#allocation6], 0 }
   0xb   :  { %24 = vsyncpa [#allocation6 + $0x1], 0 }
   0xc   :  { %25 = vsyncpa [#allocation9], 0 }
   0xd   :  { %27 = vsyncpa [#allocation9 + $0x1], 0 }
   0xe   :  { %28 = vsyncpa [#allocation12], 0  ;;  %s7016_s23 = smov 0   ;;  %s7018_s24 = smov 0  }
   0xf   :  { %s7020_s25 = smov 0   ;;  %s7022_s26 = smov 0  }
  0x10 LB: > { %s7035_s11 = sadd.s32 4294967295, %s6933_s26   ;;  %s7038_s27 = sadd.s32 1, %s6933_s26   ;;  %s6933_s26 = sphi %s7022_s26, %s8105_s26   ;;  %s6929_s25 = sphi %s7020_s25, %s8109_s25   ;;  %s6925_s24 = sphi %s7018_s24, %s8108_s24   ;;  %s6921_s23 = sphi %s7016_s23, %s8107_s23  }
  0x11   : > { %8052 = sst [smem:[#allocation19_spill]] %s7038_s27  ;;  %s38_s28 = ssub.s32 %s6933_s26, %s7038_s27 }
  0x12   : > { %s41_s29 = sadd.s32 1, %s6929_s25  ;;  %p39_p0 = scmp.eq.s32.totalorder %s38_s28, 0 }
  0x13   : > { %p48_p1 = scmp.ne.s32.totalorder %s6929_s25, %s6925_s24  ;;  %p49_p2 = scmp.eq.s32.totalorder %s6933_s26, 0 }
  0x14   : > { %p54_p3 = scmp.ne.s32.totalorder %s6925_s24, %s6921_s23  ;;  %p8027_p5 = scmp.eq.s32.totalorder %s7035_s11, 0 }
  0x15   : > { %s7048_s30 = scalar_select %p39_p0, %s6929_s25, %s41_s29  }
  0x16   : > { %p7050_p4 = por %p49_p2, %p48_p1  ;;  %p5390_p6 = scmp.ge.s32.totalorder %s6933_s26, 1 }
  0x17   : > { %8053 = sst [smem:[#allocation20_spill]] %s7048_s30  ;;  %p337_p7 = scmp.lt.s32.totalorder %s6933_s26, 3 }
  0x18   : > { %s8054_s13 = scalar_select %p7050_p4, 1, 0 }
  0x19   : > { %p7059_p8 = por %p8027_p5, %p54_p3  ;;  %p7063_p9 = pnand %p5390_p6, %p337_p7 }
  0x1a   : > { %s6935_s16 = smov [#allocation10]   ;;  %s6936_s19 = smov [#allocation11]  }
  0x1b   : > { %s8055_s14 = scalar_select %p7059_p8, 1, 0 }
  0x1c   : > { %s8056_s15 = scalar_select %p7063_p9, 1, 0 }
  0x1d   : > { %s349_s17 = sshll.u32 %s6935_s16, 4  ;;  %p6076_p10 = pneg %p7063_p9  ;;  %s350_s17 = int_to_ptr.vmem [resolvable:$true] %s349_s17 }
  0x1e   : > { %s365_s20 = sshll.u32 %s6936_s19, 4  ;;  %s8058_s4 = sld [smem:[#allocation23_spill]]  ;;  %s7075_s20 = int_to_ptr.vmem [resolvable:$true] %s365_s20 }
  0x1f   : > { %p7071_p11 = pnand %p6076_p10, %p8027_p5 }
  0x21   : > { %s8057_s18 = scalar_select %p7071_p11, 1, 0 }
  0x22   : > { %p7085_p13 = pneg %p7071_p11 }
  0x24   : > { %s6679_s23 = scalar_lea.hbm %s8058_s4, 16384 }
  0x25   : > { %p6680_p12 = scmp.ne.s32.totalorder %s8058_s4, %s6679_s23  ;;  %p6686_p2 = scmp.lt.u32.totalorder %s6679_s23, %s8058_s4 }
  0x26   : > { %s8059_s16 = scalar_select %p7085_p13, 1, 0 }
  0x27   : > { %p6682_p0 = pnand %p7085_p13, %p6680_p12 }
  0x29   : > { %p6683_p1 = pneg %p6682_p0 }
  0x2b   : > { %p6688_p3 = pnand %p6686_p2, %p6683_p1 }
  0x2d   : > { %6691 = shalt.err (!%p6688_p3)
}
  0x2e   : > { %s6692_s21 = scalar_lea.vmem %s350_s17, 16384  ;;  %p6700_p5 = scmp.lt.s32.totalorder %s350_s17, %s350_s17 }
  0x2f   : > { %p6693_p6 = scmp.ne.s32.totalorder %s350_s17, %s6692_s21  ;;  %p6701_p8 = scmp.lt.s32.totalorder %s6692_s21, %s6692_s21 }
  0x31   : > { %p6695_p7 = pnand %p6693_p6, %p7085_p13  ;;  %p6702_p9 = por %p6701_p8, %p6700_p5 }
  0x33   : > { %p6696_p10 = pneg %p6695_p7 }
  0x35   : > { %p6703_p4 = pnand %p6702_p9, %p6696_p10 }
  0x37   : > { %6706 = shalt.err (!%p6703_p4)
}
  0x38   : > { %s8032_s22 = smov 512   ;;  %s8033_s28 = smov 32  }
  0x39   : > { %6079 = dma.hbm_to_vmem [thread:$0]  (!%p7071_p11), %s8058_s4, 16384, %s350_s17, [#allocation9], %s8032_s22, %s8032_s22, %s8033_s28  }
  0x3a   : > { %p6102_p12 = scmp.lt.s32.totalorder %s6933_s26, 2  ;;  %s8060_s6 = sld [smem:[#allocation24_spill]] }
  0x40   : > { %s6707_s21 = scalar_lea.hbm %s8060_s6, 32768 }
  0x41   : > { %p6708_p4 = scmp.ne.s32.totalorder %s8060_s6, %s6707_s21  ;;  %p6714_p9 = scmp.lt.u32.totalorder %s6707_s21, %s8060_s6 }
  0x43   : > { %p6710_p5 = pnand %p6708_p4, %p7085_p13 }
  0x45   : > { %p6711_p8 = pneg %p6710_p5 }
  0x47   : > { %p6716_p0 = pnand %p6714_p9, %p6711_p8 }
  0x49   : > { %6719 = shalt.err (!%p6716_p0)
}
  0x4a   : > { %s6720_s17 = scalar_lea.vmem %s7075_s20, 32768  ;;  %p6728_p6 = scmp.lt.s32.totalorder %s7075_s20, %s7075_s20 }
  0x4b   : > { %p6721_p1 = scmp.ne.s32.totalorder %s7075_s20, %s6720_s17  ;;  %p6729_p7 = scmp.lt.s32.totalorder %s6720_s17, %s6720_s17 }
  0x4d   : > { %p6723_p2 = pnand %p6721_p1, %p7085_p13  ;;  %p6730_p10 = por %p6729_p7, %p6728_p6 }
  0x4f   : > { %p6724_p3 = pneg %p6723_p2 }
  0x51   : > { %p6731_p4 = pnand %p6730_p10, %p6724_p3 }
  0x53   : > { %6734 = shalt.err (!%p6731_p4)
}
  0x54   : > { %s8034_s12 = smov 256   ;;  %s8039_s9 = smov 16  }
  0x55   : > { %6082 = dma.hbm_to_vmem [thread:$0]  (!%p7071_p11), %s8060_s6, 32768, %s7075_s20, [#allocation12], %s8034_s12, %s8034_s12, %s8039_s9  }
  0x56   : > { %s7132_s30 = sand.u32 1, %s6929_s25   ;;  %p8061_p5 = scmp.ne.s32.totalorder %s8054_s13, 0 }
  0x57   : > { %s8035_s29 = sand.u32 1, %s6933_s26   ;;  %s5399_s19 = sshll.u32 %s7132_s30, 8 }
  0x58   : > { %p7138_p8 = pnand %p6102_p12, %p8061_p5  ;;  %s5891_s21 = sshll.u32 %s6933_s26, 12 }
  0x59   : > { %s8063_s1 = sld [smem:[#allocation22_spill]]  ;;  %s430_s13 = scalar_lea.vmem [#allocation5], %s5399_s19 }
  0x5a   : > { %s8062_s23 = scalar_select %p7138_p8, 1, 0 }
  0x5b   : > { %s438_s20 = sshll.u32 %s430_s13, 4  ;;  %s7154_s10 = scalar_lea.sflag [#allocation6], %s8035_s29  ;;  %s7150_s20 = int_to_ptr.vmem [resolvable:$true] %s438_s20 }
  0x5c   : > { %p7160_p9 = pneg %p7138_p8 }
  0x5f   : > { %s7148_s28 = scalar_lea.hbm %s8063_s1, %s5891_s21  ;;  %s6740_s19 = scalar_lea.hbm %s8063_s1, 8192 }
  0x60   : > { %s6735_s27 = scalar_lea.hbm %s7148_s28, 4096  ;;  %p6741_p2 = scmp.lt.u32.totalorder %s7148_s28, %s8063_s1 }
  0x61   : > { %p6736_p12 = scmp.ne.s32.totalorder %s7148_s28, %s6735_s27  ;;  %p6742_p3 = scmp.lt.u32.totalorder %s6740_s19, %s6735_s27 }
  0x62   : > { %p6744_p7 = scmp.lt.u32.totalorder %s6735_s27, %s7148_s28 }
  0x63   : > { %p6738_p0 = pnand %p7160_p9, %p6736_p12  ;;  %p6743_p6 = por %p6742_p3, %p6741_p2 }
  0x65   : > { %p6739_p1 = pneg %p6738_p0  ;;  %p6745_p10 = por %p6744_p7, %p6743_p6 }
  0x67   : > { %p6746_p4 = pnand %p6745_p10, %p6739_p1 }
  0x69   : > { %6749 = shalt.err (!%p6746_p4)
}
  0x6a   : > { %s6750_s29 = scalar_lea.vmem %s7150_s20, 4096  ;;  %s6941_s22 = smov [#allocation5]  }
  0x6b   : > { %p6751_p5 = scmp.ne.s32.totalorder %s7150_s20, %s6750_s29  ;;  %s6755_s21 = sshll.u32 %s6941_s22, 4  ;;  %s6756_s21 = int_to_ptr.vmem [resolvable:$false] %s6755_s21 }
  0x6c   : > { %s6757_s17 = scalar_lea.vmem %s6756_s21, 8192  ;;  %p6758_p11 = scmp.lt.s32.totalorder %s7150_s20, %s6756_s21 }
  0x6d   : > { %p6753_p12 = pnand %p6751_p5, %p7160_p9  ;;  %p6759_p13 = scmp.lt.s32.totalorder %s6757_s17, %s6750_s29 }
  0x6f   : > { %p6754_p0 = pneg %p6753_p12  ;;  %p6760_p2 = por %p6759_p13, %p6758_p11 }
  0x71   : > { %p6761_p3 = pnand %p6760_p2, %p6754_p0 }
  0x73   : > { %6764 = shalt.err (!%p6761_p3)
}
  0x74   : > { %s8065_s27 = smov 32   ;;  %s8066_s19 = smov 512  }
  0x75   : > { %6092 = dma.hbm_to_vmem [thread:$0]  (!%p7138_p8), %s7148_s28, 4096, %s7150_s20, %s7154_s10, %s8066_s19, %s8066_s19, %s8065_s27  }
  0x76   : > { %s6942_s13 = smov [#allocation13]   ;;  %s6765_s29 = scalar_lea.hbm %s8022_s8, 8192 }
  0x77   : > { %s381_s9 = sshll.u32 %s6942_s13, 4  ;;  %p6766_p11 = scmp.ne.s32.totalorder %s8022_s8, %s6765_s29  ;;  %s382_s9 = int_to_ptr.vmem [resolvable:$true] %s381_s9 }
  0x78   : > { %p8067_p13 = scmp.ne.s32.totalorder %s8059_s16, 0  ;;  %p6772_p7 = scmp.lt.u32.totalorder %s6765_s29, %s8022_s8 }
  0x7a   : > { %p6768_p1 = pnand %p6766_p11, %p8067_p13 }
  0x7c   : > { %p6769_p6 = pneg %p6768_p1 }
  0x7e   : > { %p6774_p10 = pnand %p6772_p7, %p6769_p6 }
  0x80   : > { %6777 = shalt.err (!%p6774_p10)
}
  0x81   : > { %s6778_s28 = scalar_lea.vmem %s382_s9, 8192  ;;  %p6786_p0 = scmp.lt.s32.totalorder %s382_s9, %s382_s9 }
  0x82   : > { %p6779_p4 = scmp.ne.s32.totalorder %s382_s9, %s6778_s28  ;;  %p6787_p2 = scmp.lt.s32.totalorder %s6778_s28, %s6778_s28 }
  0x84   : > { %p6781_p5 = pnand %p6779_p4, %p8067_p13  ;;  %p6788_p3 = por %p6787_p2, %p6786_p0 }
  0x86   : > { %p6782_p12 = pneg %p6781_p5 }
  0x88   : > { %p6789_p8 = pnand %p6788_p3, %p6782_p12 }
  0x8a   : > { %6792 = shalt.err (!%p6789_p8)
}
  0x8b   : > { %s8042_s1 = smov 128   ;;  %s6944_s4 = smov 8  }
  0x8c   : > { %p8068_p11 = scmp.ne.s32.totalorder %s8057_s18, 0  ;;  %s8044_s20 = sshll.u32 %s7132_s30, 6 }
  0x8d   : > { %s5889_s27 = sshll.u32 %s6933_s26, 10  ;;  %s8069_s0 = sld [smem:[#allocation21_spill]] }
  0x8e   : > { %6085 = dma.hbm_to_vmem [thread:$0]  (!%p8068_p11), %s8022_s8, 8192, %s382_s9, [#allocation12], %s8042_s1, %s8042_s1, %s6944_s4  }
  0x8f   : > { %s408_s18 = scalar_lea.vmem [#allocation3], %s8044_s20  ;;  %s7222_s9 = scalar_lea.hbm %s8017_s3, %s5889_s27 }
  0x90   : > { %s416_s29 = sshll.u32 %s408_s18, 4  ;;  %s405_s28 = scalar_lea.sflag [#allocation4], %s7132_s30  ;;  %s7217_s29 = int_to_ptr.vmem [resolvable:$true] %s416_s29 }
  0x93   : > { %s7213_s22 = scalar_lea.hbm %s8069_s0, %s5889_s27  ;;  %s6798_s13 = scalar_lea.hbm %s8069_s0, 2048 }
  0x94   : > { %s6793_s6 = scalar_lea.hbm %s7213_s22, 1024  ;;  %p6799_p6 = scmp.lt.u32.totalorder %s7213_s22, %s8069_s0 }
  0x95   : > { %p6794_p8 = scmp.ne.s32.totalorder %s7213_s22, %s6793_s6  ;;  %p6800_p7 = scmp.lt.u32.totalorder %s6798_s13, %s6793_s6 }
  0x96   : > { %p6802_p4 = scmp.lt.u32.totalorder %s6793_s6, %s7213_s22 }
  0x97   : > { %p6796_p13 = pnand %p6794_p8, %p7160_p9  ;;  %p6801_p10 = por %p6800_p7, %p6799_p6 }
  0x99   : > { %p6797_p1 = pneg %p6796_p13  ;;  %p6803_p5 = por %p6802_p4, %p6801_p10 }
  0x9b   : > { %p6804_p12 = pnand %p6803_p5, %p6797_p1 }
  0x9d   : > { %6807 = shalt.err (!%p6804_p12)
}
  0x9e   : > { %s6808_s27 = scalar_lea.vmem %s7217_s29, 1024  ;;  %s6945_s18 = smov [#allocation3]  }
  0x9f   : > { %p6809_p0 = scmp.ne.s32.totalorder %s7217_s29, %s6808_s27  ;;  %s6813_s21 = sshll.u32 %s6945_s18, 4  ;;  %s6814_s21 = int_to_ptr.vmem [resolvable:$false] %s6813_s21 }
  0xa0   : > { %s6815_s1 = scalar_lea.vmem %s6814_s21, 2048  ;;  %p6816_p11 = scmp.lt.s32.totalorder %s7217_s29, %s6814_s21 }
  0xa1   : > { %p6811_p2 = pnand %p6809_p0, %p7160_p9  ;;  %p6817_p8 = scmp.lt.s32.totalorder %s6815_s1, %s6808_s27 }
  0xa3   : > { %p6812_p3 = pneg %p6811_p2  ;;  %p6818_p13 = por %p6817_p8, %p6816_p11 }
  0xa5   : > { %p6819_p6 = pnand %p6818_p13, %p6812_p3 }
  0xa7   : > { %6822 = shalt.err (!%p6819_p6)
}
  0xa8   : > { %p8070_p1 = scmp.ne.s32.totalorder %s8062_s23, 0  ;;  %s8071_s20 = smov 128  }
  0xa9   : > { %s8072_s17 = sshll.u32 %s7132_s30, 6  ;;  %s5403_s19 = sshll.u32 %s7132_s30, 7 }
  0xaa   : > { %6089 = dma.hbm_to_vmem [thread:$0]  (!%p8070_p1), %s7213_s22, 1024, %s7217_s29, %s405_s28, %s8071_s20, %s8071_s20, %s6944_s4  }
  0xab   : > { %s474_s6 = scalar_lea.vmem [#allocation8], %s8072_s17  ;;  %s5893_s13 = sshll.u32 %s6933_s26, 11 }
  0xac   : > { %s482_s16 = sshll.u32 %s474_s6, 4  ;;  %s452_s27 = scalar_lea.vmem [#allocation7], %s5403_s19  ;;  %s7254_s16 = int_to_ptr.vmem [resolvable:$true] %s482_s16 }
  0xad   : > { %s460_s18 = sshll.u32 %s452_s27, 4  ;;  %s7260_s0 = scalar_lea.hbm %s8016_s2, %s5893_s13  ;;  %s7262_s18 = int_to_ptr.vmem [resolvable:$true] %s460_s18 }
  0xae   : > { %s6823_s22 = scalar_lea.hbm %s7260_s0, 2048  ;;  %s6828_s28 = scalar_lea.hbm %s8016_s2, 4096 }
  0xaf   : > { %p6824_p7 = scmp.ne.s32.totalorder %s7260_s0, %s6823_s22  ;;  %p6829_p5 = scmp.lt.u32.totalorder %s7260_s0, %s8016_s2 }
  0xb0   : > { %p6830_p12 = scmp.lt.u32.totalorder %s6828_s28, %s6823_s22  ;;  %p6832_p2 = scmp.lt.u32.totalorder %s6823_s22, %s7260_s0 }
  0xb1   : > { %p6826_p10 = pnand %p6824_p7, %p7160_p9 }
  0xb2   : > { %p6831_p0 = por %p6830_p12, %p6829_p5 }
  0xb3   : > { %p6827_p4 = pneg %p6826_p10 }
  0xb4   : > { %p6833_p3 = por %p6832_p2, %p6831_p0 }
  0xb6   : > { %p6834_p11 = pnand %p6833_p3, %p6827_p4 }
  0xb8   : > { %6837 = shalt.err (!%p6834_p11)
}
  0xb9   : > { %s6838_s19 = scalar_lea.vmem %s7262_s18, 2048  ;;  %s6946_s13 = smov [#allocation7]  }
  0xba   : > { %p6839_p8 = scmp.ne.s32.totalorder %s7262_s18, %s6838_s19  ;;  %s6843_s27 = sshll.u32 %s6946_s13, 4  ;;  %s6844_s27 = int_to_ptr.vmem [resolvable:$false] %s6843_s27 }
  0xbb   : > { %s6845_s21 = scalar_lea.vmem %s6844_s27, 4096  ;;  %p6846_p7 = scmp.lt.s32.totalorder %s7262_s18, %s6844_s27 }
  0xbc   : > { %p6841_p13 = pnand %p6839_p8, %p7160_p9  ;;  %p6847_p10 = scmp.lt.s32.totalorder %s6845_s21, %s6838_s19 }
  0xbe   : > { %p6842_p6 = pneg %p6841_p13  ;;  %p6848_p5 = por %p6847_p10, %p6846_p7 }
  0xc0   : > { %p6849_p12 = pnand %p6848_p5, %p6842_p6 }
  0xc2   : > { %6852 = shalt.err (!%p6849_p12)
}
  0xc3   : > { %s8073_s1 = smov 16   ;;  %s8074_s22 = smov 256  }
  0xc4   : > { %6095 = dma.hbm_to_vmem [thread:$0]  (!%p8070_p1), %s7260_s0, 2048, %s7262_s18, %s7154_s10, %s8074_s22, %s8074_s22, %s8073_s1  }
  0xc5   : > { %s8075_s30 = sand.u32 1, %s6933_s26   ;;  %s6853_s28 = scalar_lea.hbm %s7222_s9, 1024 }
  0xc6   : > { %s7291_s29 = scalar_lea.sflag [#allocation9], %s8075_s30  ;;  %p6854_p4 = scmp.ne.s32.totalorder %s7222_s9, %s6853_s28 }
  0xc7   : > { %s6858_s19 = scalar_lea.hbm %s8017_s3, 2048  ;;  %p6859_p3 = scmp.lt.u32.totalorder %s7222_s9, %s8017_s3 }
  0xc8   : > { %p6856_p0 = pnand %p6854_p4, %p7160_p9  ;;  %p6860_p11 = scmp.lt.u32.totalorder %s6858_s19, %s6853_s28 }
  0xc9   : > { %p6862_p13 = scmp.lt.u32.totalorder %s6853_s28, %s7222_s9 }
  0xca   : > { %p6857_p2 = pneg %p6856_p0  ;;  %p6861_p8 = por %p6860_p11, %p6859_p3 }
  0xcc   : > { %p6863_p6 = por %p6862_p13, %p6861_p8 }
  0xce   : > { %p6864_p7 = pnand %p6863_p6, %p6857_p2 }
  0xd0   : > { %6867 = shalt.err (!%p6864_p7)
}
  0xd1   : > { %s6868_s0 = scalar_lea.vmem %s7254_s16, 1024  ;;  %s6947_s26 = smov [#allocation8]  }
  0xd2   : > { %p6869_p10 = scmp.ne.s32.totalorder %s7254_s16, %s6868_s0  ;;  %s6873_s10 = sshll.u32 %s6947_s26, 4  ;;  %s6874_s10 = int_to_ptr.vmem [resolvable:$false] %s6873_s10 }
  0xd3   : > { %s6875_s18 = scalar_lea.vmem %s6874_s10, 2048  ;;  %p6876_p4 = scmp.lt.s32.totalorder %s7254_s16, %s6874_s10 }
  0xd4   : > { %p6871_p5 = pnand %p6869_p10, %p7160_p9  ;;  %p6877_p0 = scmp.lt.s32.totalorder %s6875_s18, %s6868_s0 }
  0xd6   : > { %p6872_p12 = pneg %p6871_p5  ;;  %p6878_p3 = por %p6877_p0, %p6876_p4 }
  0xd8   : > { %p6879_p11 = pnand %p6878_p3, %p6872_p12 }
  0xda   : > { %6882 = shalt.err (!%p6879_p11)
}
  0xdb   : > { %6098 = dma.hbm_to_vmem [thread:$0]  (!%p8070_p1), %s7222_s9, 1024, %s7254_s16, %s7291_s29, %s8071_s20, %s8071_s20, %s6944_s4  }
  0xdc   : > { %p8076_p9 = scmp.ne.s32.totalorder %s8056_s15, 0 }
  0xdd   : > { %s496_s12 = sand.u32 (!%p8076_p9), 1, %s6925_s24   ;;  %p8077_p2 = scmp.ne.s32.totalorder (!%p8076_p9), %s8055_s14, 0 }
  0xde   : > { %494 = sbr.rel (%p8076_p9) target bundleno = 1447 (0x5a7), region = 68  ;;  %s5412_s21 = sshll.u32 (!%p8076_p9), %s496_s12, 6 }
  0xdf   : > { %s497_s1 = scalar_lea.sflag (!%p8076_p9), [#allocation4], %s496_s12  ;;  %s7321_s22 = scalar_lea.vmem (!%p8076_p9), [#allocation3], %s5412_s21 }
  0xe5   : > { %6900 = dma.done.wait (%p8077_p2), %s497_s1, 1024  }
  0xe6   : > { %6902 = vsyncadd (%p8077_p2), %s497_s1, 4294966272  ;;  %s505_s23 = sand.u32 1, %s7035_s11   ;;  %s5413_s30 = sshll.u32 %s496_s12, 8 }
  0xe7   : > { %s506_s4 = scalar_lea.sflag [#allocation6], %s505_s23  ;;  %s7328_s9 = scalar_lea.vmem [#allocation5], %s5413_s30 }
  0xe8   : > { %6904 = dma.done.wait (%p8077_p2), %s506_s4, 6144  }
  0xe9   : > { %6906 = vsyncadd (%p8077_p2), %s506_s4, 4294961152  ;;  %s5414_s15 = sshll.u32 %s496_s12, 7  ;;  %s524_s16 = scalar_lea.sflag [#allocation9], %s505_s23 }
  0xea   : > { %s7334_s20 = scalar_lea.vmem [#allocation7], %s5414_s15  ;;  %s7336_s29 = scalar_lea.vmem [#allocation8], %s5412_s21 }
  0xeb   : > { %6908 = dma.done.wait (%p8077_p2), %s524_s16, 1024  }
  0xec   : > { %6910 = vsyncadd (%p8077_p2), %s524_s16, 4294966272  ;;  %p8078_p1 = scmp.eq.s32.totalorder %s7035_s11, 0 }
  0xee   : > { %6912 = dma.done.wait (%p8078_p1), [#allocation9], 16384   ;;  %p8079_p8 = pmov %p8078_p1 }
  0xef   : > { %p8080_p13 = pmov %p8078_p1 }
  0xf0   : > { %6914 = vsyncadd (%p8079_p8), [#allocation9], 4294950912 }
  0xf1   : > { %6916 = dma.done.wait (%p8080_p13), [#allocation12], 40960   ;;  %p8081_p6 = pmov %p8078_p1 }
  0xf2   : > { %v613_v1 = vld [vmem:[#allocation10] sm:$0xff]  ;;  %v615_v35 = vld [vmem:[#allocation10 + $0x10] sm:$0xff]  ;;  %s8102_s26 = sld [smem:[#allocation25_spill]]  ;;  %s8103_s12 = sld [smem:[#allocation26_spill]] }
  0xf3   : > { %6918 = vsyncadd (%p8081_p6), [#allocation12], 4294926336  ;;  %v617_v2 = vld [vmem:[#allocation10 + $0x20] sm:$0xff]  ;;  %v619_v36 = vld [vmem:[#allocation10 + $0x30] sm:$0xff]  ;;  %s5419_s21 = sshll.u32 %s7035_s11, 3  ;;  %s8104_s23 = sld [smem:[#allocation27_spill]] }
  0xf4   : > { %v621_v3 = vld [vmem:[#allocation10 + $0x40] sm:$0xff]  ;;  %v5430_v4 = vcombine.high %v613_v1, %v617_v2  ;;  %v5429_v5 = vcombine.low %v613_v1, %v617_v2  ;;  %v5434_v37 = vcombine.high %v615_v35, %v619_v36  ;;  %v5433_v38 = vcombine.low %v615_v35, %v619_v36  ;;  %v623_v39 = vld [vmem:[#allocation10 + $0x50] sm:$0xff]  ;;  %v614_v36 = vld [vmem:[#allocation10 + $0x8] sm:$0xff]  ;;  %p600_p7 = scmp.lt.s32.totalorder %s5419_s21, 15 }
  0xf5   : > { %v625_v6 = vld [vmem:[#allocation10 + $0x60] sm:$0xff]  ;;  %v627_v40 = vld [vmem:[#allocation10 + $0x70] sm:$0xff] }
  0xf6   : > { %v5438_v7 = vcombine.high %v621_v3, %v625_v6  ;;  %v629_v8 = vld [vmem:[#allocation10 + $0x80] sm:$0xff]  ;;  %1463 = vmatprep.subr.bf16.mxu1 %v5430_v4  ;;  %v5437_v10 = vcombine.low %v621_v3, %v625_v6  ;;  %v5442_v42 = vcombine.high %v623_v39, %v627_v40  ;;  %v631_v43 = vld [vmem:[#allocation10 + $0x90] sm:$0xff]  ;;  %1609 = vmatprep.subr.bf16.mxu0 %v5434_v37  ;;  %v618_v37 = vld [vmem:[#allocation10 + $0x28] sm:$0xff]  ;;  %s8111_s21 = smov (!%p600_p7, %s5419_s21), 15 }
  0xf7   : > { %v633_v9 = vld [vmem:[#allocation10 + $0xa0] sm:$0xff]  ;;  %1464 = vmatpush1.bf16.msra.mxu1 %v5429_v5  ;;  %v635_v44 = vld [vmem:[#allocation10 + $0xb0] sm:$0xff]  ;;  %1610 = vmatpush1.bf16.msra.mxu0 %v5433_v38  ;;  %v5441_v48 = vcombine.low %v623_v39, %v627_v40  ;;  %s5420_s11 = sshll.u32 %s8111_s21, 3 }
  0xf8   : > { %1465 = vmatprep.subr.bf16.mxu1 %v5438_v7  ;;  %v5446_v11 = vcombine.high %v629_v8, %v633_v9  ;;  %v637_v12 = vld [vmem:[#allocation10 + $0xc0] sm:$0xff]  ;;  %v5445_v14 = vcombine.low %v629_v8, %v633_v9  ;;  %1611 = vmatprep.subr.bf16.mxu0 %v5442_v42  ;;  %v5450_v49 = vcombine.high %v631_v43, %v635_v44  ;;  %v639_v51 = vld [vmem:[#allocation10 + $0xd0] sm:$0xff] }
  0xf9   : > { %v641_v13 = vld [vmem:[#allocation10 + $0xe0] sm:$0xff]  ;;  %v643_v52 = vld [vmem:[#allocation10 + $0xf0] sm:$0xff]  ;;  %v5449_v56 = vcombine.low %v631_v43, %v635_v44  ;;  %v622_v44 = vld [vmem:[#allocation10 + $0x48] sm:$0xff]  ;;  %s7983_s30 = scalar_lea.vmem %s8104_s23, %s5420_s11 }
  0xfa   : > { %v5454_v15 = vcombine.high %v637_v12, %v641_v13  ;;  %v645_v16 = vld [vmem:[#allocation10 + $0x100] sm:$0xff]  ;;  %v5453_v19 = vcombine.low %v637_v12, %v641_v13  ;;  %v5458_v57 = vcombine.high %v639_v51, %v643_v52  ;;  %v647_v59 = vld [vmem:[#allocation10 + $0x110] sm:$0xff]  ;;  %v5457_v0 = vcombine.low %v639_v51, %v643_v52 }
  0xfb   : > { %1466 = vmatpush1.bf16.msra.mxu1 %v5437_v10  ;;  %v649_v17 = vld [vmem:[#allocation10 + $0x120] sm:$0xff]  ;;  %1612 = vmatpush1.bf16.msra.mxu0 %v5441_v48  ;;  %v651_v60 = vld [vmem:[#allocation10 + $0x130] sm:$0xff]  ;;  %v5431_v52 = vcombine.low %v614_v36, %v618_v37 }
  0xfc   : > { %1467 = vmatprep.subr.bf16.mxu1 %v5446_v11  ;;  %v7351_v18 = vld [vmem:[%s7321_s22 + $0x4] ss:$8 sps:$4 sm:$0xff]   ;;  %v5462_v20 = vcombine.high %v645_v16, %v649_v17  ;;  %v5461_v23 = vcombine.low %v645_v16, %v649_v17  ;;  %1613 = vmatprep.subr.bf16.mxu0 %v5450_v49  ;;  %v5466_v1 = vcombine.high %v647_v59, %v651_v60  ;;  %v655_v3 = vld [vmem:[#allocation10 + $0x150] sm:$0xff]  ;;  %v7356_v48 = vld [vmem:[%s7321_s22] ss:$8 sps:$4 sm:$0xff]  }
  0xfd   : > { %1495 = vmatprep.mubr.bf16.mxu1 %v7351_v18  ;;  %v653_v21 = vld [vmem:[#allocation10 + $0x140] sm:$0xff]  ;;  %1641 = vmatprep.mubr.bf16.mxu0 %v7351_v18  ;;  %v659_v4 = vld [vmem:[#allocation10 + $0x170] sm:$0xff]  ;;  %v5465_v8 = vcombine.low %v647_v59, %v651_v60  ;;  %v5432_v49 = vcombine.high %v614_v36, %v618_v37  ;;  %v674_v36 = vld [vmem:[#allocation10 + $0x1e8] sm:$0xff] }
  0xfe   : > { %v657_v22 = vld [vmem:[#allocation10 + $0x160] sm:$0xff]  ;;  %v5474_v9 = vcombine.high %v655_v3, %v659_v4  ;;  %v663_v12 = vld [vmem:[#allocation10 + $0x190] sm:$0xff]  ;;  %v5473_v16 = vcombine.low %v655_v3, %v659_v4 }
  0xff   : > { %1468 = vmatpush1.bf16.msra.mxu1 %v5445_v14  ;;  %v5470_v24 = vcombine.high %v653_v21, %v657_v22  ;;  %v661_v25 = vld [vmem:[#allocation10 + $0x180] sm:$0xff]  ;;  %v5469_v27 = vcombine.low %v653_v21, %v657_v22  ;;  %1614 = vmatpush1.bf16.msra.mxu0 %v5449_v56  ;;  %v667_v13 = vld [vmem:[#allocation10 + $0x1b0] sm:$0xff] }
 0x100   : > { %1469 = vmatprep.subr.bf16.mxu1 %v5454_v15  ;;  %v665_v26 = vld [vmem:[#allocation10 + $0x1a0] sm:$0xff]  ;;  %1615 = vmatprep.subr.bf16.mxu0 %v5458_v57  ;;  %v5482_v17 = vcombine.high %v663_v12, %v667_v13  ;;  %v671_v22 = vld [vmem:[#allocation10 + $0x1d0] sm:$0xff] }
 0x101   : > { %v5478_v28 = vcombine.high %v661_v25, %v665_v26  ;;  %v669_v29 = vld [vmem:[#allocation10 + $0x1c0] sm:$0xff]  ;;  %v5477_v31 = vcombine.low %v661_v25, %v665_v26  ;;  %v5481_v25 = vcombine.low %v663_v12, %v667_v13  ;;  %v687_v38 = vld [vmem:[#allocation10 + $0x250] sm:$0xff]  ;;  %v650_v12 = vld [vmem:[#allocation10 + $0x128] sm:$0xff] }
 0x102   : > { %v673_v30 = vld [vmem:[#allocation10 + $0x1e0] sm:$0xff]  ;;  %v691_v39 = vld [vmem:[#allocation10 + $0x270] sm:$0xff] }
 0x103   : > { %1470 = vmatpush1.bf16.msra.mxu1 %v5453_v19  ;;  %v5486_v32 = vcombine.high %v669_v29, %v673_v30  ;;  %v677_v33 = vld [vmem:[#allocation10 + $0x200] sm:$0xff]  ;;  %v5485_v41 = vcombine.low %v669_v29, %v673_v30  ;;  %1616 = vmatpush1.bf16.msra.mxu0 %v5457_v0  ;;  %v679_v30 = vld [vmem:[#allocation10 + $0x210] sm:$0xff]  ;;  %v5506_v42 = vcombine.high %v687_v38, %v691_v39 }
 0x104   : > { %1471 = vmatprep.subr.bf16.mxu1 %v5462_v20  ;;  %v681_v34 = vld [vmem:[#allocation10 + $0x220] sm:$0xff]  ;;  %1617 = vmatprep.subr.bf16.mxu0 %v5466_v1  ;;  %v707_v56 = vld [vmem:[#allocation10 + $0x2f0] sm:$0xff] }
 0x105   : > { %v5494_v45 = vcombine.high %v677_v33, %v681_v34  ;;  %v685_v46 = vld [vmem:[#allocation10 + $0x240] sm:$0xff]  ;;  %v5493_v50 = vcombine.low %v677_v33, %v681_v34  ;;  %v711_v0 = vld [vmem:[#allocation10 + $0x310] sm:$0xff] }
 0x106   : > { %v689_v47 = vld [vmem:[#allocation10 + $0x260] sm:$0xff]  ;;  %v715_v1 = vld [vmem:[#allocation10 + $0x330] sm:$0xff] }
 0x107   : > { %1472 = vmatpush1.bf16.msra.mxu1 %v5461_v23  ;;  %v5502_v53 = vcombine.high %v685_v46, %v689_v47  ;;  %v693_v54 = vld [vmem:[#allocation10 + $0x280] sm:$0xff]  ;;  %v5501_v58 = vcombine.low %v685_v46, %v689_v47  ;;  %1618 = vmatpush1.bf16.msra.mxu0 %v5465_v8  ;;  %v675_v23 = vld [vmem:[#allocation10 + $0x1f0] sm:$0xff]  ;;  %v5529_v13 = vcombine.low %v711_v0, %v715_v1 }
 0x108   : > { %1473 = vmatprep.subr.bf16.mxu1 %v5470_v24  ;;  %v697_v55 = vld [vmem:[#allocation10 + $0x2a0] sm:$0xff]  ;;  %1619 = vmatprep.subr.bf16.mxu0 %v5474_v9  ;;  %v5490_v26 = vcombine.high %v671_v22, %v675_v23  ;;  %v5489_v33 = vcombine.low %v671_v22, %v675_v23  ;;  %v695_v46 = vld [vmem:[#allocation10 + $0x290] sm:$0xff] }
 0x109   : > { %v5510_v61 = vcombine.high %v693_v54, %v697_v55  ;;  %v701_v62 = vld [vmem:[#allocation10 + $0x2c0] sm:$0xff]  ;;  %v5509_v2 = vcombine.low %v693_v54, %v697_v55  ;;  %v699_v47 = vld [vmem:[#allocation10 + $0x2b0] sm:$0xff] }
 0x10a   : > { %v705_v63 = vld [vmem:[#allocation10 + $0x2e0] sm:$0xff]  ;;  %v5514_v51 = vcombine.high %v695_v46, %v699_v47  ;;  %v7359_v54 = vld [vmem:[%s7321_s22 + $0x14] ss:$8 sps:$4 sm:$0xff]   ;;  %v5513_v59 = vcombine.low %v695_v46, %v699_v47  ;;  %v7364_v3 = vld [vmem:[%s7321_s22 + $0x10] ss:$8 sps:$4 sm:$0xff]  }
 0x10b   : > { %1474 = vmatpush1.bf16.msra.mxu1 %v5469_v27  ;;  %v5518_v5 = vcombine.high %v701_v62, %v705_v63  ;;  %v709_v6 = vld [vmem:[#allocation10 + $0x300] sm:$0xff]  ;;  %v5517_v10 = vcombine.low %v701_v62, %v705_v63  ;;  %1620 = vmatpush1.bf16.msra.mxu0 %v5473_v16  ;;  %v703_v55 = vld [vmem:[#allocation10 + $0x2d0] sm:$0xff]  ;;  %v638_v62 = vld [vmem:[#allocation10 + $0xc8] sm:$0xff] }
 0x10c   : > { %1475 = vmatprep.subr.bf16.mxu1 %v5478_v28  ;;  %v713_v7 = vld [vmem:[#allocation10 + $0x320] sm:$0xff]  ;;  %1621 = vmatprep.subr.bf16.mxu0 %v5482_v17  ;;  %v5522_v60 = vcombine.high %v703_v55, %v707_v56  ;;  %v642_v63 = vld [vmem:[#allocation10 + $0xe8] sm:$0xff]  ;;  %v5521_v4 = vcombine.low %v703_v55, %v707_v56  ;;  %v719_v9 = vld [vmem:[#allocation10 + $0x350] sm:$0xff] }
 0x10d   : > { %v717_v11 = vld [vmem:[#allocation10 + $0x340] sm:$0xff]  ;;  %v5526_v14 = vcombine.high %v709_v6, %v713_v7  ;;  %v5525_v19 = vcombine.low %v709_v6, %v713_v7  ;;  %v646_v7 = vld [vmem:[#allocation10 + $0x108] sm:$0xff] }
 0x10e   : > { %v721_v15 = vld [vmem:[#allocation10 + $0x360] sm:$0xff]  ;;  %v654_v16 = vld [vmem:[#allocation10 + $0x148] sm:$0xff] }
 0x10f   : > { %1476 = vmatpush1.bf16.msra.mxu1 %v5477_v31  ;;  %v725_v20 = vld [vmem:[#allocation10 + $0x380] sm:$0xff]  ;;  %v5534_v24 = vcombine.high %v717_v11, %v721_v15  ;;  %v5533_v27 = vcombine.low %v717_v11, %v721_v15  ;;  %v683_v31 = vld [vmem:[#allocation10 + $0x230] sm:$0xff]  ;;  %1622 = vmatpush1.bf16.msra.mxu0 %v5481_v25  ;;  %v5456_v11 = vcombine.high %v638_v62, %v642_v63  ;;  %v658_v17 = vld [vmem:[#allocation10 + $0x168] sm:$0xff] }
 0x110   : > { %1477 = vmatprep.subr.bf16.mxu1 %v5486_v32  ;;  %v729_v21 = vld [vmem:[#allocation10 + $0x3a0] sm:$0xff]  ;;  %1623 = vmatprep.subr.bf16.mxu0 %v5490_v26  ;;  %v5498_v34 = vcombine.high %v679_v30, %v683_v31  ;;  %v5455_v15 = vcombine.low %v638_v62, %v642_v63  ;;  %v5463_v25 = vcombine.low %v646_v7, %v650_v12  ;;  %v662_v26 = vld [vmem:[#allocation10 + $0x188] sm:$0xff] }
 0x111   : > { %v733_v28 = vld [vmem:[#allocation10 + $0x3c0] sm:$0xff]  ;;  %v5542_v32 = vcombine.high %v725_v20, %v729_v21  ;;  %v5541_v35 = vcombine.low %v725_v20, %v729_v21  ;;  %v731_v20 = vld [vmem:[#allocation10 + $0x3b0] sm:$0xff]  ;;  %v5464_v21 = vcombine.high %v646_v7, %v650_v12  ;;  %v694_v56 = vld [vmem:[#allocation10 + $0x288] sm:$0xff] }
 0x112   : > { %v737_v29 = vld [vmem:[#allocation10 + $0x3e0] sm:$0xff]  ;;  %v706_v62 = vld [vmem:[#allocation10 + $0x2e8] sm:$0xff] }
 0x113   : > { %1478 = vmatpush1.bf16.msra.mxu1 %v5485_v41  ;;  %v5550_v40 = vcombine.high %v733_v28, %v737_v29  ;;  %1624 = vmatpush1.bf16.msra.mxu0 %v5489_v33  ;;  %v5497_v41 = vcombine.low %v679_v30, %v683_v31  ;;  %v5549_v43 = vcombine.low %v733_v28, %v737_v29  ;;  %v7367_v8 = vld [vmem:[%s7321_s22 + $0x24] ss:$8 sps:$4 sm:$0xff]   ;;  %v7372_v22 = vld [vmem:[%s7321_s22 + $0x20] ss:$8 sps:$4 sm:$0xff]   ;;  %v735_v28 = vld [vmem:[#allocation10 + $0x3d0] sm:$0xff] }
 0x114   : > { %1479 = vmatprep.subr.bf16.mxu1 %v5494_v45  ;;  %1625 = vmatprep.subr.bf16.mxu0 %v5498_v34  ;;  %v626_v45 = vld [vmem:[#allocation10 + $0x68] sm:$0xff]  ;;  %v739_v29 = vld [vmem:[#allocation10 + $0x3f0] sm:$0xff]  ;;  %v5472_v30 = vcombine.high %v654_v16, %v658_v17  ;;  %v5471_v34 = vcombine.low %v654_v16, %v658_v17 }
 0x115   : > { %v5440_v57 = vcombine.high %v622_v44, %v626_v45  ;;  %v666_v31 = vld [vmem:[#allocation10 + $0x1a8] sm:$0xff]  ;;  %v5554_v33 = vcombine.high %v735_v28, %v739_v29  ;;  %v6167_v46 = vld [vmem:[#allocation11 + $0x24] ss:$16 sps:$4 sm:$0xff]   ;;  %v6177_v63 = vld [vmem:[#allocation11 + $0x60] ss:$16 sps:$4 sm:$0xff]  }
 0x116   : > { %v5480_v37 = vcombine.high %v662_v26, %v666_v31  ;;  %v722_v12 = vld [vmem:[#allocation10 + $0x368] sm:$0xff] }
 0x117   : > { %1480 = vmatpush1.bf16.msra.mxu1 %v5493_v50  ;;  %1626 = vmatpush1.bf16.msra.mxu0 %v5497_v41  ;;  %v5505_v50 = vcombine.low %v687_v38, %v691_v39  ;;  %v7380_v38 = vld [vmem:[%s7321_s22 + $0x30] ss:$8 sps:$4 sm:$0xff]   ;;  %v6161_v39 = vld [vmem:[#allocation11 + $0x4] ss:$16 sps:$4 sm:$0xff]   ;;  %v5479_v41 = vcombine.low %v662_v26, %v666_v31  ;;  %v726_v17 = vld [vmem:[#allocation10 + $0x388] sm:$0xff] }
 0x118   : > { %1481 = vmatprep.subr.bf16.mxu1 %v5502_v53  ;;  %1627 = vmatprep.subr.bf16.mxu0 %v5506_v42  ;;  %v630_v53 = vld [vmem:[#allocation10 + $0x88] sm:$0xff] }
 0x119   : > { %v678_v42 = vld [vmem:[#allocation10 + $0x208] sm:$0xff] }
 0x11a   : > { %v738_v26 = vld [vmem:[#allocation10 + $0x3e8] sm:$0xff] }
 0x11b   : > { %1482 = vmatpush1.bf16.msra.mxu1 %v5501_v58  ;;  %v634_v58 = vld [vmem:[#allocation10 + $0xa8] sm:$0xff]  ;;  %1628 = vmatpush1.bf16.msra.mxu0 %v5505_v50 }
 0x11c   : > { %1483 = vmatprep.subr.bf16.mxu1 %v5510_v61  ;;  %1629 = vmatprep.subr.bf16.mxu0 %v5514_v51  ;;  %v5439_v61 = vcombine.low %v622_v44, %v626_v45  ;;  %v5447_v6 = vcombine.low %v630_v53, %v634_v58  ;;  %v6159_v44 = vld [vmem:[#allocation11] ss:$16 sps:$4 sm:$0xff]   ;;  %v690_v50 = vld [vmem:[#allocation10 + $0x268] sm:$0xff] }
 0x11d   : > { %v6165_v51 = vld [vmem:[#allocation11 + $0x20] ss:$16 sps:$4 sm:$0xff]  }
 0x11f   : > { %1484 = vmatpush1.bf16.msra.mxu1 %v5509_v2  ;;  %v5448_v2 = vcombine.high %v630_v53, %v634_v58  ;;  %1630 = vmatpush1.bf16.msra.mxu0 %v5513_v59  ;;  %v6173_v53 = vld [vmem:[#allocation11 + $0x44] ss:$16 sps:$4 sm:$0xff]   ;;  %v6171_v58 = vld [vmem:[#allocation11 + $0x40] ss:$16 sps:$4 sm:$0xff]  }
 0x120   : > { %1485 = vmatprep.subr.bf16.mxu1 %v5518_v5  ;;  %1631 = vmatprep.subr.bf16.mxu0 %v5522_v60  ;;  %v5530_v5 = vcombine.high %v711_v0, %v715_v1  ;;  %v6179_v60 = vld [vmem:[#allocation11 + $0x64] ss:$16 sps:$4 sm:$0xff]  }
 0x121   : > { %v6185_v1 = vld [vmem:[#allocation11 + $0x84] ss:$16 sps:$4 sm:$0xff]  }
 0x123   : > { %1486 = vmatpush1.bf16.msra.mxu1 %v5517_v10  ;;  %v723_v10 = vld [vmem:[#allocation10 + $0x370] sm:$0xff]  ;;  %1632 = vmatpush1.bf16.msra.mxu0 %v5521_v4  ;;  %v710_v4 = vld [vmem:[#allocation10 + $0x308] sm:$0xff] }
 0x124   : > { %1487 = vmatprep.subr.bf16.mxu1 %v5526_v14  ;;  %1633 = vmatprep.subr.bf16.mxu0 %v5530_v5  ;;  %v5538_v14 = vcombine.high %v719_v9, %v723_v10  ;;  %v5537_v23 = vcombine.low %v719_v9, %v723_v10  ;;  %v714_v5 = vld [vmem:[#allocation10 + $0x328] sm:$0xff]  ;;  %v6191_v9 = vld [vmem:[#allocation11 + $0xa4] ss:$16 sps:$4 sm:$0xff]  }
 0x125   : > { %v5527_v16 = vcombine.low %v710_v4, %v714_v5 }
 0x127   : > { %1488 = vmatpush1.bf16.msra.mxu1 %v5525_v19  ;;  %v727_v19 = vld [vmem:[#allocation10 + $0x390] sm:$0xff]  ;;  %1634 = vmatpush1.bf16.msra.mxu0 %v5529_v13 }
 0x128   : > { %1489 = vmatprep.subr.bf16.mxu1 %v5534_v24  ;;  %1635 = vmatprep.subr.bf16.mxu0 %v5538_v14  ;;  %v5546_v24 = vcombine.high %v727_v19, %v731_v20  ;;  %v6189_v13 = vld [vmem:[#allocation11 + $0xa0] ss:$16 sps:$4 sm:$0xff]   ;;  %v5528_v14 = vcombine.high %v710_v4, %v714_v5  ;;  %v672_v5 = vld [vmem:[#allocation10 + $0x1d8] sm:$0xff] }
 0x12b   : > { %1490 = vmatpush1.bf16.msra.mxu1 %v5533_v27  ;;  %v7375_v27 = vld [vmem:[%s7321_s22 + $0x34] ss:$8 sps:$4 sm:$0xff]   ;;  %1636 = vmatpush1.bf16.msra.mxu0 %v5537_v23 }
 0x12c   : > { %1491 = vmatprep.subr.bf16.mxu1 %v5542_v32  ;;  %v5545_v32 = vcombine.low %v727_v19, %v731_v20  ;;  %1637 = vmatprep.subr.bf16.mxu0 %v5546_v24  ;;  %v730_v19 = vld [vmem:[#allocation10 + $0x3a8] sm:$0xff]  ;;  %v6195_v20 = vld [vmem:[#allocation11 + $0xc0] ss:$16 sps:$4 sm:$0xff]   ;;  %v6203_v23 = vld [vmem:[#allocation11 + $0xe4] ss:$16 sps:$4 sm:$0xff]  }
 0x12d   : > { %v5543_v31 = vcombine.low %v726_v17, %v730_v19 }
 0x12f   : > { %1492 = vmatpush1.bf16.msra.mxu1 %v5541_v35  ;;  %v670_v35 = vld [vmem:[#allocation10 + $0x1c8] sm:$0xff]  ;;  %1638 = vmatpush1.bf16.msra.mxu0 %v5545_v32  ;;  %v616_v32 = vld [vmem:[#allocation10 + $0x18] sm:$0xff] }
 0x130   : > { %1493 = vmatprep.subr.bf16.mxu1 %v5550_v40  ;;  %v5553_v40 = vcombine.low %v735_v28, %v739_v29  ;;  %1639 = vmatprep.subr.bf16.mxu0 %v5554_v33  ;;  %v5488_v45 = vcombine.high %v670_v35, %v674_v36  ;;  %v5487_v47 = vcombine.low %v670_v35, %v674_v36  ;;  %v6201_v28 = vld [vmem:[#allocation11 + $0xe0] ss:$16 sps:$4 sm:$0xff]   ;;  %v620_v33 = vld [vmem:[#allocation10 + $0x38] sm:$0xff]  ;;  %v6215_v36 = vld [vmem:[#allocation11 + $0x124] ss:$16 sps:$4 sm:$0xff]  }
 0x131   : > { %v5544_v29 = vcombine.high %v726_v17, %v730_v19  ;;  %v688_v17 = vld [vmem:[#allocation10 + $0x258] sm:$0xff]  ;;  %v6251_v19 = vld [vmem:[#allocation11 + $0x1e4] ss:$16 sps:$4 sm:$0xff]  }
 0x133   : > { %1494 = vmatpush1.bf16.msra.mxu1 %v5549_v43  ;;  %v682_v43 = vld [vmem:[#allocation10 + $0x228] sm:$0xff]  ;;  %1640 = vmatpush1.bf16.msra.mxu0 %v5553_v40  ;;  %v628_v40 = vld [vmem:[#allocation10 + $0x78] sm:$0xff] }
 0x134   : > { %1536 = vmatprep.subr.bf16.mxu1 %v5432_v49  ;;  %3697 = vmatprep.subr.bf16.mxu0 %v6161_v39  ;;  %v686_v49 = vld [vmem:[#allocation10 + $0x248] sm:$0xff]  ;;  %v5495_v55 = vcombine.low %v678_v42, %v682_v43  ;;  %v624_v39 = vld [vmem:[#allocation10 + $0x58] sm:$0xff] }
 0x135   : > { %v5504_v59 = vcombine.high %v686_v49, %v690_v50 }
 0x136   : > { %1496 = vmatmul.mubr.bf16.vlgmr.msra.gmra.mrb[0].mxu1 %v7356_v48  ;;  %1642 = vmatmul.mubr.bf16.vlgmr.msra.gmra.mrb[0].mxu0 %v7356_v48 }
 0x137   : > { %1537 = vmatpush1.bf16.msra.mxu1 %v5431_v52  ;;  %1505 = vmatprep.mubr.bf16.mxu1 %v7359_v54  ;;  %v5496_v52 = vcombine.high %v678_v42, %v682_v43  ;;  %v5436_v42 = vcombine.high %v616_v32, %v620_v33  ;;  %v6221_v43 = vld [vmem:[#allocation11 + $0x144] ss:$16 sps:$4 sm:$0xff]  }
 0x138   : > { %1538 = vmatprep.subr.bf16.mxu1 %v5440_v57  ;;  %1651 = vmatprep.mubr.bf16.mxu0 %v7359_v54  ;;  %v698_v57 = vld [vmem:[#allocation10 + $0x2a8] sm:$0xff] }
 0x139   : > { %3698 = vmatpush1.bf16.msra.mxu0 %v6159_v44  ;;  %v5512_v0 = vcombine.high %v694_v56, %v698_v57  ;;  %v5435_v44 = vcombine.low %v616_v32, %v620_v33  ;;  %v708_v32 = vld [vmem:[#allocation10 + $0x2f8] sm:$0xff] }
 0x13a   : > { %3699 = vmatprep.subr.bf16.mxu0 %v6167_v46  ;;  %v636_v46 = vld [vmem:[#allocation10 + $0xb8] sm:$0xff] }
 0x13b   : > { %1539 = vmatpush1.bf16.msra.mxu1 %v5439_v61  ;;  %v702_v61 = vld [vmem:[#allocation10 + $0x2c8] sm:$0xff] }
 0x13c   : > { %1540 = vmatprep.subr.bf16.mxu1 %v5448_v2  ;;  %v5511_v2 = vcombine.low %v694_v56, %v698_v57  ;;  %v5520_v7 = vcombine.high %v702_v61, %v706_v62  ;;  %v5519_v10 = vcombine.low %v702_v61, %v706_v62  ;;  %v6233_v57 = vld [vmem:[#allocation11 + $0x184] ss:$16 sps:$4 sm:$0xff]   ;;  %v656_v61 = vld [vmem:[#allocation10 + $0x158] sm:$0xff] }
 0x13d   : > { %3700 = vmatpush1.bf16.msra.mxu0 %v6165_v51  ;;  %v5443_v51 = vcombine.low %v624_v39, %v628_v40  ;;  %v660_v62 = vld [vmem:[#allocation10 + $0x178] sm:$0xff] }
 0x13e   : > { %1506 = vmatmul.mubr.bf16.gmra.mrb[4].mxu1 %v7364_v3  ;;  %3701 = vmatprep.subr.bf16.mxu0 %v6173_v53  ;;  %v644_v53 = vld [vmem:[#allocation10 + $0xf8] sm:$0xff]  ;;  %v5476_v4 = vcombine.high %v656_v61, %v660_v62 }
 0x13f   : > { %1541 = vmatpush1.bf16.msra.mxu1 %v5447_v6  ;;  %1515 = vmatprep.mubr.bf16.mxu1 %v7367_v8  ;;  %v6183_v6 = vld [vmem:[#allocation11 + $0x80] ss:$16 sps:$4 sm:$0xff]  }
 0x140   : > { %1542 = vmatprep.subr.bf16.mxu1 %v5456_v11  ;;  %1652 = vmatmul.mubr.bf16.gmra.mrb[4].mxu0 %v7364_v3  ;;  %v718_v11 = vld [vmem:[#allocation10 + $0x348] sm:$0xff] }
 0x141   : > { %1661 = vmatprep.mubr.bf16.mxu0 %v7367_v8  ;;  %3702 = vmatpush1.bf16.msra.mxu0 %v6171_v58  ;;  %v5535_v24 = vcombine.low %v718_v11, %v722_v12 }
 0x142   : > { %3703 = vmatprep.subr.bf16.mxu0 %v6179_v60  ;;  %v652_v60 = vld [vmem:[#allocation10 + $0x138] sm:$0xff] }
 0x143   : > { %1543 = vmatpush1.bf16.msra.mxu1 %v5455_v15  ;;  %v6197_v15 = vld [vmem:[#allocation11 + $0xc4] ss:$16 sps:$4 sm:$0xff]  }
 0x144   : > { %1544 = vmatprep.subr.bf16.mxu1 %v5464_v21  ;;  %v5536_v21 = vcombine.high %v718_v11, %v722_v12  ;;  %v680_v12 = vld [vmem:[#allocation10 + $0x218] sm:$0xff] }
 0x145   : > { %3704 = vmatpush1.bf16.msra.mxu0 %v6177_v63 }
 0x146   : > { %1516 = vmatmul.mubr.bf16.gmra.mrb[8].mxu1 %v7372_v22  ;;  %3705 = vmatprep.subr.bf16.mxu0 %v6185_v1  ;;  %v664_v1 = vld [vmem:[#allocation10 + $0x198] sm:$0xff] }
 0x147   : > { %1545 = vmatpush1.bf16.msra.mxu1 %v5463_v25  ;;  %1525 = vmatprep.mubr.bf16.mxu1 %v7375_v27  ;;  %v734_v25 = vld [vmem:[#allocation10 + $0x3c8] sm:$0xff] }
 0x148   : > { %1546 = vmatprep.subr.bf16.mxu1 %v5472_v30  ;;  %1662 = vmatmul.mubr.bf16.gmra.mrb[8].mxu0 %v7372_v22  ;;  %v6209_v30 = vld [vmem:[#allocation11 + $0x104] ss:$16 sps:$4 sm:$0xff]   ;;  %v5552_v35 = vcombine.high %v734_v25, %v738_v26 }
 0x149   : > { %1671 = vmatprep.mubr.bf16.mxu0 %v7375_v27  ;;  %3706 = vmatpush1.bf16.msra.mxu0 %v6183_v6  ;;  %v6239_v6 = vld [vmem:[#allocation11 + $0x1a4] ss:$16 sps:$4 sm:$0xff]  }
 0x14a   : > { %3707 = vmatprep.subr.bf16.mxu0 %v6191_v9  ;;  %v6237_v9 = vld [vmem:[#allocation11 + $0x1a0] ss:$16 sps:$4 sm:$0xff]  }
 0x14b   : > { %1547 = vmatpush1.bf16.msra.mxu1 %v5471_v34  ;;  %v6207_v34 = vld [vmem:[#allocation11 + $0x100] ss:$16 sps:$4 sm:$0xff]  }
 0x14c   : > { %1548 = vmatprep.subr.bf16.mxu1 %v5480_v37  ;;  %v5551_v37 = vcombine.low %v734_v25, %v738_v26  ;;  %v6257_v25 = vld [vmem:[#allocation11 + $0x204] ss:$16 sps:$4 sm:$0xff]   ;;  %v696_v26 = vld [vmem:[#allocation10 + $0x298] sm:$0xff] }
 0x14d   : > { %3708 = vmatpush1.bf16.msra.mxu0 %v6189_v13  ;;  %v6245_v13 = vld [vmem:[#allocation11 + $0x1c4] ss:$16 sps:$4 sm:$0xff]  }
 0x14e   : > { %1526 = vmatmul.mubr.bf16.gmra.mrb[12].mxu1 %v7380_v38  ;;  %3709 = vmatprep.subr.bf16.mxu0 %v6197_v15  ;;  %v6671_v15 = vld [vmem:[%s7321_s22 + $0x4] ss:$8 sps:$4 sm:$0xff]  }
 0x14f   : > { %1549 = vmatpush1.bf16.msra.mxu1 %v5479_v41  ;;  %1568 = vmatprep.mubr.bf16.mxu1 %v7351_v18  ;;  %v5503_v18 = vcombine.low %v686_v49, %v690_v50  ;;  %v6213_v41 = vld [vmem:[#allocation11 + $0x120] ss:$16 sps:$4 sm:$0xff]   ;;  %v5444_v49 = vcombine.high %v624_v39, %v628_v40  ;;  %v6227_v50 = vld [vmem:[#allocation11 + $0x164] ss:$16 sps:$4 sm:$0xff]   ;;  %v720_v40 = vld [vmem:[#allocation10 + $0x358] sm:$0xff] }
 0x150   : > { %1550 = vmatprep.subr.bf16.mxu1 %v5488_v45  ;;  %1672 = vmatmul.mubr.bf16.gmra.mrb[12].mxu0 %v7380_v38  ;;  %v632_v45 = vld [vmem:[#allocation10 + $0x98] sm:$0xff] }
 0x151   : > { %3710 = vmatpush1.bf16.msra.mxu0 %v6195_v20  ;;  %v5452_v56 = vcombine.high %v632_v45, %v636_v46  ;;  %v5451_v58 = vcombine.low %v632_v45, %v636_v46  ;;  %v692_v20 = vld [vmem:[#allocation10 + $0x278] sm:$0xff] }
 0x152   : > { %3711 = vmatprep.subr.bf16.mxu0 %v6203_v23  ;;  %v732_v45 = vld [vmem:[#allocation10 + $0x3b8] sm:$0xff] }
 0x153   : > { %1551 = vmatpush1.bf16.msra.mxu1 %v5487_v47  ;;  %v6219_v47 = vld [vmem:[#allocation11 + $0x140] ss:$16 sps:$4 sm:$0xff]  }
 0x154   : > { %1552 = vmatprep.subr.bf16.mxu1 %v5496_v52  ;;  %v640_v52 = vld [vmem:[#allocation10 + $0xd8] sm:$0xff] }
 0x155   : > { %3712 = vmatpush1.bf16.msra.mxu0 %v6201_v28  ;;  %v700_v28 = vld [vmem:[#allocation10 + $0x2b8] sm:$0xff] }
 0x156   : > { %3713 = vmatprep.subr.bf16.mxu0 %v6209_v30  ;;  %v5516_v30 = vcombine.high %v696_v26, %v700_v28  ;;  %v5515_v33 = vcombine.low %v696_v26, %v700_v28  ;;  %v743_v26 = vlaneseq }
 0x157   : > { %1553 = vmatpush1.bf16.msra.mxu1 %v5495_v55  ;;  %v6225_v55 = vld [vmem:[#allocation11 + $0x160] ss:$16 sps:$4 sm:$0xff]  }
 0x158   : > { %1554 = vmatprep.subr.bf16.mxu1 %v5504_v59  ;;  %v648_v59 = vld [vmem:[#allocation10 + $0x118] sm:$0xff]  ;;  %v7406_v28 = vshrl.u32 %v743_v26, 7 }
 0x159   : > { %3714 = vmatpush1.bf16.msra.mxu0 %v6207_v34  ;;  %v5468_v63 = vcombine.high %v648_v59, %v652_v60 }
 0x15a   : > { %3715 = vmatprep.subr.bf16.mxu0 %v6215_v36  ;;  %v716_v36 = vld [vmem:[#allocation10 + $0x338] sm:$0xff] }
 0x15b   : > { %1555 = vmatpush1.bf16.msra.mxu1 %v5503_v18  ;;  %v6231_v18 = vld [vmem:[#allocation11 + $0x180] ss:$16 sps:$4 sm:$0xff]  }
 0x15c   : > { %1556 = vmatprep.subr.bf16.mxu1 %v5512_v0  ;;  %v5467_v0 = vcombine.low %v648_v59, %v652_v60  ;;  %v6168_v59 = vld [vmem:[#allocation11 + $0x28] ss:$16 sps:$4 sm:$0xff]   ;;  %v6673_v60 = vld [vmem:[%s7321_s22 + $0x14] ss:$8 sps:$4 sm:$0xff]  }
 0x15d   : > { %3716 = vmatpush1.bf16.msra.mxu0 %v6213_v41  ;;  %v724_v41 = vld [vmem:[#allocation10 + $0x378] sm:$0xff] }
 0x15e   : > { %3717 = vmatprep.subr.bf16.mxu0 %v6221_v43  ;;  %v5540_v43 = vcombine.high %v720_v40, %v724_v41  ;;  %v5539_v46 = vcombine.low %v720_v40, %v724_v41 }
 0x15f   : > { %1557 = vmatpush1.bf16.msra.mxu1 %v5511_v2  ;;  %v668_v2 = vld [vmem:[#allocation10 + $0x1b8] sm:$0xff] }
 0x160   : > { %1558 = vmatprep.subr.bf16.mxu1 %v5520_v7  ;;  %v676_v7 = vld [vmem:[#allocation10 + $0x1f8] sm:$0xff] }
 0x161   : > { %3718 = vmatpush1.bf16.msra.mxu0 %v6219_v47  ;;  %v5492_v11 = vcombine.high %v672_v5, %v676_v7 }
 0x162   : > { %3719 = vmatprep.subr.bf16.mxu0 %v6227_v50  ;;  %v740_v50 = vld [vmem:[#allocation10 + $0x3f8] sm:$0xff] }
 0x163   : > { %1559 = vmatpush1.bf16.msra.mxu1 %v5519_v10  ;;  %v5483_v10 = vcombine.low %v664_v1, %v668_v2 }
 0x164   : > { %1560 = vmatprep.subr.bf16.mxu1 %v5528_v14  ;;  %v6243_v14 = vld [vmem:[#allocation11 + $0x1c0] ss:$16 sps:$4 sm:$0xff]  }
 0x165   : > { %3720 = vmatpush1.bf16.msra.mxu0 %v6225_v55  ;;  %v6164_v55 = vld [vmem:[#allocation11 + $0xc] ss:$16 sps:$4 sm:$0xff]  }
 0x166   : > { %3721 = vmatprep.subr.bf16.mxu0 %v6233_v57  ;;  %v6170_v57 = vld [vmem:[#allocation11 + $0x2c] ss:$16 sps:$4 sm:$0xff]  }
 0x167   : > { %1561 = vmatpush1.bf16.msra.mxu1 %v5527_v16 }
 0x168   : > { %1562 = vmatprep.subr.bf16.mxu1 %v5536_v21  ;;  %v6249_v21 = vld [vmem:[#allocation11 + $0x1e0] ss:$16 sps:$4 sm:$0xff]  }
 0x169   : > { %3722 = vmatpush1.bf16.msra.mxu0 %v6231_v18  ;;  %v6176_v18 = vld [vmem:[#allocation11 + $0x4c] ss:$16 sps:$4 sm:$0xff]  }
 0x16a   : > { %3723 = vmatprep.subr.bf16.mxu0 %v6239_v6  ;;  %v6198_v6 = vld [vmem:[#allocation11 + $0xc8] ss:$16 sps:$4 sm:$0xff]  }
 0x16b   : > { %1563 = vmatpush1.bf16.msra.mxu1 %v5535_v24  ;;  %v5508_v24 = vcombine.high %v688_v17, %v692_v20 }
 0x16c   : > { %1564 = vmatprep.subr.bf16.mxu1 %v5544_v29  ;;  %v5507_v29 = vcombine.low %v688_v17, %v692_v20  ;;  %v6242_v17 = vld [vmem:[#allocation11 + $0x1ac] ss:$16 sps:$4 sm:$0xff]  }
 0x16d   : > { %3724 = vmatpush1.bf16.msra.mxu0 %v6237_v9  ;;  %v6204_v9 = vld [vmem:[#allocation11 + $0xe8] ss:$16 sps:$4 sm:$0xff]   ;;  %v6248_v20 = vld [vmem:[#allocation11 + $0x1cc] ss:$16 sps:$4 sm:$0xff]  }
 0x16e   : > { %3725 = vmatprep.subr.bf16.mxu0 %v6245_v13  ;;  %v6216_v13 = vld [vmem:[#allocation11 + $0x128] ss:$16 sps:$4 sm:$0xff]  }
 0x16f   : > { %1565 = vmatpush1.bf16.msra.mxu1 %v5543_v31  ;;  %v704_v31 = vld [vmem:[#allocation10 + $0x2d8] sm:$0xff] }
 0x170   : > { %1566 = vmatprep.subr.bf16.mxu1 %v5552_v35  ;;  %v5524_v34 = vcombine.high %v704_v31, %v708_v32  ;;  %v712_v35 = vld [vmem:[#allocation10 + $0x318] sm:$0xff] }
 0x171   : > { %3726 = vmatpush1.bf16.msra.mxu0 %v6243_v14  ;;  %v5532_v39 = vcombine.high %v712_v35, %v716_v36  ;;  %v6222_v14 = vld [vmem:[#allocation11 + $0x148] ss:$16 sps:$4 sm:$0xff]  }
 0x172   : > { %3727 = vmatprep.subr.bf16.mxu0 %v6251_v19  ;;  %v6240_v19 = vld [vmem:[#allocation11 + $0x1a8] ss:$16 sps:$4 sm:$0xff]  }
 0x173   : > { %1567 = vmatpush1.bf16.msra.mxu1 %v5551_v37  ;;  %v5523_v37 = vcombine.low %v704_v31, %v708_v32  ;;  %v7417_v31 = vsub.s32 1, %v7406_v28 }
 0x174   : > { %1682 = vmatprep.subr.bf16.mxu1 %v5436_v42  ;;  %v5531_v42 = vcombine.low %v712_v35, %v716_v36 }
 0x175   : > { %3728 = vmatpush1.bf16.msra.mxu0 %v6249_v21  ;;  %v6246_v21 = vld [vmem:[#allocation11 + $0x1c8] ss:$16 sps:$4 sm:$0xff]  }
 0x176   : > { %1569 = vmatmul.mubr.bf16.vlgmr.msra.gmra.mrb[16].mxu1 %v7356_v48  ;;  %v5460_v48 = vcombine.high %v640_v52, %v644_v53  ;;  %3770 = vmatprep.subr.bf16.mxu0 %v6257_v25  ;;  %v6260_v25 = vld [vmem:[#allocation11 + $0x20c] ss:$16 sps:$4 sm:$0xff]  }
 0x177   : > { %1578 = vmatprep.mubr.bf16.mxu1 %v7359_v54  ;;  %1683 = vmatpush1.bf16.msra.mxu1 %v5435_v44  ;;  %v5459_v54 = vcombine.low %v640_v52, %v644_v53  ;;  %v728_v44 = vld [vmem:[#allocation10 + $0x398] sm:$0xff] }
 0x178   : > { %1684 = vmatprep.subr.bf16.mxu1 %v5444_v49  ;;  %v5548_v47 = vcombine.high %v728_v44, %v732_v45  ;;  %v736_v49 = vld [vmem:[#allocation10 + $0x3d8] sm:$0xff] }
 0x179   : > { %v5556_v52 = vcombine.high %v736_v49, %v740_v50  ;;  %v5555_v53 = vcombine.low %v736_v49, %v740_v50 }
 0x17b   : > { %1685 = vmatpush1.bf16.msra.mxu1 %v5443_v51  ;;  %v5547_v51 = vcombine.low %v728_v44, %v732_v45 }
 0x17c   : > { %1686 = vmatprep.subr.bf16.mxu1 %v5452_v56  ;;  %v6162_v56 = vld [vmem:[#allocation11 + $0x8] ss:$16 sps:$4 sm:$0xff]  }
 0x17e   : > { %1579 = vmatmul.mubr.bf16.gmra.mrb[20].mxu1 %v7364_v3  ;;  %v5475_v3 = vcombine.low %v656_v61, %v660_v62  ;;  %v6674_v61 = vld [vmem:[%s7321_s22 + $0x10] ss:$8 sps:$4 sm:$0xff]  }
 0x17f   : > { %1588 = vmatprep.mubr.bf16.mxu1 %v7367_v8  ;;  %1687 = vmatpush1.bf16.msra.mxu1 %v5451_v58  ;;  %v5484_v8 = vcombine.high %v664_v1, %v668_v2  ;;  %v6672_v58 = vld [vmem:[%s7321_s22] ss:$8 sps:$4 sm:$0xff]   ;;  %v6194_v2 = vld [vmem:[#allocation11 + $0xac] ss:$16 sps:$4 sm:$0xff]  }
 0x180   : > { %1688 = vmatprep.subr.bf16.mxu1 %v5460_v48  ;;  %v6174_v48 = vld [vmem:[#allocation11 + $0x48] ss:$16 sps:$4 sm:$0xff]  }
 0x181   : > { %v6180_v62 = vld [vmem:[#allocation11 + $0x68] ss:$16 sps:$4 sm:$0xff]  }
 0x182   : > { %v6186_v1 = vld [vmem:[#allocation11 + $0x88] ss:$16 sps:$4 sm:$0xff]  }
 0x183   : > { %1689 = vmatpush1.bf16.msra.mxu1 %v5459_v54  ;;  %v6182_v54 = vld [vmem:[#allocation11 + $0x6c] ss:$16 sps:$4 sm:$0xff]  }
 0x184   : > { %1690 = vmatprep.subr.bf16.mxu1 %v5468_v63  ;;  %v6675_v63 = vld [vmem:[%s7321_s22 + $0x24] ss:$8 sps:$4 sm:$0xff]  }
 0x186   : > { %1589 = vmatmul.mubr.bf16.gmra.mrb[24].mxu1 %v7372_v22  ;;  %v684_v22 = vld [vmem:[#allocation10 + $0x238] sm:$0xff] }
 0x187   : > { %1598 = vmatprep.mubr.bf16.mxu1 %v7375_v27  ;;  %1691 = vmatpush1.bf16.msra.mxu1 %v5467_v0  ;;  %v5491_v27 = vcombine.low %v672_v5, %v676_v7  ;;  %v5500_v16 = vcombine.high %v680_v12, %v684_v22  ;;  %v5499_v23 = vcombine.low %v680_v12, %v684_v22  ;;  %v6188_v0 = vld [vmem:[#allocation11 + $0x8c] ss:$16 sps:$4 sm:$0xff]  }
 0x188   : > { %1692 = vmatprep.subr.bf16.mxu1 %v5476_v4  ;;  %v6676_v4 = vld [vmem:[%s7321_s22 + $0x20] ss:$8 sps:$4 sm:$0xff]   ;;  %v6200_v5 = vld [vmem:[#allocation11 + $0xcc] ss:$16 sps:$4 sm:$0xff]  }
 0x189   : > { %v6206_v7 = vld [vmem:[#allocation11 + $0xec] ss:$16 sps:$4 sm:$0xff]  }
 0x18a   : > { %v6218_v12 = vld [vmem:[#allocation11 + $0x12c] ss:$16 sps:$4 sm:$0xff]  }
 0x18b   : > { %1693 = vmatpush1.bf16.msra.mxu1 %v5475_v3  ;;  %v6192_v3 = vld [vmem:[#allocation11 + $0xa8] ss:$16 sps:$4 sm:$0xff]   ;;  %v6224_v22 = vld [vmem:[#allocation11 + $0x14c] ss:$16 sps:$4 sm:$0xff]  }
 0x18c   : > { %1694 = vmatprep.subr.bf16.mxu1 %v5484_v8  ;;  %v6677_v8 = vld [vmem:[%s7321_s22 + $0x34] ss:$8 sps:$4 sm:$0xff]  }
 0x18e   : > { %1599 = vmatmul.mubr.bf16.gmra.mrb[28].mxu1 %v7380_v38 }
 0x18f   : > { %1695 = vmatpush1.bf16.msra.mxu1 %v5483_v10  ;;  %1714 = vmatprep.mubr.bf16.mxu1 %v6671_v15  ;;  %v6212_v10 = vld [vmem:[#allocation11 + $0x10c] ss:$16 sps:$4 sm:$0xff]   ;;  %v6228_v15 = vld [vmem:[#allocation11 + $0x168] ss:$16 sps:$4 sm:$0xff]  }
 0x190   : > { %1696 = vmatprep.subr.bf16.mxu1 %v5492_v11  ;;  %v6210_v11 = vld [vmem:[#allocation11 + $0x108] ss:$16 sps:$4 sm:$0xff]  }
 0x193   : > { %1697 = vmatpush1.bf16.msra.mxu1 %v5491_v27  ;;  %v6230_v27 = vld [vmem:[#allocation11 + $0x16c] ss:$16 sps:$4 sm:$0xff]  }
 0x194   : > { %1698 = vmatprep.subr.bf16.mxu1 %v5500_v16  ;;  %v6234_v16 = vld [vmem:[#allocation11 + $0x188] ss:$16 sps:$4 sm:$0xff]  }
 0x197   : > { %1699 = vmatpush1.bf16.msra.mxu1 %v5499_v23  ;;  %v6254_v23 = vld [vmem:[#allocation11 + $0x1ec] ss:$16 sps:$4 sm:$0xff]  }
 0x198   : > { %1700 = vmatprep.subr.bf16.mxu1 %v5508_v24  ;;  %v6252_v24 = vld [vmem:[#allocation11 + $0x1e8] ss:$16 sps:$4 sm:$0xff]  }
 0x19b   : > { %1701 = vmatpush1.bf16.msra.mxu1 %v5507_v29  ;;  %v7409_v29 = vsub.s32 0, %v7406_v28 }
 0x19c   : > { %1702 = vmatprep.subr.bf16.mxu1 %v5516_v30  ;;  %v7414_v30 = vld [vmem:[%s8019_s5] sm:$0xff] }
 0x19d   : > { %v7421_v32 = vrot.slane %v7414_v30, %v7409_v29 }
 0x19f   : > { %1703 = vmatpush1.bf16.msra.mxu1 %v5515_v33  ;;  %v7425_v33 = vrot.slane %v7414_v30, %v7417_v31 }
 0x1a0   : > { %1704 = vmatprep.subr.bf16.mxu1 %v5524_v34  ;;  %v1947_v34 = vld [vmem:[%s7328_s9] sm:$0xff] }
 0x1a1   : > { %v1979_v40 = vunpack.c.l.bf16 %v1947_v34 }
 0x1a3   : > { %1705 = vmatpush1.bf16.msra.mxu1 %v5523_v37 }
 0x1a4   : > { %1706 = vmatprep.subr.bf16.mxu1 %v5532_v39  ;;  %v1951_v39 = vld [vmem:[%s7328_s9 + $0x20] sm:$0xff] }
 0x1a5   : > { %v1987_v49 = vunpack.c.l.bf16 %v1951_v39 }
 0x1a7   : > { %1707 = vmatpush1.bf16.msra.mxu1 %v5531_v42 }
 0x1a8   : > { %1708 = vmatprep.subr.bf16.mxu1 %v5540_v43 }
 0x1ab   : > { %1709 = vmatpush1.bf16.msra.mxu1 %v5539_v46  ;;  %v1980_v46 = vunpack.c.h.bf16 %v1947_v34 }
 0x1ac   : > { %1710 = vmatprep.subr.bf16.mxu1 %v5548_v47 }
 0x1af   : > { %1711 = vmatpush1.bf16.msra.mxu1 %v5547_v51 }
 0x1b0   : > { %1712 = vmatprep.subr.bf16.mxu1 %v5556_v52 }
 0x1b3   : > { %1713 = vmatpush1.bf16.msra.mxu1 %v5555_v53  ;;  %v1988_v53 = vunpack.c.h.bf16 %v1951_v39 }
 0x1b4   : > { %3989 = vmatprep.subr.bf16.mxu1 %v6164_v55 }
 0x1b6   : > { %1715 = vmatmul.mubr.bf16.vlgmr.msra.gmra.mrb[32].mxu1 %v6672_v58  ;;  %v1955_v58 = vld [vmem:[%s7328_s9 + $0x40] sm:$0xff] }
 0x1b7   : > { %3990 = vmatpush1.bf16.msra.mxu1 %v6162_v56  ;;  %1724 = vmatprep.mubr.bf16.mxu1 %v6673_v60 }
 0x1b8   : > { %3991 = vmatprep.subr.bf16.mxu1 %v6170_v57 }
 0x1bb   : > { %3992 = vmatpush1.bf16.msra.mxu1 %v6168_v59 }
 0x1bc   : > { %3993 = vmatprep.subr.bf16.mxu1 %v6176_v18 }
 0x1be   : > { %1725 = vmatmul.mubr.bf16.gmra.mrb[36].mxu1 %v6674_v61 }
 0x1bf   : > { %3994 = vmatpush1.bf16.msra.mxu1 %v6174_v48  ;;  %1734 = vmatprep.mubr.bf16.mxu1 %v6675_v63 }
 0x1c0   : > { %3995 = vmatprep.subr.bf16.mxu1 %v6182_v54 }
 0x1c3   : > { %3996 = vmatpush1.bf16.msra.mxu1 %v6180_v62 }
 0x1c4   : > { %3997 = vmatprep.subr.bf16.mxu1 %v6188_v0  ;;  %v1959_v0 = vld [vmem:[%s7328_s9 + $0x60] sm:$0xff] }
 0x1c6   : > { %1735 = vmatmul.mubr.bf16.gmra.mrb[40].mxu1 %v6676_v4  ;;  %v6258_v4 = vld [vmem:[#allocation11 + $0x208] ss:$16 sps:$4 sm:$0xff]  }
 0x1c7   : > { %3998 = vmatpush1.bf16.msra.mxu1 %v6186_v1  ;;  %1744 = vmatprep.mubr.bf16.mxu1 %v6677_v8 }
 0x1c8   : > { %3999 = vmatprep.subr.bf16.mxu1 %v6194_v2  ;;  %v6255_v2 = vld [vmem:[#allocation11 + $0x200] ss:$16 sps:$4 sm:$0xff]  }
 0x1cb   : > { %4000 = vmatpush1.bf16.msra.mxu1 %v6192_v3 }
 0x1cc   : > { %4001 = vmatprep.subr.bf16.mxu1 %v6200_v5  ;;  %v1996_v5 = vunpack.c.h.bf16 %v1955_v58 }
 0x1ce   : > { %1745 = vmatmul.mubr.bf16.gmra.mrb[44].mxu1 %v7380_v38  ;;  %v6236_v38 = vld [vmem:[#allocation11 + $0x18c] ss:$16 sps:$4 sm:$0xff]  }
 0x1cf   : > { %4002 = vmatpush1.bf16.msra.mxu1 %v6198_v6  ;;  %v1995_v6 = vunpack.c.l.bf16 %v1955_v58 }
 0x1d0   : > { %4003 = vmatprep.subr.bf16.mxu1 %v6206_v7 }
 0x1d3   : > { %4004 = vmatpush1.bf16.msra.mxu1 %v6204_v9  ;;  %v6263_v9 = vld [vmem:[#allocation11 + $0x224] ss:$16 sps:$4 sm:$0xff]  }
 0x1d4   : > { %4005 = vmatprep.subr.bf16.mxu1 %v6212_v10 }
 0x1d7   : > { %4006 = vmatpush1.bf16.msra.mxu1 %v6210_v11 }
 0x1d8   : > { %4007 = vmatprep.subr.bf16.mxu1 %v6218_v12 }
 0x1db   : > { %4008 = vmatpush1.bf16.msra.mxu1 %v6216_v13  ;;  %v6266_v13 = vld [vmem:[#allocation11 + $0x22c] ss:$16 sps:$4 sm:$0xff]  }
 0x1dc   : > { %4009 = vmatprep.subr.bf16.mxu1 %v6224_v22 }
 0x1df   : > { %4010 = vmatpush1.bf16.msra.mxu1 %v6222_v14 }
 0x1e0   : > { %4011 = vmatprep.subr.bf16.mxu1 %v6230_v27  ;;  %v2003_v27 = vunpack.c.l.bf16 %v1959_v0 }
 0x1e3   : > { %4012 = vmatpush1.bf16.msra.mxu1 %v6228_v15 }
 0x1e4   : > { %4013 = vmatprep.subr.bf16.mxu1 %v6236_v38 }
 0x1e7   : > { %4014 = vmatpush1.bf16.msra.mxu1 %v6234_v16  ;;  %v2004_v16 = vunpack.c.h.bf16 %v1959_v0 }
 0x1e8   : > { %4015 = vmatprep.subr.bf16.mxu1 %v6242_v17 }
 0x1eb   : > { %4016 = vmatpush1.bf16.msra.mxu1 %v6240_v19 }
 0x1ec   : > { %4017 = vmatprep.subr.bf16.mxu1 %v6248_v20 }
 0x1ef   : > { %4018 = vmatpush1.bf16.msra.mxu1 %v6246_v21  ;;  %v1963_v21 = vld [vmem:[%s7328_s9 + $0x80] sm:$0xff] }
 0x1f0   : > { %4019 = vmatprep.subr.bf16.mxu1 %v6254_v23  ;;  %v7441_v23 = vld [vmem:[%s7328_s9 + $0xa0] sm:$0xff] }
 0x1f3   : > { %4020 = vmatpush1.bf16.msra.mxu1 %v6252_v24  ;;  %v6261_v24 = vld [vmem:[#allocation11 + $0x220] ss:$16 sps:$4 sm:$0xff]  }
 0x1f4   : > { %4062 = vmatprep.subr.bf16.mxu1 %v6260_v25  ;;  %v6264_v25 = vld [vmem:[#allocation11 + $0x228] ss:$16 sps:$4 sm:$0xff]  }
 0x209   : > { %v1497_v35 = vpop.f32.mrb[0].mxu1 }
 0x20a   : > { %v1498_v36 = vadd.f32 %v1497_v35, %v7421_v32  ;;  %v1499_v37 = vpop.f32.mrb[1].mxu1  ;;  %v6269_v35 = vld [vmem:[#allocation11 + $0x244] ss:$16 sps:$4 sm:$0xff]  }
 0x20b   : > { %v1500_v41 = vadd.f32 %v1499_v37, %v7425_v33  ;;  %v1501_v42 = vpop.f32.mrb[2].mxu1 }
 0x20c   : > { %vm1755_vm0 = vcmp.ge.f32.partialorder %v1498_v36, 0.0  ;;  %v1819_v43 = vmul.f32 0.2, %v1498_v36  ;;  %v1502_v44 = vadd.f32 %v1501_v42, %v7421_v32  ;;  %v1503_v45 = vpop.f32.mrb[3].mxu1 }
 0x20d   : > { %vm1756_vm1 = vcmp.ge.f32.partialorder %v1500_v41, 0.0  ;;  %v1820_v47 = vmul.f32 0.2, %v1500_v41  ;;  %v1504_v50 = vadd.f32 %v1503_v45, %v7425_v33  ;;  %v2012_v45 = vunpack.c.h.bf16 %v1963_v21 }
 0x20e   : > { %v1883_v51 = vsel %vm1755_vm0, %v1498_v36, %v1819_v43  ;;  %vm1763_vm2 = vcmp.ge.f32.partialorder %v1502_v44, 0.0  ;;  %v1827_v52 = vmul.f32 0.2, %v1502_v44  ;;  %v6272_v36 = vld [vmem:[#allocation11 + $0x24c] ss:$16 sps:$4 sm:$0xff]  }
 0x20f   : > { %v1884_v55 = vsel %vm1756_vm1, %v1500_v41, %v1820_v47  ;;  %vm1764_vm3 = vcmp.ge.f32.partialorder %v1504_v50, 0.0  ;;  %v1828_v56 = vmul.f32 0.2, %v1504_v50  ;;  %v2043_v59 = vmul.f32 %v1979_v40, %v1883_v51  ;;  %v6267_v41 = vld [vmem:[#allocation11 + $0x240] ss:$16 sps:$4 sm:$0xff]  }
 0x210   : > { %v1891_v57 = vsel %vm1763_vm2, %v1502_v44, %v1827_v52  ;;  %v2044_v54 = vmul.f32 %v1980_v46, %v1884_v55  ;;  %v2020_v46 = vunpack.c.h.bf16 %v7441_v23  ;;  %v6270_v47 = vld [vmem:[#allocation11 + $0x248] ss:$16 sps:$4 sm:$0xff]   ;;  %v2019_v55 = vunpack.c.l.bf16 %v7441_v23 }
 0x211   : > { %v2051_v60 = vmul.f32 %v1987_v49, %v1891_v57  ;;  %v1892_v18 = vsel %vm1764_vm3, %v1504_v50, %v1828_v56  ;;  %v1507_v48 = vpop.f32.mrb[4].mxu1  ;;  %v6275_v49 = vld [vmem:[#allocation11 + $0x264] ss:$16 sps:$4 sm:$0xff]   ;;  %v6278_v56 = vld [vmem:[#allocation11 + $0x26c] ss:$16 sps:$4 sm:$0xff]  }
 0x212   : > { %v2052_v61 = vmul.f32 %v1988_v53, %v1892_v18  ;;  %v1508_v62 = vadd.f32 %v1507_v48, %v7421_v32  ;;  %v1509_v63 = vpop.f32.mrb[5].mxu1  ;;  %v2011_v53 = vunpack.c.l.bf16 %v1963_v21 }
 0x213   : > { %v2107_v1 = vpack.c.bf16 %v2051_v60, %v2043_v59  ;;  %v1510_v3 = vadd.f32 %v1509_v63, %v7425_v33  ;;  %v1511_v8 = vpop.f32.mrb[6].mxu1 }
 0x214   : > { %v2108_v7 = vpack.c.bf16 %v2052_v61, %v2044_v54  ;;  %vm1771_vm4 = vcmp.ge.f32.partialorder %v1508_v62, 0.0  ;;  %v1835_v10 = vmul.f32 0.2, %v1508_v62  ;;  %v1512_v11 = vadd.f32 %v1511_v8, %v7421_v32  ;;  %v1513_v12 = vpop.f32.mrb[7].mxu1  ;;  %v7450_v54 = vld [vmem:[%s7328_s9 + $0xc0] sm:$0xff] }
 0x215   : > { %vm1772_vm5 = vcmp.ge.f32.partialorder %v1510_v3, 0.0  ;;  %v1836_v22 = vmul.f32 0.2, %v1510_v3  ;;  %v1514_v14 = vadd.f32 %v1513_v12, %v7425_v33  ;;  %v7453_v61 = vld [vmem:[%s7328_s9 + $0xe0] sm:$0xff] }
 0x216   : > { %3729 = vmatprep.mubr.bf16.mxu0 %v2108_v7  ;;  %4021 = vmatprep.mubr.bf16.mxu1 %v2108_v7  ;;  %v1899_v15 = vsel %vm1771_vm4, %v1508_v62, %v1835_v10  ;;  %vm1779_vm6 = vcmp.ge.f32.partialorder %v1512_v11, 0.0  ;;  %v1843_v38 = vmul.f32 0.2, %v1512_v11  ;;  %v761_v62 = vsub.s32 4, %v7406_v28  ;;  %v6273_v8 = vld [vmem:[#allocation11 + $0x260] ss:$16 sps:$4 sm:$0xff]  }
 0x217   : > { %3730 = vmatmul.mubr.bf16.vlgmr.msra.gmra.mrb[16].mxu0 %v2107_v1  ;;  %4022 = vmatmul.mubr.bf16.vlgmr.msra.gmra.mrb[48].mxu1 %v2107_v1  ;;  %v1900_v17 = vsel %vm1772_vm5, %v1510_v3, %v1836_v22  ;;  %vm1780_vm7 = vcmp.ge.f32.partialorder %v1514_v14, 0.0  ;;  %v1844_v19 = vmul.f32 0.2, %v1514_v14  ;;  %v2059_v20 = vmul.f32 %v1995_v6, %v1899_v15  ;;  %v6281_v12 = vld [vmem:[#allocation11 + $0x284] ss:$16 sps:$4 sm:$0xff]  }
 0x218   : > { %3771 = vmatpush1.bf16.msra.mxu0 %v6255_v2  ;;  %4063 = vmatpush1.bf16.msra.mxu1 %v6258_v4  ;;  %v1907_v26 = vsel %vm1779_vm6, %v1512_v11, %v1843_v38  ;;  %v2060_v34 = vmul.f32 %v1996_v5, %v1900_v17  ;;  %v765_v1 = vsub.s32 5, %v7406_v28  ;;  %v6276_v5 = vld [vmem:[#allocation11 + $0x268] ss:$16 sps:$4 sm:$0xff]   ;;  %v2036_v10 = vunpack.c.h.bf16 %v7453_v61  ;;  %v7460_v11 = vld [vmem:[%s7328_s9 + $0x10] sm:$0xff] }
 0x219   : > { %3772 = vmatprep.subr.bf16.mxu0 %v6263_v9  ;;  %4064 = vmatprep.subr.bf16.mxu1 %v6266_v13  ;;  %v1908_v37 = vsel %vm1780_vm7, %v1514_v14, %v1844_v19  ;;  %v1517_v39 = vpop.f32.mrb[8].mxu1  ;;  %v2067_v40 = vmul.f32 %v2003_v27, %v1907_v26  ;;  %v2028_v9 = vunpack.c.h.bf16 %v7450_v54  ;;  %v6284_v13 = vld [vmem:[#allocation11 + $0x28c] ss:$16 sps:$4 sm:$0xff]   ;;  %v2027_v15 = vunpack.c.l.bf16 %v7450_v54  ;;  %v1953_v54 = vld [vmem:[%s7328_s9 + $0x30] sm:$0xff] }
 0x21a   : > { %v1518_v42 = vadd.f32 %v1517_v39, %v7421_v32  ;;  %v1519_v43 = vpop.f32.mrb[9].mxu1  ;;  %v2068_v44 = vmul.f32 %v2004_v16, %v1908_v37  ;;  %v7465_v38 = vrot.slane %v7414_v30, %v761_v62  ;;  %v6279_v16 = vld [vmem:[#allocation11 + $0x280] ss:$16 sps:$4 sm:$0xff]   ;;  %v2035_v21 = vunpack.c.l.bf16 %v7453_v61  ;;  %v6296_v62 = vld [vmem:[#allocation11 + $0x2cc] ss:$16 sps:$4 sm:$0xff]  }
 0x21b   : > { %v1520_v50 = vadd.f32 %v1519_v43, %v7425_v33  ;;  %v1521_v51 = vpop.f32.mrb[10].mxu1  ;;  %v2115_v52 = vpack.c.bf16 %v2067_v40, %v2059_v20  ;;  %v7470_v23 = vrot.slane %v7414_v30, %v765_v1  ;;  %v1983_v37 = vunpack.c.l.bf16 %v7460_v11 }
 0x21c   : > { %3773 = vmatpush1.bf16.msra.mxu0 %v6261_v24  ;;  %4065 = vmatpush1.bf16.msra.mxu1 %v6264_v25  ;;  %vm1787_vm8 = vcmp.ge.f32.partialorder %v1518_v42, 0.0  ;;  %v1851_v57 = vmul.f32 0.2, %v1518_v42  ;;  %v1522_v58 = vadd.f32 %v1521_v51, %v7421_v32  ;;  %v1523_v59 = vpop.f32.mrb[11].mxu1  ;;  %v2116_v60 = vpack.c.bf16 %v2068_v44, %v2060_v34  ;;  %v6282_v24 = vld [vmem:[#allocation11 + $0x288] ss:$16 sps:$4 sm:$0xff]  }
 0x21d   : > { %3774 = vmatprep.subr.bf16.mxu0 %v6269_v35  ;;  %4066 = vmatprep.subr.bf16.mxu1 %v6272_v36  ;;  %vm1788_vm9 = vcmp.ge.f32.partialorder %v1520_v50, 0.0  ;;  %v1852_v18 = vmul.f32 0.2, %v1520_v50  ;;  %v1524_v48 = vadd.f32 %v1523_v59, %v7425_v33  ;;  %v6287_v25 = vld [vmem:[#allocation11 + $0x2a4] ss:$16 sps:$4 sm:$0xff]   ;;  %v1643_v36 = vpop.f32.mrb[0].mxu0  ;;  %v1984_v39 = vunpack.c.h.bf16 %v7460_v11 }
 0x21e   : > { %v1915_v63 = vsel %vm1787_vm8, %v1518_v42, %v1851_v57  ;;  %vm1795_vm10 = vcmp.ge.f32.partialorder %v1522_v58, 0.0  ;;  %v1859_v0 = vmul.f32 0.2, %v1522_v58  ;;  %3739 = vmatprep.mubr.bf16.mxu0 %v2116_v60  ;;  %4031 = vmatprep.mubr.bf16.mxu1 %v2116_v60  ;;  %v1645_v44 = vpop.f32.mrb[1].mxu0  ;;  %v6285_v51 = vld [vmem:[#allocation11 + $0x2a0] ss:$16 sps:$4 sm:$0xff]  }
 0x21f   : > { %v1916_v2 = vsel %vm1788_vm9, %v1520_v50, %v1852_v18  ;;  %vm1796_vm11 = vcmp.ge.f32.partialorder %v1524_v48, 0.0  ;;  %v1860_v4 = vmul.f32 0.2, %v1524_v48  ;;  %3740 = vmatmul.mubr.bf16.gmra.mrb[20].mxu0 %v2115_v52  ;;  %4032 = vmatmul.mubr.bf16.gmra.mrb[52].mxu1 %v2115_v52  ;;  %v2075_v3 = vmul.f32 %v2011_v53, %v1915_v63  ;;  %v1647_v50 = vpop.f32.mrb[2].mxu0  ;;  %v6293_v59 = vld [vmem:[#allocation11 + $0x2c4] ss:$16 sps:$4 sm:$0xff]  }
 0x220   : > { %3775 = vmatpush1.bf16.msra.mxu0 %v6267_v41  ;;  %4067 = vmatpush1.bf16.msra.mxu1 %v6270_v47  ;;  %v1923_v6 = vsel %vm1795_vm10, %v1522_v58, %v1859_v0  ;;  %v2076_v7 = vmul.f32 %v2012_v45, %v1916_v2  ;;  %v6290_v45 = vld [vmem:[#allocation11 + $0x2ac] ss:$16 sps:$4 sm:$0xff]   ;;  %v6291_v2 = vld [vmem:[#allocation11 + $0x2c0] ss:$16 sps:$4 sm:$0xff]  }
 0x221   : > { %3776 = vmatprep.subr.bf16.mxu0 %v6275_v49  ;;  %4068 = vmatprep.subr.bf16.mxu1 %v6278_v56  ;;  %v1924_v22 = vsel %vm1796_vm11, %v1524_v48, %v1860_v4  ;;  %v1527_v14 = vpop.f32.mrb[12].mxu1  ;;  %v2083_v27 = vmul.f32 %v2019_v55, %v1923_v6  ;;  %v1644_v49 = vadd.f32 %v1643_v36, %v7465_v38  ;;  %v1649_v55 = vpop.f32.mrb[3].mxu0  ;;  %v6288_v56 = vld [vmem:[#allocation11 + $0x2a8] ss:$16 sps:$4 sm:$0xff]  }
 0x222   : > { %v1528_v17 = vadd.f32 %v1527_v14, %v7421_v32  ;;  %v1529_v19 = vpop.f32.mrb[13].mxu1  ;;  %v2084_v20 = vmul.f32 %v2020_v46, %v1924_v22  ;;  %v6294_v6 = vld [vmem:[#allocation11 + $0x2c8] ss:$16 sps:$4 sm:$0xff]   ;;  %v1992_v22 = vunpack.c.h.bf16 %v1953_v54  ;;  %v1653_v14 = vpop.f32.mrb[4].mxu0 }
 0x223   : > { %v1530_v26 = vadd.f32 %v1529_v19, %v7425_v33  ;;  %v1531_v34 = vpop.f32.mrb[14].mxu1  ;;  %v2123_v35 = vpack.c.bf16 %v2083_v27, %v2075_v3  ;;  %vm1759_vm0 = vcmp.ge.f32.partialorder %v1644_v49, 0.0  ;;  %v1823_v48 = vmul.f32 0.2, %v1644_v49  ;;  %v1655_v61 = vpop.f32.mrb[5].mxu0 }
 0x224   : > { %3777 = vmatpush1.bf16.msra.mxu0 %v6273_v8  ;;  %4069 = vmatpush1.bf16.msra.mxu1 %v6276_v5  ;;  %vm1803_vm12 = vcmp.ge.f32.partialorder %v1528_v17, 0.0  ;;  %v1867_v40 = vmul.f32 0.2, %v1528_v17  ;;  %v1532_v41 = vadd.f32 %v1531_v34, %v7421_v32  ;;  %v1533_v42 = vpop.f32.mrb[15].mxu1  ;;  %v2124_v43 = vpack.c.bf16 %v2084_v20, %v2076_v7  ;;  %v6299_v7 = vld [vmem:[#allocation11 + $0x2e4] ss:$16 sps:$4 sm:$0xff]  }
 0x225   : > { %3778 = vmatprep.subr.bf16.mxu0 %v6281_v12  ;;  %4070 = vmatprep.subr.bf16.mxu1 %v6284_v13  ;;  %vm1804_vm13 = vcmp.ge.f32.partialorder %v1530_v26, 0.0  ;;  %v1868_v46 = vmul.f32 0.2, %v1530_v26  ;;  %v1534_v47 = vadd.f32 %v1533_v42, %v7425_v33  ;;  %v1646_v32 = vadd.f32 %v1645_v44, %v7470_v23  ;;  %v6300_v36 = vld [vmem:[#allocation11 + $0x2e8] ss:$16 sps:$4 sm:$0xff]  }
 0x226   : > { %v1931_v52 = vsel %vm1803_vm12, %v1528_v17, %v1867_v40  ;;  %vm1811_vm14 = vcmp.ge.f32.partialorder %v1532_v41, 0.0  ;;  %v1875_v53 = vmul.f32 0.2, %v1532_v41  ;;  %3749 = vmatprep.mubr.bf16.mxu0 %v2124_v43  ;;  %4041 = vmatprep.mubr.bf16.mxu1 %v2124_v43  ;;  %v1887_v3 = vsel %vm1759_vm0, %v1644_v49, %v1823_v48  ;;  %v6305_v42 = vld [vmem:[#allocation11 + $0x304] ss:$16 sps:$4 sm:$0xff]  }
 0x227   : > { %v1932_v57 = vsel %vm1804_vm13, %v1530_v26, %v1868_v46  ;;  %vm1812_vm15 = vcmp.ge.f32.partialorder %v1534_v47, 0.0  ;;  %v1876_v58 = vmul.f32 0.2, %v1534_v47  ;;  %3750 = vmatmul.mubr.bf16.gmra.mrb[24].mxu0 %v2123_v35  ;;  %4042 = vmatmul.mubr.bf16.gmra.mrb[56].mxu1 %v2123_v35  ;;  %v2091_v33 = vmul.f32 %v2027_v15, %v1931_v52  ;;  %v6297_v35 = vld [vmem:[#allocation11 + $0x2e0] ss:$16 sps:$4 sm:$0xff]  }
 0x228   : > { %3779 = vmatpush1.bf16.msra.mxu0 %v6279_v16  ;;  %4071 = vmatpush1.bf16.msra.mxu1 %v6282_v24  ;;  %v1939_v60 = vsel %vm1811_vm14, %v1532_v41, %v1875_v53  ;;  %v2092_v18 = vmul.f32 %v2028_v9, %v1932_v57  ;;  %vm1760_vm1 = vcmp.ge.f32.partialorder %v1646_v32, 0.0  ;;  %v1824_v1 = vmul.f32 0.2, %v1646_v32  ;;  %v6306_v57 = vld [vmem:[#allocation11 + $0x308] ss:$16 sps:$4 sm:$0xff]  }
 0x229   : > { %3780 = vmatprep.subr.bf16.mxu0 %v6287_v25  ;;  %4072 = vmatprep.subr.bf16.mxu1 %v6290_v45  ;;  %v1940_v63 = vsel %vm1812_vm15, %v1534_v47, %v1876_v58  ;;  %v2099_v0 = vmul.f32 %v2035_v21, %v1939_v60  ;;  %v1648_v8 = vadd.f32 %v1647_v50, %v7465_v38  ;;  %v1991_v13 = vunpack.c.l.bf16 %v1953_v54  ;;  %v1657_v21 = vpop.f32.mrb[6].mxu0  ;;  %v1957_v50 = vld [vmem:[%s7328_s9 + $0x50] sm:$0xff]  ;;  %v6314_v54 = vld [vmem:[#allocation11 + $0x32c] ss:$16 sps:$4 sm:$0xff]  }
 0x22a   : > { %v2100_v4 = vmul.f32 %v2036_v10, %v1940_v63  ;;  %v1650_v5 = vadd.f32 %v1649_v55, %v7470_v23  ;;  %v1888_v12 = vsel %vm1760_vm1, %v1646_v32, %v1824_v1  ;;  %v6302_v10 = vld [vmem:[#allocation11 + $0x2ec] ss:$16 sps:$4 sm:$0xff]   ;;  %v2047_v16 = vmul.f32 %v1983_v37, %v1887_v3  ;;  %v1659_v34 = vpop.f32.mrb[7].mxu0  ;;  %v6311_v48 = vld [vmem:[#allocation11 + $0x324] ss:$16 sps:$4 sm:$0xff]  }
 0x22b   : > { %v2131_v9 = vpack.c.bf16 %v2099_v0, %v2091_v33  ;;  %vm1767_vm2 = vcmp.ge.f32.partialorder %v1648_v8, 0.0  ;;  %v1831_v15 = vmul.f32 0.2, %v1648_v8  ;;  %v1654_v19 = vadd.f32 %v1653_v14, %v7465_v38  ;;  %v1663_v32 = vpop.f32.mrb[8].mxu0 }
 0x22c   : > { %3781 = vmatpush1.bf16.msra.mxu0 %v6285_v51  ;;  %4073 = vmatpush1.bf16.msra.mxu1 %v6288_v56  ;;  %v2132_v27 = vpack.c.bf16 %v2100_v4, %v2092_v18  ;;  %vm1768_vm3 = vcmp.ge.f32.partialorder %v1650_v5, 0.0  ;;  %v1832_v17 = vmul.f32 0.2, %v1650_v5  ;;  %v1656_v20 = vadd.f32 %v1655_v61, %v7470_v23  ;;  %v1961_v51 = vld [vmem:[%s7328_s9 + $0x70] sm:$0xff] }
 0x22d   : > { %3782 = vmatprep.subr.bf16.mxu0 %v6293_v59  ;;  %4074 = vmatprep.subr.bf16.mxu1 %v6296_v62  ;;  %v1895_v24 = vsel %vm1767_vm2, %v1648_v8, %v1831_v15  ;;  %v2048_v25 = vmul.f32 %v1984_v39, %v1888_v12  ;;  %v1658_v26 = vadd.f32 %v1657_v21, %v7465_v38  ;;  %v1839_v41 = vmul.f32 0.2, %v1654_v19  ;;  %v6308_v39 = vld [vmem:[#allocation11 + $0x30c] ss:$16 sps:$4 sm:$0xff]   ;;  %v6303_v56 = vld [vmem:[#allocation11 + $0x300] ss:$16 sps:$4 sm:$0xff]  }
 0x22e   : > { %3759 = vmatprep.mubr.bf16.mxu0 %v2132_v27  ;;  %4051 = vmatprep.mubr.bf16.mxu1 %v2132_v27  ;;  %v2055_v37 = vmul.f32 %v1991_v13, %v1895_v24  ;;  %v1896_v40 = vsel %vm1768_vm3, %v1650_v5, %v1832_v17  ;;  %vm1775_vm4 = vcmp.ge.f32.partialorder %v1654_v19, 0.0  ;;  %vm1776_vm5 = vcmp.ge.f32.partialorder %v1656_v20, 0.0  ;;  %v1665_v59 = vpop.f32.mrb[9].mxu0  ;;  %v6309_v4 = vld [vmem:[#allocation11 + $0x320] ss:$16 sps:$4 sm:$0xff]  }
 0x22f   : > { %3760 = vmatmul.mubr.bf16.gmra.mrb[28].mxu0 %v2131_v9  ;;  %4052 = vmatmul.mubr.bf16.gmra.mrb[60].mxu1 %v2131_v9  ;;  %v2056_v43 = vmul.f32 %v1992_v22, %v1896_v40  ;;  %v1840_v11 = vmul.f32 0.2, %v1656_v20  ;;  %vm1783_vm6 = vcmp.ge.f32.partialorder %v1658_v26, 0.0  ;;  %v1847_v45 = vmul.f32 0.2, %v1658_v26  ;;  %v1667_v0 = vpop.f32.mrb[10].mxu0 }
 0x230   : > { %3783 = vmatpush1.bf16.msra.mxu0 %v6291_v2  ;;  %4075 = vmatpush1.bf16.msra.mxu1 %v6294_v6  ;;  %v7494_v44 = vpack.c.bf16 %v2055_v37, %v2047_v16  ;;  %v1660_v46 = vadd.f32 %v1659_v34, %v7470_v23  ;;  %v1903_v52 = vsel %vm1775_vm4, %v1654_v19, %v1839_v41  ;;  %v2000_v55 = vunpack.c.h.bf16 %v1957_v50  ;;  %v1669_v5 = vpop.f32.mrb[11].mxu0  ;;  %v6317_v22 = vld [vmem:[#allocation11 + $0x344] ss:$16 sps:$4 sm:$0xff]   ;;  %v6320_v15 = vld [vmem:[#allocation11 + $0x34c] ss:$16 sps:$4 sm:$0xff]  }
 0x231   : > { %3784 = vmatprep.subr.bf16.mxu0 %v6299_v7  ;;  %4076 = vmatprep.subr.bf16.mxu1 %v6302_v10  ;;  %v7497_v47 = vpack.c.bf16 %v2056_v43, %v2048_v25  ;;  %v1904_v49 = vsel %vm1776_vm5, %v1656_v20, %v1840_v11  ;;  %v1911_v58 = vsel %vm1783_vm6, %v1658_v26, %v1847_v45  ;;  %v2008_v60 = vunpack.c.h.bf16 %v1961_v51  ;;  %v6312_v7 = vld [vmem:[#allocation11 + $0x328] ss:$16 sps:$4 sm:$0xff]   ;;  %v1965_v17 = vld [vmem:[%s7328_s9 + $0x90] sm:$0xff]  ;;  %v1673_v34 = vpop.f32.mrb[12].mxu0  ;;  %v6326_v45 = vld [vmem:[#allocation11 + $0x36c] ss:$16 sps:$4 sm:$0xff]  }
 0x232   : > { %vm1784_vm7 = vcmp.ge.f32.partialorder %v1660_v46, 0.0  ;;  %v1848_v53 = vmul.f32 0.2, %v1660_v46  ;;  %v1664_v33 = vadd.f32 %v1663_v32, %v7465_v38  ;;  %v1999_v18 = vunpack.c.l.bf16 %v1957_v50  ;;  %v1969_v21 = vld [vmem:[%s7328_s9 + $0xb0] sm:$0xff]  ;;  %v6318_v40 = vld [vmem:[#allocation11 + $0x348] ss:$16 sps:$4 sm:$0xff]  }
 0x233   : > { %v1666_v63 = vadd.f32 %v1665_v59, %v7470_v23  ;;  %v2064_v1 = vmul.f32 %v2000_v55, %v1904_v49  ;;  %v2007_v2 = vunpack.c.l.bf16 %v1961_v51  ;;  %v1668_v8 = vadd.f32 %v1667_v0, %v7465_v38  ;;  %v6315_v37 = vld [vmem:[#allocation11 + $0x340] ss:$16 sps:$4 sm:$0xff]  }
 0x234   : > { %3785 = vmatpush1.bf16.msra.mxu0 %v6297_v35  ;;  %4077 = vmatpush1.bf16.msra.mxu1 %v6300_v36  ;;  %v1912_v62 = vsel %vm1784_vm7, %v1660_v46, %v1848_v53  ;;  %vm1791_vm8 = vcmp.ge.f32.partialorder %v1664_v33, 0.0  ;;  %v1855_v3 = vmul.f32 0.2, %v1664_v33  ;;  %v1670_v12 = vadd.f32 %v1669_v5, %v7470_v23 }
 0x235   : > { %3786 = vmatprep.subr.bf16.mxu0 %v6305_v42  ;;  %4078 = vmatprep.subr.bf16.mxu1 %v6308_v39  ;;  %v2072_v6 = vmul.f32 %v2008_v60, %v1912_v62  ;;  %vm1792_vm9 = vcmp.ge.f32.partialorder %v1666_v63, 0.0  ;;  %v1856_v9 = vmul.f32 0.2, %v1666_v63  ;;  %v2063_v13 = vmul.f32 %v1999_v18, %v1903_v52  ;;  %v1675_v42 = vpop.f32.mrb[13].mxu0  ;;  %v6323_v39 = vld [vmem:[#allocation11 + $0x364] ss:$16 sps:$4 sm:$0xff]  }
 0x236   : > { %vm1799_vm10 = vcmp.ge.f32.partialorder %v1668_v8, 0.0  ;;  %v1863_v14 = vmul.f32 0.2, %v1668_v8  ;;  %vm1800_vm11 = vcmp.ge.f32.partialorder %v1670_v12, 0.0  ;;  %v1864_v10 = vmul.f32 0.2, %v1670_v12 }
 0x237   : > { %v7507_v27 = vpack.c.bf16 %v2072_v6, %v2064_v1  ;;  %v1920_v61 = vsel %vm1792_vm9, %v1666_v63, %v1856_v9  ;;  %v2071_v16 = vmul.f32 %v2007_v2, %v1911_v58  ;;  %v1919_v19 = vsel %vm1791_vm8, %v1664_v33, %v1855_v3  ;;  %v1677_v49 = vpop.f32.mrb[14].mxu0  ;;  %v6321_v52 = vld [vmem:[#allocation11 + $0x360] ss:$16 sps:$4 sm:$0xff]   ;;  %v6329_v60 = vld [vmem:[#allocation11 + $0x384] ss:$16 sps:$4 sm:$0xff]  }
 0x238   : > { %3787 = vmatpush1.bf16.msra.mxu0 %v6303_v56  ;;  %4079 = vmatpush1.bf16.msra.mxu1 %v6306_v57  ;;  %v1927_v20 = vsel %vm1799_vm10, %v1668_v8, %v1863_v14  ;;  %v2016_v24 = vunpack.c.h.bf16 %v1965_v17  ;;  %v1928_v25 = vsel %vm1800_vm11, %v1670_v12, %v1864_v10  ;;  %v2024_v35 = vunpack.c.h.bf16 %v1969_v21  ;;  %v1679_v32 = vpop.f32.mrb[15].mxu0  ;;  %v6324_v56 = vld [vmem:[#allocation11 + $0x368] ss:$16 sps:$4 sm:$0xff]   ;;  %v1973_v2 = vld [vmem:[%s7328_s9 + $0xd0] sm:$0xff] }
 0x239   : > { %3788 = vmatprep.subr.bf16.mxu0 %v6311_v48  ;;  %4080 = vmatprep.subr.bf16.mxu1 %v6314_v54  ;;  %v7512_v26 = vpack.c.bf16 %v2071_v16, %v2063_v13  ;;  %v2015_v36 = vunpack.c.l.bf16 %v1965_v17  ;;  %v1674_v41 = vadd.f32 %v1673_v34, %v7465_v38  ;;  %v2023_v11 = vunpack.c.l.bf16 %v1969_v21  ;;  %v6327_v3 = vld [vmem:[#allocation11 + $0x380] ss:$16 sps:$4 sm:$0xff]   ;;  %v6330_v8 = vld [vmem:[#allocation11 + $0x388] ss:$16 sps:$4 sm:$0xff]   ;;  %v6335_v12 = vld [vmem:[#allocation11 + $0x3a4] ss:$16 sps:$4 sm:$0xff]  }
 0x23a   : > { %v2080_v43 = vmul.f32 %v2016_v24, %v1920_v61  ;;  %v1676_v46 = vadd.f32 %v1675_v42, %v7470_v23  ;;  %v2088_v50 = vmul.f32 %v2024_v35, %v1928_v25  ;;  %v1678_v53 = vadd.f32 %v1677_v49, %v7465_v38  ;;  %v6332_v38 = vld [vmem:[#allocation11 + $0x38c] ss:$16 sps:$4 sm:$0xff]   ;;  %v6336_v21 = vld [vmem:[#allocation11 + $0x3a8] ss:$16 sps:$4 sm:$0xff]   ;;  %v6341_v34 = vld [vmem:[#allocation11 + $0x3c4] ss:$16 sps:$4 sm:$0xff]  }
 0x23b   : > { %v2079_v51 = vmul.f32 %v2015_v36, %v1919_v19  ;;  %v2087_v55 = vmul.f32 %v2023_v11, %v1927_v20  ;;  %v1871_v57 = vmul.f32 0.2, %v1674_v41  ;;  %v1680_v33 = vadd.f32 %v1679_v32, %v7470_v23  ;;  %v6338_v13 = vld [vmem:[#allocation11 + $0x3ac] ss:$16 sps:$4 sm:$0xff]   ;;  %v6333_v20 = vld [vmem:[#allocation11 + $0x3a0] ss:$16 sps:$4 sm:$0xff]  }
 0x23c   : > { %3789 = vmatpush1.bf16.msra.mxu0 %v6309_v4  ;;  %4081 = vmatpush1.bf16.msra.mxu1 %v6312_v7  ;;  %v1872_v58 = vmul.f32 0.2, %v1676_v46  ;;  %v7518_v59 = vpack.c.bf16 %v2088_v50, %v2080_v43  ;;  %vm1807_vm12 = vcmp.ge.f32.partialorder %v1674_v41, 0.0  ;;  %vm1808_vm13 = vcmp.ge.f32.partialorder %v1676_v46, 0.0  ;;  %v1977_v4 = vld [vmem:[%s7328_s9 + $0xf0] sm:$0xff]  ;;  %v1948_v19 = vld [vmem:[%s7328_s9 + $0x8] sm:$0xff] }
 0x23d   : > { %3790 = vmatprep.subr.bf16.mxu0 %v6317_v22  ;;  %4082 = vmatprep.subr.bf16.mxu1 %v6320_v15  ;;  %v1879_v18 = vmul.f32 0.2, %v1678_v53  ;;  %v7520_v48 = vpack.c.bf16 %v2087_v55, %v2079_v51  ;;  %vm1815_vm14 = vcmp.ge.f32.partialorder %v1678_v53, 0.0  ;;  %vm1816_vm15 = vcmp.ge.f32.partialorder %v1680_v33, 0.0  ;;  %v6344_v35 = vld [vmem:[#allocation11 + $0x3cc] ss:$16 sps:$4 sm:$0xff]  }
 0x23e   : > { %v1880_v54 = vmul.f32 0.2, %v1680_v33  ;;  %v753_v23 = vsub.s32 2, %v7406_v28  ;;  %v757_v62 = vsub.s32 3, %v7406_v28  ;;  %v1935_v63 = vsel %vm1807_vm12, %v1674_v41, %v1871_v57  ;;  %v6339_v11 = vld [vmem:[#allocation11 + $0x3c0] ss:$16 sps:$4 sm:$0xff]  }
 0x23f   : > { %v1936_v0 = vsel %vm1808_vm13, %v1676_v46, %v1872_v58  ;;  %v1943_v5 = vsel %vm1815_vm14, %v1678_v53, %v1879_v18  ;;  %v2032_v6 = vunpack.c.h.bf16 %v1973_v2  ;;  %v2040_v7 = vunpack.c.h.bf16 %v1977_v4  ;;  %v6347_v50 = vld [vmem:[#allocation11 + $0x3e4] ss:$16 sps:$4 sm:$0xff]   ;;  %v6350_v55 = vld [vmem:[#allocation11 + $0x3ec] ss:$16 sps:$4 sm:$0xff]  }
 0x240   : > { %3791 = vmatpush1.bf16.msra.mxu0 %v6315_v37  ;;  %4083 = vmatpush1.bf16.msra.mxu1 %v6318_v40  ;;  %v1944_v1 = vsel %vm1816_vm15, %v1680_v33, %v1880_v54  ;;  %v2031_v9 = vunpack.c.l.bf16 %v1973_v2  ;;  %v2039_v22 = vunpack.c.l.bf16 %v1977_v4  ;;  %v7529_v14 = vrot.slane %v7414_v30, %v753_v23  ;;  %v1952_v40 = vld [vmem:[%s7328_s9 + $0x28] sm:$0xff]  ;;  %v6353_v4 = vld [vmem:[#allocation11 + $0x404] ss:$16 sps:$4 sm:$0xff]  }
 0x241   : > { %3792 = vmatprep.subr.bf16.mxu0 %v6323_v39  ;;  %4084 = vmatprep.subr.bf16.mxu1 %v6326_v45  ;;  %v2096_v15 = vmul.f32 %v2032_v6, %v1936_v0  ;;  %v2104_v61 = vmul.f32 %v2040_v7, %v1944_v1  ;;  %v7534_v16 = vrot.slane %v7414_v30, %v757_v62  ;;  %v1981_v41 = vunpack.c.l.bf16 %v1948_v19  ;;  %v6342_v39 = vld [vmem:[#allocation11 + $0x3c8] ss:$16 sps:$4 sm:$0xff]  }
 0x242   : > { %v2095_v10 = vmul.f32 %v2031_v9, %v1935_v63  ;;  %v2103_v17 = vmul.f32 %v2039_v22, %v1943_v5  ;;  %v1982_v51 = vunpack.c.h.bf16 %v1948_v19  ;;  %v1989_v53 = vunpack.c.l.bf16 %v1952_v40  ;;  %v6348_v54 = vld [vmem:[#allocation11 + $0x3e8] ss:$16 sps:$4 sm:$0xff]   ;;  %v6351_v22 = vld [vmem:[#allocation11 + $0x400] ss:$16 sps:$4 sm:$0xff]  }
 0x243   : > { %v7537_v24 = vpack.c.bf16 %v2104_v61, %v2096_v15  ;;  %v1990_v58 = vunpack.c.h.bf16 %v1952_v40  ;;  %v1956_v63 = vld [vmem:[%s7328_s9 + $0x48] sm:$0xff] }
 0x244   : > { %3793 = vmatpush1.bf16.msra.mxu0 %v6321_v52  ;;  %4085 = vmatpush1.bf16.msra.mxu1 %v6324_v56  ;;  %v7539_v36 = vpack.c.bf16 %v2103_v17, %v2095_v10  ;;  %v6354_v15 = vld [vmem:[#allocation11 + $0x408] ss:$16 sps:$4 sm:$0xff]   ;;  %v1998_v17 = vunpack.c.h.bf16 %v1956_v63  ;;  %v1997_v19 = vunpack.c.l.bf16 %v1956_v63 }
 0x245   : > { %3794 = vmatprep.subr.bf16.mxu0 %v6329_v60  ;;  %4086 = vmatprep.subr.bf16.mxu1 %v6332_v38  ;;  %v6345_v38 = vld [vmem:[#allocation11 + $0x3e0] ss:$16 sps:$4 sm:$0xff]   ;;  %v6366_v63 = vld [vmem:[#allocation11 + $0x448] ss:$16 sps:$4 sm:$0xff]  }
 0x248   : > { %3795 = vmatpush1.bf16.msra.mxu0 %v6327_v3  ;;  %4087 = vmatpush1.bf16.msra.mxu1 %v6330_v8  ;;  %v6356_v3 = vld [vmem:[#allocation11 + $0x40c] ss:$16 sps:$4 sm:$0xff]  }
 0x249   : > { %v1570_v25 = vpop.f32.mrb[16].mxu1  ;;  %3796 = vmatprep.subr.bf16.mxu0 %v6335_v12  ;;  %4088 = vmatprep.subr.bf16.mxu1 %v6338_v13  ;;  %v1960_v12 = vld [vmem:[%s7328_s9 + $0x68] sm:$0xff] }
 0x24a   : > { %v1571_v37 = vadd.f32 %v1570_v25, %v7529_v14  ;;  %v1572_v30 = vpop.f32.mrb[17].mxu1 }
 0x24b   : > { %v1573_v42 = vadd.f32 %v1572_v30, %v7534_v16  ;;  %v1574_v43 = vpop.f32.mrb[18].mxu1 }
 0x24c   : > { %vm1757_vm0 = vcmp.ge.f32.partialorder %v1571_v37, 0.0  ;;  %v1821_v45 = vmul.f32 0.2, %v1571_v37  ;;  %v1575_v46 = vadd.f32 %v1574_v43, %v7529_v14  ;;  %3797 = vmatpush1.bf16.msra.mxu0 %v6333_v20  ;;  %4089 = vmatpush1.bf16.msra.mxu1 %v6336_v21  ;;  %v1576_v49 = vpop.f32.mrb[19].mxu1  ;;  %v6359_v21 = vld [vmem:[#allocation11 + $0x424] ss:$16 sps:$4 sm:$0xff]  }
 0x24d   : > { %vm1758_vm1 = vcmp.ge.f32.partialorder %v1573_v42, 0.0  ;;  %v1822_v52 = vmul.f32 0.2, %v1573_v42  ;;  %v1577_v32 = vadd.f32 %v1576_v49, %v7534_v16  ;;  %3798 = vmatprep.subr.bf16.mxu0 %v6341_v34  ;;  %4090 = vmatprep.subr.bf16.mxu1 %v6344_v35  ;;  %v6357_v49 = vld [vmem:[#allocation11 + $0x420] ss:$16 sps:$4 sm:$0xff]  }
 0x24e   : > { %v1885_v56 = vsel %vm1757_vm0, %v1571_v37, %v1821_v45  ;;  %vm1765_vm2 = vcmp.ge.f32.partialorder %v1575_v46, 0.0  ;;  %v1829_v57 = vmul.f32 0.2, %v1575_v46  ;;  %v6362_v37 = vld [vmem:[#allocation11 + $0x42c] ss:$16 sps:$4 sm:$0xff]  }
 0x24f   : > { %v1886_v33 = vsel %vm1758_vm1, %v1573_v42, %v1822_v52  ;;  %vm1766_vm3 = vcmp.ge.f32.partialorder %v1577_v32, 0.0  ;;  %v1830_v60 = vmul.f32 0.2, %v1577_v32  ;;  %v2045_v0 = vmul.f32 %v1981_v41, %v1885_v56 }
 0x250   : > { %v1893_v18 = vsel %vm1765_vm2, %v1575_v46, %v1829_v57  ;;  %3799 = vmatpush1.bf16.msra.mxu0 %v6339_v11  ;;  %4091 = vmatpush1.bf16.msra.mxu1 %v6342_v39  ;;  %v2046_v5 = vmul.f32 %v1982_v51, %v1886_v33  ;;  %v2005_v41 = vunpack.c.l.bf16 %v1960_v12  ;;  %v2006_v11 = vunpack.c.h.bf16 %v1960_v12  ;;  %v6374_v12 = vld [vmem:[#allocation11 + $0x46c] ss:$16 sps:$4 sm:$0xff]  }
 0x251   : > { %v2053_v1 = vmul.f32 %v1989_v53, %v1893_v18  ;;  %v1894_v2 = vsel %vm1766_vm3, %v1577_v32, %v1830_v60  ;;  %3800 = vmatprep.subr.bf16.mxu0 %v6347_v50  ;;  %4092 = vmatprep.subr.bf16.mxu1 %v6350_v55  ;;  %v1580_v8 = vpop.f32.mrb[20].mxu1  ;;  %v6360_v50 = vld [vmem:[#allocation11 + $0x428] ss:$16 sps:$4 sm:$0xff]   ;;  %v6365_v32 = vld [vmem:[#allocation11 + $0x444] ss:$16 sps:$4 sm:$0xff]  }
 0x252   : > { %v2054_v6 = vmul.f32 %v1990_v58, %v1894_v2  ;;  %v1581_v7 = vadd.f32 %v1580_v8, %v7529_v14  ;;  %v1582_v9 = vpop.f32.mrb[21].mxu1  ;;  %v1964_v53 = vld [vmem:[%s7328_s9 + $0x88] sm:$0xff]  ;;  %v6371_v8 = vld [vmem:[#allocation11 + $0x464] ss:$16 sps:$4 sm:$0xff]  }
 0x253   : > { %v2109_v13 = vpack.c.bf16 %v2053_v1, %v2045_v0  ;;  %v1583_v61 = vadd.f32 %v1582_v9, %v7534_v16  ;;  %v1584_v10 = vpop.f32.mrb[22].mxu1  ;;  %v6368_v55 = vld [vmem:[#allocation11 + $0x44c] ss:$16 sps:$4 sm:$0xff]  }
 0x254   : > { %3801 = vmatpush1.bf16.msra.mxu0 %v6345_v38  ;;  %4093 = vmatpush1.bf16.msra.mxu1 %v6348_v54  ;;  %v2110_v20 = vpack.c.bf16 %v2054_v6, %v2046_v5  ;;  %vm1773_vm4 = vcmp.ge.f32.partialorder %v1581_v7, 0.0  ;;  %v1837_v25 = vmul.f32 0.2, %v1581_v7  ;;  %v1585_v34 = vadd.f32 %v1584_v10, %v7529_v14  ;;  %v1586_v35 = vpop.f32.mrb[23].mxu1  ;;  %v1968_v38 = vld [vmem:[%s7328_s9 + $0xa8] sm:$0xff] }
 0x255   : > { %3843 = vmatprep.subr.bf16.mxu0 %v6353_v4  ;;  %4135 = vmatprep.subr.bf16.mxu1 %v6356_v3  ;;  %vm1774_vm5 = vcmp.ge.f32.partialorder %v1583_v61, 0.0  ;;  %v1838_v30 = vmul.f32 0.2, %v1583_v61  ;;  %v1587_v40 = vadd.f32 %v1586_v35, %v7534_v16  ;;  %v6363_v54 = vld [vmem:[#allocation11 + $0x440] ss:$16 sps:$4 sm:$0xff]   ;;  %v2014_v4 = vunpack.c.h.bf16 %v1964_v53 }
 0x256   : > { %3802 = vmatprep.mubr.bf16.mxu0 %v2110_v20  ;;  %4094 = vmatprep.mubr.bf16.mxu1 %v2110_v20  ;;  %v1901_v42 = vsel %vm1773_vm4, %v1581_v7, %v1837_v25  ;;  %vm1781_vm6 = vcmp.ge.f32.partialorder %v1585_v34, 0.0  ;;  %v1845_v43 = vmul.f32 0.2, %v1585_v34  ;;  %v2013_v3 = vunpack.c.l.bf16 %v1964_v53  ;;  %v6369_v25 = vld [vmem:[#allocation11 + $0x460] ss:$16 sps:$4 sm:$0xff]  }
 0x257   : > { %3803 = vmatmul.mubr.bf16.vlgmr.msra.gmra.mrb[16].mxu0 %v2109_v13  ;;  %4095 = vmatmul.mubr.bf16.vlgmr.msra.gmra.mrb[48].mxu1 %v2109_v13  ;;  %v1902_v39 = vsel %vm1774_vm5, %v1583_v61, %v1838_v30  ;;  %vm1782_vm7 = vcmp.ge.f32.partialorder %v1587_v40, 0.0  ;;  %v1846_v45 = vmul.f32 0.2, %v1587_v40  ;;  %v2061_v46 = vmul.f32 %v1997_v19, %v1901_v42  ;;  %v1972_v30 = vld [vmem:[%s7328_s9 + $0xc8] sm:$0xff] }
 0x258   : > { %3844 = vmatpush1.bf16.msra.mxu0 %v6351_v22  ;;  %4136 = vmatpush1.bf16.msra.mxu1 %v6354_v15  ;;  %v1909_v51 = vsel %vm1781_vm6, %v1585_v34, %v1845_v43  ;;  %v2062_v52 = vmul.f32 %v1998_v17, %v1902_v39  ;;  %v2021_v15 = vunpack.c.l.bf16 %v1968_v38  ;;  %v2022_v17 = vunpack.c.h.bf16 %v1968_v38  ;;  %v6372_v34 = vld [vmem:[#allocation11 + $0x468] ss:$16 sps:$4 sm:$0xff]   ;;  %v6386_v38 = vld [vmem:[#allocation11 + $0x4ac] ss:$16 sps:$4 sm:$0xff]  }
 0x259   : > { %3845 = vmatprep.subr.bf16.mxu0 %v6359_v21  ;;  %4137 = vmatprep.subr.bf16.mxu1 %v6362_v37  ;;  %v1910_v56 = vsel %vm1782_vm7, %v1587_v40, %v1846_v45  ;;  %v1590_v57 = vpop.f32.mrb[24].mxu1  ;;  %v2069_v58 = vmul.f32 %v2005_v41, %v1909_v51  ;;  %v6377_v40 = vld [vmem:[#allocation11 + $0x484] ss:$16 sps:$4 sm:$0xff]   ;;  %v6380_v41 = vld [vmem:[#allocation11 + $0x48c] ss:$16 sps:$4 sm:$0xff]  }
 0x25a   : > { %v1591_v33 = vadd.f32 %v1590_v57, %v7529_v14  ;;  %v1592_v60 = vpop.f32.mrb[25].mxu1  ;;  %v2070_v18 = vmul.f32 %v2006_v11, %v1910_v56  ;;  %v6378_v51 = vld [vmem:[#allocation11 + $0x488] ss:$16 sps:$4 sm:$0xff]   ;;  %v2029_v56 = vunpack.c.l.bf16 %v1972_v30  ;;  %v6383_v57 = vld [vmem:[#allocation11 + $0x4a4] ss:$16 sps:$4 sm:$0xff]  }
 0x25b   : > { %v1593_v0 = vadd.f32 %v1592_v60, %v7534_v16  ;;  %v1594_v1 = vpop.f32.mrb[26].mxu1  ;;  %v2117_v2 = vpack.c.bf16 %v2069_v58, %v2061_v46 }
 0x25c   : > { %3846 = vmatpush1.bf16.msra.mxu0 %v6357_v49  ;;  %4138 = vmatpush1.bf16.msra.mxu1 %v6360_v50  ;;  %vm1789_vm8 = vcmp.ge.f32.partialorder %v1591_v33, 0.0  ;;  %v1853_v5 = vmul.f32 0.2, %v1591_v33  ;;  %v1595_v6 = vadd.f32 %v1594_v1, %v7529_v14  ;;  %v1596_v7 = vpop.f32.mrb[27].mxu1  ;;  %v2118_v9 = vpack.c.bf16 %v2070_v18, %v2062_v52  ;;  %v1976_v49 = vld [vmem:[%s7328_s9 + $0xe8] sm:$0xff] }
 0x25d   : > { %3847 = vmatprep.subr.bf16.mxu0 %v6365_v32  ;;  %4139 = vmatprep.subr.bf16.mxu1 %v6368_v55  ;;  %vm1790_vm9 = vcmp.ge.f32.partialorder %v1593_v0, 0.0  ;;  %v1854_v13 = vmul.f32 0.2, %v1593_v0  ;;  %v1597_v22 = vadd.f32 %v1596_v7, %v7534_v16  ;;  %v6375_v50 = vld [vmem:[#allocation11 + $0x480] ss:$16 sps:$4 sm:$0xff]   ;;  %v2030_v55 = vunpack.c.h.bf16 %v1972_v30 }
 0x25e   : > { %v1917_v61 = vsel %vm1789_vm8, %v1591_v33, %v1853_v5  ;;  %vm1797_vm10 = vcmp.ge.f32.partialorder %v1595_v6, 0.0  ;;  %v1861_v10 = vmul.f32 0.2, %v1595_v6  ;;  %3812 = vmatprep.mubr.bf16.mxu0 %v2118_v9  ;;  %4104 = vmatprep.mubr.bf16.mxu1 %v2118_v9  ;;  %v6381_v5 = vld [vmem:[#allocation11 + $0x4a0] ss:$16 sps:$4 sm:$0xff]  }
 0x25f   : > { %v1918_v19 = vsel %vm1790_vm9, %v1593_v0, %v1854_v13  ;;  %vm1798_vm11 = vcmp.ge.f32.partialorder %v1597_v22, 0.0  ;;  %v1862_v20 = vmul.f32 0.2, %v1597_v22  ;;  %3813 = vmatmul.mubr.bf16.gmra.mrb[20].mxu0 %v2117_v2  ;;  %4105 = vmatmul.mubr.bf16.gmra.mrb[52].mxu1 %v2117_v2  ;;  %v2077_v21 = vmul.f32 %v2013_v3, %v1917_v61  ;;  %v6399_v30 = vld [vmem:[#allocation11 + $0x500] ss:$16 sps:$4 sm:$0xff]  }
 0x260   : > { %3848 = vmatpush1.bf16.msra.mxu0 %v6363_v54  ;;  %4140 = vmatpush1.bf16.msra.mxu1 %v6366_v63  ;;  %v1925_v35 = vsel %vm1797_vm10, %v1595_v6, %v1861_v10  ;;  %v2078_v37 = vmul.f32 %v2014_v4, %v1918_v19  ;;  %v2037_v0 = vunpack.c.l.bf16 %v1976_v49  ;;  %v2038_v4 = vunpack.c.h.bf16 %v1976_v49  ;;  %v6384_v6 = vld [vmem:[#allocation11 + $0x4a8] ss:$16 sps:$4 sm:$0xff]   ;;  %v6387_v10 = vld [vmem:[#allocation11 + $0x4c0] ss:$16 sps:$4 sm:$0xff]   ;;  %v6419_v49 = vld [vmem:[#allocation11 + $0x564] ss:$16 sps:$4 sm:$0xff]  }
 0x261   : > { %3849 = vmatprep.subr.bf16.mxu0 %v6371_v8  ;;  %4141 = vmatprep.subr.bf16.mxu1 %v6374_v12  ;;  %v1926_v42 = vsel %vm1798_vm11, %v1597_v22, %v1862_v20  ;;  %v1600_v43 = vpop.f32.mrb[28].mxu1  ;;  %v2085_v11 = vmul.f32 %v2021_v15, %v1925_v35  ;;  %v6392_v12 = vld [vmem:[#allocation11 + $0x4cc] ss:$16 sps:$4 sm:$0xff]   ;;  %v6395_v20 = vld [vmem:[#allocation11 + $0x4e4] ss:$16 sps:$4 sm:$0xff]  }
 0x262   : > { %v1601_v39 = vadd.f32 %v1600_v43, %v7529_v14  ;;  %v1602_v45 = vpop.f32.mrb[29].mxu1  ;;  %v2086_v46 = vmul.f32 %v2022_v17, %v1926_v42  ;;  %v6390_v17 = vld [vmem:[#allocation11 + $0x4c8] ss:$16 sps:$4 sm:$0xff]   ;;  %v6401_v35 = vld [vmem:[#allocation11 + $0x504] ss:$16 sps:$4 sm:$0xff]  }
 0x263   : > { %v1603_v52 = vadd.f32 %v1602_v45, %v7534_v16  ;;  %v1604_v53 = vpop.f32.mrb[30].mxu1  ;;  %v2125_v32 = vpack.c.bf16 %v2085_v11, %v2077_v21  ;;  %v6398_v21 = vld [vmem:[#allocation11 + $0x4ec] ss:$16 sps:$4 sm:$0xff]   ;;  %v6405_v43 = vld [vmem:[#allocation11 + $0x520] ss:$16 sps:$4 sm:$0xff]  }
 0x264   : > { %3850 = vmatpush1.bf16.msra.mxu0 %v6369_v25  ;;  %4142 = vmatpush1.bf16.msra.mxu1 %v6372_v34  ;;  %vm1805_vm12 = vcmp.ge.f32.partialorder %v1601_v39, 0.0  ;;  %v1869_v58 = vmul.f32 0.2, %v1601_v39  ;;  %v1605_v33 = vadd.f32 %v1604_v53, %v7529_v14  ;;  %v1606_v60 = vpop.f32.mrb[31].mxu1  ;;  %v2126_v18 = vpack.c.bf16 %v2086_v46, %v2078_v37  ;;  %v6393_v25 = vld [vmem:[#allocation11 + $0x4e0] ss:$16 sps:$4 sm:$0xff]  }
 0x265   : > { %3851 = vmatprep.subr.bf16.mxu0 %v6377_v40  ;;  %4143 = vmatprep.subr.bf16.mxu1 %v6380_v41  ;;  %vm1806_vm13 = vcmp.ge.f32.partialorder %v1603_v52, 0.0  ;;  %v1870_v54 = vmul.f32 0.2, %v1603_v52  ;;  %v1607_v63 = vadd.f32 %v1606_v60, %v7534_v16  ;;  %v6389_v16 = vld [vmem:[#allocation11 + $0x4c4] ss:$16 sps:$4 sm:$0xff]  }
 0x266   : > { %v1933_v1 = vsel %vm1805_vm12, %v1601_v39, %v1869_v58  ;;  %vm1813_vm14 = vcmp.ge.f32.partialorder %v1605_v33, 0.0  ;;  %v1877_v2 = vmul.f32 0.2, %v1605_v33  ;;  %3822 = vmatprep.mubr.bf16.mxu0 %v2126_v18  ;;  %4114 = vmatprep.mubr.bf16.mxu1 %v2126_v18  ;;  %v6396_v34 = vld [vmem:[#allocation11 + $0x4e8] ss:$16 sps:$4 sm:$0xff]   ;;  %v6678_v18 = vld [vmem:[%s8019_s5] sm:$0xff] }
 0x267   : > { %v1934_v3 = vsel %vm1806_vm13, %v1603_v52, %v1870_v54  ;;  %vm1814_vm15 = vcmp.ge.f32.partialorder %v1607_v63, 0.0  ;;  %v1878_v8 = vmul.f32 0.2, %v1607_v63  ;;  %3823 = vmatmul.mubr.bf16.gmra.mrb[24].mxu0 %v2125_v32  ;;  %4115 = vmatmul.mubr.bf16.gmra.mrb[56].mxu1 %v2125_v32  ;;  %v2093_v14 = vmul.f32 %v2029_v56, %v1933_v1  ;;  %v6404_v37 = vld [vmem:[#allocation11 + $0x50c] ss:$16 sps:$4 sm:$0xff]  }
 0x268   : > { %3852 = vmatpush1.bf16.msra.mxu0 %v6375_v50  ;;  %4144 = vmatpush1.bf16.msra.mxu1 %v6378_v51  ;;  %v1941_v7 = vsel %vm1813_vm14, %v1605_v33, %v1877_v2  ;;  %v2094_v9 = vmul.f32 %v2030_v55, %v1934_v3  ;;  %v6402_v40 = vld [vmem:[#allocation11 + $0x508] ss:$16 sps:$4 sm:$0xff]   ;;  %v6407_v41 = vld [vmem:[#allocation11 + $0x524] ss:$16 sps:$4 sm:$0xff]   ;;  %v6410_v42 = vld [vmem:[#allocation11 + $0x52c] ss:$16 sps:$4 sm:$0xff]  }
 0x269   : > { %3853 = vmatprep.subr.bf16.mxu0 %v6383_v57  ;;  %4145 = vmatprep.subr.bf16.mxu1 %v6386_v38  ;;  %v1942_v13 = vsel %vm1814_vm15, %v1607_v63, %v1878_v8  ;;  %v2101_v22 = vmul.f32 %v2037_v0, %v1941_v7  ;;  %v6408_v11 = vld [vmem:[#allocation11 + $0x528] ss:$16 sps:$4 sm:$0xff]   ;;  %v6413_v39 = vld [vmem:[#allocation11 + $0x544] ss:$16 sps:$4 sm:$0xff]   ;;  %v6416_v45 = vld [vmem:[#allocation11 + $0x54c] ss:$16 sps:$4 sm:$0xff]  }
 0x26a   : > { %v2102_v15 = vmul.f32 %v2038_v4, %v1942_v13  ;;  %v6411_v46 = vld [vmem:[#allocation11 + $0x540] ss:$16 sps:$4 sm:$0xff]   ;;  %v6422_v50 = vld [vmem:[#allocation11 + $0x56c] ss:$16 sps:$4 sm:$0xff]   ;;  %v6420_v52 = vld [vmem:[#allocation11 + $0x568] ss:$16 sps:$4 sm:$0xff]  }
 0x26b   : > { %v2133_v61 = vpack.c.bf16 %v2101_v22, %v2093_v14  ;;  %v6417_v51 = vld [vmem:[#allocation11 + $0x560] ss:$16 sps:$4 sm:$0xff]   ;;  %v6425_v53 = vld [vmem:[#allocation11 + $0x584] ss:$16 sps:$4 sm:$0xff]   ;;  %v6428_v32 = vld [vmem:[#allocation11 + $0x58c] ss:$16 sps:$4 sm:$0xff]  }
 0x26c   : > { %3854 = vmatpush1.bf16.msra.mxu0 %v6381_v5  ;;  %4146 = vmatpush1.bf16.msra.mxu1 %v6384_v6  ;;  %v2134_v19 = vpack.c.bf16 %v2102_v15, %v2094_v9  ;;  %v769_v55 = vsub.s32 6, %v7406_v28  ;;  %v773_v56 = vsub.s32 7, %v7406_v28  ;;  %v6423_v57 = vld [vmem:[#allocation11 + $0x580] ss:$16 sps:$4 sm:$0xff]   ;;  %v6426_v58 = vld [vmem:[#allocation11 + $0x588] ss:$16 sps:$4 sm:$0xff]  }
 0x26d   : > { %3855 = vmatprep.subr.bf16.mxu0 %v6389_v16  ;;  %4147 = vmatprep.subr.bf16.mxu1 %v6392_v12  ;;  %v6431_v33 = vld [vmem:[#allocation11 + $0x5a4] ss:$16 sps:$4 sm:$0xff]   ;;  %v6434_v60 = vld [vmem:[#allocation11 + $0x5ac] ss:$16 sps:$4 sm:$0xff]   ;;  %v6429_v63 = vld [vmem:[#allocation11 + $0x5a0] ss:$16 sps:$4 sm:$0xff]  }
 0x26e   : > { %3832 = vmatprep.mubr.bf16.mxu0 %v2134_v19  ;;  %4124 = vmatprep.mubr.bf16.mxu1 %v2134_v19  ;;  %v7572_v38 = vrot.slane %v6678_v18, %v769_v55  ;;  %v7574_v54 = vrot.slane %v6678_v18, %v773_v56  ;;  %v6432_v0 = vld [vmem:[#allocation11 + $0x5a8] ss:$16 sps:$4 sm:$0xff]   ;;  %v6437_v2 = vld [vmem:[#allocation11 + $0x5c4] ss:$16 sps:$4 sm:$0xff]   ;;  %v6440_v4 = vld [vmem:[#allocation11 + $0x5cc] ss:$16 sps:$4 sm:$0xff]  }
 0x26f   : > { %3833 = vmatmul.mubr.bf16.gmra.mrb[28].mxu0 %v2133_v61  ;;  %4125 = vmatmul.mubr.bf16.gmra.mrb[60].mxu1 %v2133_v61  ;;  %v1950_v1 = vld [vmem:[%s7328_s9 + $0x18] sm:$0xff]  ;;  %v6435_v6 = vld [vmem:[#allocation11 + $0x5c0] ss:$16 sps:$4 sm:$0xff]   ;;  %v6443_v13 = vld [vmem:[#allocation11 + $0x5e4] ss:$16 sps:$4 sm:$0xff]  }
 0x270   : > { %3856 = vmatpush1.bf16.msra.mxu0 %v6387_v10  ;;  %4148 = vmatpush1.bf16.msra.mxu1 %v6390_v17  ;;  %v1954_v5 = vld [vmem:[%s7328_s9 + $0x38] sm:$0xff]  ;;  %v1985_v9 = vunpack.c.l.bf16 %v1950_v1  ;;  %v1986_v10 = vunpack.c.h.bf16 %v1950_v1  ;;  %v6447_v55 = vld [vmem:[#allocation11 + $0x600] ss:$16 sps:$4 sm:$0xff]  }
 0x271   : > { %3857 = vmatprep.subr.bf16.mxu0 %v6395_v20  ;;  %4149 = vmatprep.subr.bf16.mxu1 %v6398_v21  ;;  %v6438_v7 = vld [vmem:[#allocation11 + $0x5c8] ss:$16 sps:$4 sm:$0xff]   ;;  %v6446_v17 = vld [vmem:[#allocation11 + $0x5ec] ss:$16 sps:$4 sm:$0xff]   ;;  %v1993_v20 = vunpack.c.l.bf16 %v1954_v5 }
 0x272   : > { %3875 = vmatprep.mubr.bf16.mxu0 %v7497_v47  ;;  %4167 = vmatprep.mubr.bf16.mxu1 %v7497_v47  ;;  %v6414_v47 = vld [vmem:[#allocation11 + $0x548] ss:$16 sps:$4 sm:$0xff]  }
 0x273   : > { %v6450_v56 = vld [vmem:[#allocation11 + $0x608] ss:$16 sps:$4 sm:$0xff]  }
 0x274   : > { %3858 = vmatpush1.bf16.msra.mxu0 %v6393_v25  ;;  %4150 = vmatpush1.bf16.msra.mxu1 %v6396_v34 }
 0x275   : > { %3859 = vmatprep.subr.bf16.mxu0 %v6401_v35  ;;  %4151 = vmatprep.subr.bf16.mxu1 %v6404_v37  ;;  %v1994_v35 = vunpack.c.h.bf16 %v1954_v5 }
 0x278   : > { %3860 = vmatpush1.bf16.msra.mxu0 %v6399_v30  ;;  %4152 = vmatpush1.bf16.msra.mxu1 %v6402_v40 }
 0x279   : > { %3861 = vmatprep.subr.bf16.mxu0 %v6407_v41  ;;  %4153 = vmatprep.subr.bf16.mxu1 %v6410_v42  ;;  %v6441_v41 = vld [vmem:[#allocation11 + $0x5e0] ss:$16 sps:$4 sm:$0xff]   ;;  %v6444_v42 = vld [vmem:[#allocation11 + $0x5e8] ss:$16 sps:$4 sm:$0xff]  }
 0x27c   : > { %3862 = vmatpush1.bf16.msra.mxu0 %v6405_v43  ;;  %4154 = vmatpush1.bf16.msra.mxu1 %v6408_v11 }
 0x27d   : > { %3863 = vmatprep.subr.bf16.mxu0 %v6413_v39  ;;  %4155 = vmatprep.subr.bf16.mxu1 %v6416_v45  ;;  %v1958_v39 = vld [vmem:[%s7328_s9 + $0x58] sm:$0xff]  ;;  %v6449_v45 = vld [vmem:[#allocation11 + $0x604] ss:$16 sps:$4 sm:$0xff]  }
 0x27e   : > { %v2001_v18 = vunpack.c.l.bf16 %v1958_v39 }
 0x280   : > { %3864 = vmatpush1.bf16.msra.mxu0 %v6411_v46  ;;  %4156 = vmatpush1.bf16.msra.mxu1 %v6414_v47  ;;  %v6452_v46 = vld [vmem:[#allocation11 + $0x60c] ss:$16 sps:$4 sm:$0xff]  }
 0x281   : > { %3865 = vmatprep.subr.bf16.mxu0 %v6419_v49  ;;  %4157 = vmatprep.subr.bf16.mxu1 %v6422_v50 }
 0x284   : > { %3866 = vmatpush1.bf16.msra.mxu0 %v6417_v51  ;;  %4158 = vmatpush1.bf16.msra.mxu1 %v6420_v52 }
 0x285   : > { %3867 = vmatprep.subr.bf16.mxu0 %v6425_v53  ;;  %4159 = vmatprep.subr.bf16.mxu1 %v6428_v32  ;;  %v1962_v32 = vld [vmem:[%s7328_s9 + $0x78] sm:$0xff] }
 0x286   : > { %v2009_v5 = vunpack.c.l.bf16 %v1962_v32 }
 0x288   : > { %3868 = vmatpush1.bf16.msra.mxu0 %v6423_v57  ;;  %4160 = vmatpush1.bf16.msra.mxu1 %v6426_v58 }
 0x289   : > { %3869 = vmatprep.subr.bf16.mxu0 %v6431_v33  ;;  %4161 = vmatprep.subr.bf16.mxu1 %v6434_v60  ;;  %v1716_v3 = vpop.f32.mrb[32].mxu1  ;;  %v2002_v60 = vunpack.c.h.bf16 %v1958_v39 }
 0x28a   : > { %v1717_v8 = vadd.f32 %v1716_v3, %v7572_v38  ;;  %v1718_v14 = vpop.f32.mrb[33].mxu1  ;;  %v6458_v3 = vld [vmem:[#allocation11 + $0x62c] ss:$16 sps:$4 sm:$0xff]  }
 0x28b   : > { %v1719_v16 = vadd.f32 %v1718_v14, %v7574_v54  ;;  %v1720_v12 = vpop.f32.mrb[34].mxu1 }
 0x28c   : > { %3870 = vmatpush1.bf16.msra.mxu0 %v6429_v63  ;;  %4162 = vmatpush1.bf16.msra.mxu1 %v6432_v0  ;;  %vm1761_vm0 = vcmp.ge.f32.partialorder %v1717_v8, 0.0  ;;  %v1825_v22 = vmul.f32 0.2, %v1717_v8  ;;  %v1721_v15 = vadd.f32 %v1720_v12, %v7572_v38  ;;  %v1722_v61 = vpop.f32.mrb[35].mxu1  ;;  %v6455_v63 = vld [vmem:[#allocation11 + $0x624] ss:$16 sps:$4 sm:$0xff]  }
 0x28d   : > { %3871 = vmatprep.subr.bf16.mxu0 %v6437_v2  ;;  %4163 = vmatprep.subr.bf16.mxu1 %v6440_v4  ;;  %vm1762_vm1 = vcmp.ge.f32.partialorder %v1719_v16, 0.0  ;;  %v1826_v19 = vmul.f32 0.2, %v1719_v16  ;;  %v1723_v21 = vadd.f32 %v1722_v61, %v7574_v54 }
 0x28e   : > { %v1889_v25 = vsel %vm1761_vm0, %v1717_v8, %v1825_v22  ;;  %vm1769_vm2 = vcmp.ge.f32.partialorder %v1721_v15, 0.0  ;;  %v1833_v34 = vmul.f32 0.2, %v1721_v15  ;;  %v6453_v22 = vld [vmem:[#allocation11 + $0x620] ss:$16 sps:$4 sm:$0xff]  }
 0x28f   : > { %v2049_v37 = vmul.f32 %v1985_v9, %v1889_v25  ;;  %v1890_v30 = vsel %vm1762_vm1, %v1719_v16, %v1826_v19  ;;  %vm1770_vm3 = vcmp.ge.f32.partialorder %v1723_v21, 0.0  ;;  %v1834_v40 = vmul.f32 0.2, %v1723_v21  ;;  %v6461_v19 = vld [vmem:[#allocation11 + $0x644] ss:$16 sps:$4 sm:$0xff]  }
 0x290   : > { %3872 = vmatpush1.bf16.msra.mxu0 %v6435_v6  ;;  %4164 = vmatpush1.bf16.msra.mxu1 %v6438_v7  ;;  %v1897_v43 = vsel %vm1769_vm2, %v1721_v15, %v1833_v34  ;;  %v2050_v11 = vmul.f32 %v1986_v10, %v1890_v30  ;;  %v2010_v9 = vunpack.c.h.bf16 %v1962_v32  ;;  %v6456_v15 = vld [vmem:[#allocation11 + $0x628] ss:$16 sps:$4 sm:$0xff]  }
 0x291   : > { %3873 = vmatprep.subr.bf16.mxu0 %v6443_v13  ;;  %4165 = vmatprep.subr.bf16.mxu1 %v6446_v17  ;;  %v2057_v47 = vmul.f32 %v1993_v20, %v1897_v43  ;;  %v1898_v49 = vsel %vm1770_vm3, %v1723_v21, %v1834_v40  ;;  %v1726_v50 = vpop.f32.mrb[36].mxu1  ;;  %v1966_v17 = vld [vmem:[%s7328_s9 + $0x98] sm:$0xff]  ;;  %v6459_v40 = vld [vmem:[#allocation11 + $0x640] ss:$16 sps:$4 sm:$0xff]  }
 0x292   : > { %v1727_v51 = vadd.f32 %v1726_v50, %v7572_v38  ;;  %v2058_v52 = vmul.f32 %v1994_v35, %v1898_v49  ;;  %v1728_v53 = vpop.f32.mrb[37].mxu1  ;;  %v6464_v20 = vld [vmem:[#allocation11 + $0x64c] ss:$16 sps:$4 sm:$0xff]   ;;  %v2018_v39 = vunpack.c.h.bf16 %v1966_v17 }
 0x293   : > { %v7585_v57 = vpack.c.bf16 %v2057_v47, %v2049_v37  ;;  %v1729_v58 = vadd.f32 %v1728_v53, %v7574_v54  ;;  %v1730_v33 = vpop.f32.mrb[38].mxu1  ;;  %v1970_v30 = vld [vmem:[%s7328_s9 + $0xb8] sm:$0xff] }
 0x294   : > { %3874 = vmatpush1.bf16.msra.mxu0 %v6441_v41  ;;  %4166 = vmatpush1.bf16.msra.mxu1 %v6444_v42  ;;  %vm1777_vm4 = vcmp.ge.f32.partialorder %v1727_v51, 0.0  ;;  %v1841_v0 = vmul.f32 0.2, %v1727_v51  ;;  %v7588_v1 = vpack.c.bf16 %v2058_v52, %v2050_v11  ;;  %v1731_v2 = vadd.f32 %v1730_v33, %v7572_v38  ;;  %v1732_v4 = vpop.f32.mrb[39].mxu1  ;;  %v6462_v41 = vld [vmem:[#allocation11 + $0x648] ss:$16 sps:$4 sm:$0xff]  }
 0x295   : > { %3916 = vmatprep.subr.bf16.mxu0 %v6449_v45  ;;  %4208 = vmatprep.subr.bf16.mxu1 %v6452_v46  ;;  %vm1778_vm5 = vcmp.ge.f32.partialorder %v1729_v58, 0.0  ;;  %v1842_v8 = vmul.f32 0.2, %v1729_v58  ;;  %v1733_v14 = vadd.f32 %v1732_v4, %v7574_v54  ;;  %v2017_v45 = vunpack.c.l.bf16 %v1966_v17  ;;  %v6467_v46 = vld [vmem:[#allocation11 + $0x664] ss:$16 sps:$4 sm:$0xff]  }
 0x296   : > { %v1905_v6 = vsel %vm1777_vm4, %v1727_v51, %v1841_v0  ;;  %vm1785_vm6 = vcmp.ge.f32.partialorder %v1731_v2, 0.0  ;;  %v1849_v7 = vmul.f32 0.2, %v1731_v2  ;;  %v6470_v51 = vld [vmem:[#allocation11 + $0x66c] ss:$16 sps:$4 sm:$0xff]   ;;  %v2025_v32 = vunpack.c.l.bf16 %v1970_v30 }
 0x297   : > { %3876 = vmatmul.mubr.bf16.vlgmr.msra.gmra.mrb[16].mxu0 %v7494_v44  ;;  %4168 = vmatmul.mubr.bf16.vlgmr.msra.gmra.mrb[48].mxu1 %v7494_v44  ;;  %v1906_v16 = vsel %vm1778_vm5, %v1729_v58, %v1842_v8  ;;  %vm1786_vm7 = vcmp.ge.f32.partialorder %v1733_v14, 0.0  ;;  %v1850_v12 = vmul.f32 0.2, %v1733_v14  ;;  %v2065_v13 = vmul.f32 %v2001_v18, %v1905_v6  ;;  %v6468_v0 = vld [vmem:[#allocation11 + $0x668] ss:$16 sps:$4 sm:$0xff]  }
 0x298   : > { %3917 = vmatpush1.bf16.msra.mxu0 %v6447_v55  ;;  %4209 = vmatpush1.bf16.msra.mxu1 %v6450_v56  ;;  %v1913_v61 = vsel %vm1785_vm6, %v1731_v2, %v1849_v7  ;;  %v2066_v10 = vmul.f32 %v2002_v60, %v1906_v16  ;;  %v2026_v58 = vunpack.c.h.bf16 %v1970_v30  ;;  %v6473_v8 = vld [vmem:[#allocation11 + $0x684] ss:$16 sps:$4 sm:$0xff]  }
 0x299   : > { %3918 = vmatprep.subr.bf16.mxu0 %v6455_v63  ;;  %4210 = vmatprep.subr.bf16.mxu1 %v6458_v3  ;;  %v1914_v21 = vsel %vm1786_vm7, %v1733_v14, %v1850_v12  ;;  %v1736_v25 = vpop.f32.mrb[40].mxu1  ;;  %v2073_v34 = vmul.f32 %v2009_v5, %v1913_v61  ;;  %v6465_v63 = vld [vmem:[#allocation11 + $0x660] ss:$16 sps:$4 sm:$0xff]   ;;  %v1974_v3 = vld [vmem:[%s7328_s9 + $0xd8] sm:$0xff] }
 0x29a   : > { %3885 = vmatprep.mubr.bf16.mxu0 %v7507_v27  ;;  %4177 = vmatprep.mubr.bf16.mxu1 %v7507_v27  ;;  %v1737_v44 = vadd.f32 %v1736_v25, %v7572_v38  ;;  %v1738_v35 = vpop.f32.mrb[41].mxu1  ;;  %v2074_v37 = vmul.f32 %v2010_v9, %v1914_v21  ;;  %v6476_v14 = vld [vmem:[#allocation11 + $0x68c] ss:$16 sps:$4 sm:$0xff]   ;;  %v2034_v17 = vunpack.c.h.bf16 %v1974_v3 }
 0x29b   : > { %v1739_v42 = vadd.f32 %v1738_v35, %v7574_v54  ;;  %v1740_v43 = vpop.f32.mrb[42].mxu1  ;;  %v7600_v11 = vpack.c.bf16 %v2073_v34, %v2065_v13  ;;  %v1978_v12 = vld [vmem:[%s7328_s9 + $0xf8] sm:$0xff]  ;;  %v6471_v13 = vld [vmem:[#allocation11 + $0x680] ss:$16 sps:$4 sm:$0xff]  }
 0x29c   : > { %3919 = vmatpush1.bf16.msra.mxu0 %v6453_v22  ;;  %4211 = vmatpush1.bf16.msra.mxu1 %v6456_v15  ;;  %vm1793_vm8 = vcmp.ge.f32.partialorder %v1737_v44, 0.0  ;;  %v1857_v47 = vmul.f32 0.2, %v1737_v44  ;;  %v1741_v27 = vadd.f32 %v1740_v43, %v7572_v38  ;;  %v1742_v49 = vpop.f32.mrb[43].mxu1  ;;  %v7603_v50 = vpack.c.bf16 %v2074_v37, %v2066_v10  ;;  %v6474_v22 = vld [vmem:[#allocation11 + $0x688] ss:$16 sps:$4 sm:$0xff]  }
 0x29d   : > { %3920 = vmatprep.subr.bf16.mxu0 %v6461_v19  ;;  %4212 = vmatprep.subr.bf16.mxu1 %v6464_v20  ;;  %vm1794_vm9 = vcmp.ge.f32.partialorder %v1739_v42, 0.0  ;;  %v1858_v52 = vmul.f32 0.2, %v1739_v42  ;;  %v1743_v53 = vadd.f32 %v1742_v49, %v7574_v54  ;;  %v2033_v19 = vunpack.c.l.bf16 %v1974_v3  ;;  %v6479_v20 = vld [vmem:[#allocation11 + $0x6a4] ss:$16 sps:$4 sm:$0xff]  }
 0x29e   : > { %v1921_v55 = vsel %vm1793_vm8, %v1737_v44, %v1857_v47  ;;  %vm1801_vm10 = vcmp.ge.f32.partialorder %v1741_v27, 0.0  ;;  %v1865_v56 = vmul.f32 0.2, %v1741_v27  ;;  %v6482_v44 = vld [vmem:[#allocation11 + $0x6ac] ss:$16 sps:$4 sm:$0xff]   ;;  %v2041_v30 = vunpack.c.l.bf16 %v1978_v12 }
 0x29f   : > { %3886 = vmatmul.mubr.bf16.gmra.mrb[20].mxu0 %v7512_v26  ;;  %4178 = vmatmul.mubr.bf16.gmra.mrb[52].mxu1 %v7512_v26  ;;  %v1922_v33 = vsel %vm1794_vm9, %v1739_v42, %v1858_v52  ;;  %vm1802_vm11 = vcmp.ge.f32.partialorder %v1743_v53, 0.0  ;;  %v1866_v60 = vmul.f32 0.2, %v1743_v53  ;;  %v2081_v18 = vmul.f32 %v2017_v45, %v1921_v55  ;;  %v6477_v45 = vld [vmem:[#allocation11 + $0x6a0] ss:$16 sps:$4 sm:$0xff]  }
 0x2a0   : > { %3921 = vmatpush1.bf16.msra.mxu0 %v6459_v40  ;;  %4213 = vmatpush1.bf16.msra.mxu1 %v6462_v41  ;;  %v1929_v2 = vsel %vm1801_vm10, %v1741_v27, %v1865_v56  ;;  %v2082_v4 = vmul.f32 %v2018_v39, %v1922_v33  ;;  %v2042_v42 = vunpack.c.h.bf16 %v1978_v12  ;;  %v6488_v49 = vld [vmem:[#allocation11 + $0x6cc] ss:$16 sps:$4 sm:$0xff]   ;;  %v6486_v55 = vld [vmem:[#allocation11 + $0x6c8] ss:$16 sps:$4 sm:$0xff]   ;;  %v6501_v3 = vld [vmem:[#allocation11 + $0x720] ss:$16 sps:$4 sm:$0xff]  }
 0x2a1   : > { %3922 = vmatprep.subr.bf16.mxu0 %v6467_v46  ;;  %4214 = vmatprep.subr.bf16.mxu1 %v6470_v51  ;;  %v1930_v5 = vsel %vm1802_vm11, %v1743_v53, %v1866_v60  ;;  %v1746_v6 = vpop.f32.mrb[44].mxu1  ;;  %v2089_v7 = vmul.f32 %v2025_v32, %v1929_v2  ;;  %v6480_v46 = vld [vmem:[#allocation11 + $0x6a8] ss:$16 sps:$4 sm:$0xff]   ;;  %v6483_v32 = vld [vmem:[#allocation11 + $0x6c0] ss:$16 sps:$4 sm:$0xff]  }
 0x2a2   : > { %3895 = vmatprep.mubr.bf16.mxu0 %v7518_v59  ;;  %4187 = vmatprep.mubr.bf16.mxu1 %v7518_v59  ;;  %v1747_v26 = vadd.f32 %v1746_v6, %v7572_v38  ;;  %v1748_v9 = vpop.f32.mrb[45].mxu1  ;;  %v2090_v16 = vmul.f32 %v2026_v58, %v1930_v5  ;;  %v6491_v58 = vld [vmem:[#allocation11 + $0x6e4] ss:$16 sps:$4 sm:$0xff]   ;;  %v6494_v33 = vld [vmem:[#allocation11 + $0x6ec] ss:$16 sps:$4 sm:$0xff]  }
 0x2a3   : > { %v1749_v15 = vadd.f32 %v1748_v9, %v7574_v54  ;;  %v1750_v61 = vpop.f32.mrb[46].mxu1  ;;  %v7614_v10 = vpack.c.bf16 %v2089_v7, %v2081_v18  ;;  %v6492_v60 = vld [vmem:[#allocation11 + $0x6e8] ss:$16 sps:$4 sm:$0xff]   ;;  %v6497_v18 = vld [vmem:[#allocation11 + $0x704] ss:$16 sps:$4 sm:$0xff]  }
 0x2a4   : > { %3923 = vmatpush1.bf16.msra.mxu0 %v6465_v63  ;;  %4215 = vmatpush1.bf16.msra.mxu1 %v6468_v0  ;;  %vm1809_vm12 = vcmp.ge.f32.partialorder %v1747_v26, 0.0  ;;  %v1873_v21 = vmul.f32 0.2, %v1747_v26  ;;  %v1751_v59 = vadd.f32 %v1750_v61, %v7572_v38  ;;  %v1752_v25 = vpop.f32.mrb[47].mxu1  ;;  %v7617_v34 = vpack.c.bf16 %v2090_v16, %v2082_v4  ;;  %v6500_v63 = vld [vmem:[#allocation11 + $0x70c] ss:$16 sps:$4 sm:$0xff]  }
 0x2a5   : > { %3924 = vmatprep.subr.bf16.mxu0 %v6473_v8  ;;  %4216 = vmatprep.subr.bf16.mxu1 %v6476_v14  ;;  %vm1810_vm13 = vcmp.ge.f32.partialorder %v1749_v15, 0.0  ;;  %v1874_v35 = vmul.f32 0.2, %v1749_v15  ;;  %v1753_v37 = vadd.f32 %v1752_v25, %v7574_v54  ;;  %v6485_v54 = vld [vmem:[#allocation11 + $0x6c4] ss:$16 sps:$4 sm:$0xff]  }
 0x2a6   : > { %v1937_v40 = vsel %vm1809_vm12, %v1747_v26, %v1873_v21  ;;  %vm1817_vm14 = vcmp.ge.f32.partialorder %v1751_v59, 0.0  ;;  %v1881_v41 = vmul.f32 0.2, %v1751_v59  ;;  %v6495_v0 = vld [vmem:[#allocation11 + $0x700] ss:$16 sps:$4 sm:$0xff]  }
 0x2a7   : > { %3896 = vmatmul.mubr.bf16.gmra.mrb[24].mxu0 %v7520_v48  ;;  %4188 = vmatmul.mubr.bf16.gmra.mrb[56].mxu1 %v7520_v48  ;;  %v1938_v38 = vsel %vm1810_vm13, %v1749_v15, %v1874_v35  ;;  %vm1818_vm15 = vcmp.ge.f32.partialorder %v1753_v37, 0.0  ;;  %v1882_v43 = vmul.f32 0.2, %v1753_v37  ;;  %v2097_v39 = vmul.f32 %v2033_v19, %v1937_v40  ;;  %v6498_v2 = vld [vmem:[#allocation11 + $0x708] ss:$16 sps:$4 sm:$0xff]  }
 0x2a8   : > { %3925 = vmatpush1.bf16.msra.mxu0 %v6471_v13  ;;  %4217 = vmatpush1.bf16.msra.mxu1 %v6474_v22  ;;  %v1945_v47 = vsel %vm1817_vm14, %v1751_v59, %v1881_v41  ;;  %v2098_v27 = vmul.f32 %v2034_v17, %v1938_v38  ;;  %v6503_v4 = vld [vmem:[#allocation11 + $0x724] ss:$16 sps:$4 sm:$0xff]   ;;  %v6504_v8 = vld [vmem:[#allocation11 + $0x728] ss:$16 sps:$4 sm:$0xff]   ;;  %v6512_v5 = vld [vmem:[#allocation11 + $0x74c] ss:$16 sps:$4 sm:$0xff]  }
 0x2a9   : > { %3926 = vmatprep.subr.bf16.mxu0 %v6479_v20  ;;  %4218 = vmatprep.subr.bf16.mxu1 %v6482_v44  ;;  %v1946_v51 = vsel %vm1818_vm15, %v1753_v37, %v1882_v43  ;;  %v2105_v52 = vmul.f32 %v2041_v30, %v1945_v47  ;;  %v6509_v14 = vld [vmem:[#allocation11 + $0x744] ss:$16 sps:$4 sm:$0xff]   ;;  %v6507_v6 = vld [vmem:[#allocation11 + $0x740] ss:$16 sps:$4 sm:$0xff]   ;;  %v6518_v26 = vld [vmem:[#allocation11 + $0x76c] ss:$16 sps:$4 sm:$0xff]  }
 0x2aa   : > { %3905 = vmatprep.mubr.bf16.mxu0 %v7537_v24  ;;  %4197 = vmatprep.mubr.bf16.mxu1 %v7537_v24  ;;  %v2106_v48 = vmul.f32 %v2042_v42, %v1946_v51  ;;  %v6489_v24 = vld [vmem:[#allocation11 + $0x6e0] ss:$16 sps:$4 sm:$0xff]   ;;  %v6515_v7 = vld [vmem:[#allocation11 + $0x764] ss:$16 sps:$4 sm:$0xff]   ;;  %v6516_v16 = vld [vmem:[#allocation11 + $0x768] ss:$16 sps:$4 sm:$0xff]  }
 0x2ab   : > { %v7624_v53 = vpack.c.bf16 %v2105_v52, %v2097_v39  ;;  %v6513_v9 = vld [vmem:[#allocation11 + $0x760] ss:$16 sps:$4 sm:$0xff]   ;;  %v6521_v12 = vld [vmem:[#allocation11 + $0x784] ss:$16 sps:$4 sm:$0xff]   ;;  %v6524_v13 = vld [vmem:[#allocation11 + $0x78c] ss:$16 sps:$4 sm:$0xff]  }
 0x2ac   : > { %3927 = vmatpush1.bf16.msra.mxu0 %v6477_v45  ;;  %4219 = vmatpush1.bf16.msra.mxu1 %v6480_v46  ;;  %v7626_v56 = vpack.c.bf16 %v2106_v48, %v2098_v27  ;;  %v6519_v22 = vld [vmem:[#allocation11 + $0x780] ss:$16 sps:$4 sm:$0xff]   ;;  %v6522_v15 = vld [vmem:[#allocation11 + $0x788] ss:$16 sps:$4 sm:$0xff]   ;;  %v6527_v61 = vld [vmem:[#allocation11 + $0x7a4] ss:$16 sps:$4 sm:$0xff]  }
 0x2ad   : > { %3928 = vmatprep.subr.bf16.mxu0 %v6485_v54  ;;  %4220 = vmatprep.subr.bf16.mxu1 %v6488_v49  ;;  %v6530_v17 = vld [vmem:[#allocation11 + $0x7ac] ss:$16 sps:$4 sm:$0xff]   ;;  %v6525_v19 = vld [vmem:[#allocation11 + $0x7a0] ss:$16 sps:$4 sm:$0xff]   ;;  %v6528_v20 = vld [vmem:[#allocation11 + $0x7a8] ss:$16 sps:$4 sm:$0xff]  }
 0x2ae   : > { %v6533_v21 = vld [vmem:[#allocation11 + $0x7c4] ss:$16 sps:$4 sm:$0xff]   ;;  %v6536_v59 = vld [vmem:[#allocation11 + $0x7cc] ss:$16 sps:$4 sm:$0xff]   ;;  %v6531_v25 = vld [vmem:[#allocation11 + $0x7c0] ss:$16 sps:$4 sm:$0xff]  }
 0x2af   : > { %3906 = vmatmul.mubr.bf16.gmra.mrb[28].mxu0 %v7539_v36  ;;  %4198 = vmatmul.mubr.bf16.gmra.mrb[60].mxu1 %v7539_v36  ;;  %v6506_v36 = vld [vmem:[#allocation11 + $0x72c] ss:$16 sps:$4 sm:$0xff]   ;;  %v6534_v44 = vld [vmem:[#allocation11 + $0x7c8] ss:$16 sps:$4 sm:$0xff]   ;;  %v6539_v35 = vld [vmem:[#allocation11 + $0x7e4] ss:$16 sps:$4 sm:$0xff]  }
 0x2b0   : > { %3929 = vmatpush1.bf16.msra.mxu0 %v6483_v32  ;;  %4221 = vmatpush1.bf16.msra.mxu1 %v6486_v55  ;;  %v6542_v37 = vld [vmem:[#allocation11 + $0x7ec] ss:$16 sps:$4 sm:$0xff]   ;;  %v6537_v30 = vld [vmem:[#allocation11 + $0x7e0] ss:$16 sps:$4 sm:$0xff]   ;;  %v6540_v40 = vld [vmem:[#allocation11 + $0x7e8] ss:$16 sps:$4 sm:$0xff]  }
 0x2b1   : > { %3930 = vmatprep.subr.bf16.mxu0 %v6491_v58  ;;  %4222 = vmatprep.subr.bf16.mxu1 %v6494_v33  ;;  %v6545_v41 = vld [vmem:[#allocation13 + $0x4] ss:$8 sps:$4 sm:$0xff]   ;;  %v6543_v42 = vld [vmem:[#allocation13] ss:$8 sps:$4 sm:$0xff]   ;;  %v6548_v38 = vld [vmem:[#allocation13 + $0x14] ss:$8 sps:$4 sm:$0xff]  }
 0x2b2   : > { %3948 = vmatprep.mubr.bf16.mxu0 %v7588_v1  ;;  %4240 = vmatprep.mubr.bf16.mxu1 %v7588_v1  ;;  %v6510_v1 = vld [vmem:[#allocation11 + $0x748] ss:$16 sps:$4 sm:$0xff]   ;;  %v6551_v39 = vld [vmem:[#allocation13 + $0x24] ss:$8 sps:$4 sm:$0xff]   ;;  %v6554_v46 = vld [vmem:[#allocation13 + $0x34] ss:$8 sps:$4 sm:$0xff]  }
 0x2b3   : > { %v6546_v43 = vld [vmem:[#allocation13 + $0x10] ss:$8 sps:$4 sm:$0xff]   ;;  %v6549_v45 = vld [vmem:[#allocation13 + $0x20] ss:$8 sps:$4 sm:$0xff]   ;;  %v6560_v27 = vld [vmem:[#allocation13 + $0x54] ss:$8 sps:$4 sm:$0xff]  }
 0x2b4   : > { %3931 = vmatpush1.bf16.msra.mxu0 %v6489_v24  ;;  %4223 = vmatpush1.bf16.msra.mxu1 %v6492_v60  ;;  %v6555_v47 = vld [vmem:[#allocation13 + $0x40] ss:$8 sps:$4 sm:$0xff]   ;;  %v6566_v49 = vld [vmem:[#allocation13 + $0x74] ss:$8 sps:$4 sm:$0xff]   ;;  %v6564_v51 = vld [vmem:[#allocation13 + $0x70] ss:$8 sps:$4 sm:$0xff]  }
 0x2b5   : > { %3932 = vmatprep.subr.bf16.mxu0 %v6497_v18  ;;  %4224 = vmatprep.subr.bf16.mxu1 %v6500_v63  ;;  %v6561_v54 = vld [vmem:[#allocation13 + $0x60] ss:$8 sps:$4 sm:$0xff]   ;;  %v6572_v48 = vld [vmem:[#allocation13 + $0x94] ss:$8 sps:$4 sm:$0xff]   ;;  %v6570_v32 = vld [vmem:[#allocation13 + $0x90] ss:$8 sps:$4 sm:$0xff]  }
 0x2b6   : > { %v6567_v52 = vld [vmem:[#allocation13 + $0x80] ss:$8 sps:$4 sm:$0xff]   ;;  %v6575_v55 = vld [vmem:[#allocation13 + $0xa4] ss:$8 sps:$4 sm:$0xff]   ;;  %v6578_v58 = vld [vmem:[#allocation13 + $0xb4] ss:$8 sps:$4 sm:$0xff]  }
 0x2b7   : > { %v6576_v33 = vld [vmem:[#allocation13 + $0xb0] ss:$8 sps:$4 sm:$0xff]   ;;  %v6579_v24 = vld [vmem:[#allocation13 + $0xc0] ss:$8 sps:$4 sm:$0xff]   ;;  %v6584_v60 = vld [vmem:[#allocation13 + $0xd4] ss:$8 sps:$4 sm:$0xff]  }
 0x2b8   : > { %3933 = vmatpush1.bf16.msra.mxu0 %v6495_v0  ;;  %4225 = vmatpush1.bf16.msra.mxu1 %v6498_v2  ;;  %v6582_v18 = vld [vmem:[#allocation13 + $0xd0] ss:$8 sps:$4 sm:$0xff]   ;;  %v6587_v63 = vld [vmem:[#allocation13 + $0xe4] ss:$8 sps:$4 sm:$0xff]   ;;  %v6585_v0 = vld [vmem:[#allocation13 + $0xe0] ss:$8 sps:$4 sm:$0xff]  }
 0x2b9   : > { %3934 = vmatprep.subr.bf16.mxu0 %v6503_v4  ;;  %4226 = vmatprep.subr.bf16.mxu1 %v6506_v36  ;;  %v6590_v2 = vld [vmem:[#allocation13 + $0xf4] ss:$8 sps:$4 sm:$0xff]   ;;  %v6588_v4 = vld [vmem:[#allocation13 + $0xf0] ss:$8 sps:$4 sm:$0xff]   ;;  %v6593_v36 = vld [vmem:[#allocation13 + $0x104] ss:$8 sps:$4 sm:$0xff]  }
 0x2bc   : > { %3935 = vmatpush1.bf16.msra.mxu0 %v6501_v3  ;;  %4227 = vmatpush1.bf16.msra.mxu1 %v6504_v8  ;;  %v2395_v3 = vld [vmem:[%s8021_s7] sm:$0xf] }
 0x2bd   : > { %3936 = vmatprep.subr.bf16.mxu0 %v6509_v14  ;;  %4228 = vmatprep.subr.bf16.mxu1 %v6512_v5  ;;  %v7650_v8 = vld [vmem:[%s7334_s20] sm:$0xff]  ;;  %v7653_v14 = vld [vmem:[%s7334_s20 + $0x8] sm:$0xff]  ;;  %v7656_v5 = vld [vmem:[%s7334_s20 + $0x10] sm:$0xff] }
 0x2be   : > { %v4394_v28 = vunpack.c.h.bf16 %v7650_v8 }
 0x2c0   : > { %3937 = vmatpush1.bf16.msra.mxu0 %v6507_v6  ;;  %4229 = vmatpush1.bf16.msra.mxu1 %v6510_v1  ;;  %v7659_v6 = vld [vmem:[%s7334_s20 + $0x18] sm:$0xff]  ;;  %v7662_v1 = vrot.slane %v2395_v3, %v7409_v29 }
 0x2c1   : > { %3938 = vmatprep.subr.bf16.mxu0 %v6515_v7  ;;  %4230 = vmatprep.subr.bf16.mxu1 %v6518_v26  ;;  %v7666_v7 = vrot.slane %v2395_v3, %v753_v23  ;;  %v7669_v26 = vrot.slane %v2395_v3, %v7417_v31  ;;  %v4397_v23 = vunpack.c.l.bf16 %v7656_v5 }
 0x2c4   : > { %3939 = vmatpush1.bf16.msra.mxu0 %v6513_v9  ;;  %4231 = vmatpush1.bf16.msra.mxu1 %v6516_v16  ;;  %v7673_v9 = vrot.slane %v2395_v3, %v757_v62  ;;  %v7676_v16 = vld [vmem:[%s7334_s20 + $0x20] sm:$0xff]  ;;  %v4398_v62 = vunpack.c.h.bf16 %v7656_v5 }
 0x2c5   : > { %3940 = vmatprep.subr.bf16.mxu0 %v6521_v12  ;;  %4232 = vmatprep.subr.bf16.mxu1 %v6524_v13  ;;  %v7679_v12 = vld [vmem:[%s7334_s20 + $0x30] sm:$0xff]  ;;  %v4393_v13 = vunpack.c.l.bf16 %v7650_v8 }
 0x2c8   : > { %3941 = vmatpush1.bf16.msra.mxu0 %v6519_v22  ;;  %4233 = vmatpush1.bf16.msra.mxu1 %v6522_v15  ;;  %v4395_v22 = vunpack.c.l.bf16 %v7653_v14  ;;  %v4399_v15 = vunpack.c.l.bf16 %v7659_v6 }
 0x2c9   : > { %3942 = vmatprep.subr.bf16.mxu0 %v6527_v61  ;;  %4234 = vmatprep.subr.bf16.mxu1 %v6530_v17  ;;  %v7686_v61 = vld [vmem:[%s7334_s20 + $0x40] sm:$0xff]  ;;  %v7689_v17 = vld [vmem:[%s7334_s20 + $0x50] sm:$0xff] }
 0x2cc   : > { %3943 = vmatpush1.bf16.msra.mxu0 %v6525_v19  ;;  %4235 = vmatpush1.bf16.msra.mxu1 %v6528_v20  ;;  %v7694_v19 = vld [vmem:[%s7334_s20 + $0x60] sm:$0xff]  ;;  %v4396_v20 = vunpack.c.h.bf16 %v7653_v14 }
 0x2cd   : > { %3944 = vmatprep.subr.bf16.mxu0 %v6533_v21  ;;  %4236 = vmatprep.subr.bf16.mxu1 %v6536_v59  ;;  %v7699_v59 = vld [vmem:[%s7334_s20 + $0x28] sm:$0xff] }
 0x2d0   : > { %3945 = vmatpush1.bf16.msra.mxu0 %v6531_v25  ;;  %4237 = vmatpush1.bf16.msra.mxu1 %v6534_v44  ;;  %v4402_v25 = vunpack.c.h.bf16 %v7676_v16  ;;  %v4406_v44 = vunpack.c.h.bf16 %v7679_v12 }
 0x2d1   : > { %3946 = vmatprep.subr.bf16.mxu0 %v6539_v35  ;;  %4238 = vmatprep.subr.bf16.mxu1 %v6542_v37  ;;  %v4401_v35 = vunpack.c.l.bf16 %v7676_v16  ;;  %v4405_v37 = vunpack.c.l.bf16 %v7679_v12 }
 0x2d4   : > { %3947 = vmatpush1.bf16.msra.mxu0 %v6537_v30  ;;  %4239 = vmatpush1.bf16.msra.mxu1 %v6540_v40  ;;  %v7706_v30 = vld [vmem:[%s7334_s20 + $0x70] sm:$0xff]  ;;  %v7709_v40 = vld [vmem:[%s7334_s20 + $0x38] sm:$0xff] }
 0x2d5   : > { %4869 = vmatprep.subr.bf16.mxu0 %v6545_v41  ;;  %v4410_v41 = vunpack.c.h.bf16 %v7686_v61 }
 0x2d7   : > { %3949 = vmatmul.mubr.bf16.vlgmr.msra.gmra.mrb[16].mxu0 %v7585_v57  ;;  %4241 = vmatmul.mubr.bf16.vlgmr.msra.gmra.mrb[48].mxu1 %v7585_v57  ;;  %v6552_v57 = vld [vmem:[#allocation13 + $0x30] ss:$8 sps:$4 sm:$0xff]  }
 0x2d8   : > { %3958 = vmatprep.mubr.bf16.mxu0 %v7603_v50  ;;  %4250 = vmatprep.mubr.bf16.mxu1 %v7603_v50  ;;  %v6557_v50 = vld [vmem:[#allocation13 + $0x44] ss:$8 sps:$4 sm:$0xff]  }
 0x2d9   : > { %4870 = vmatpush1.bf16.msra.mxu0 %v6543_v42  ;;  %v4414_v42 = vunpack.c.h.bf16 %v7689_v17 }
 0x2da   : > { %4871 = vmatprep.subr.bf16.mxu0 %v6548_v38 }
 0x2dd   : > { %4872 = vmatpush1.bf16.msra.mxu0 %v6546_v43 }
 0x2de   : > { %4873 = vmatprep.subr.bf16.mxu0 %v6551_v39  ;;  %v7716_v39 = vld [vmem:[%s7334_s20 + $0x48] sm:$0xff] }
 0x2df   : > { %3959 = vmatmul.mubr.bf16.gmra.mrb[20].mxu0 %v7600_v11  ;;  %4251 = vmatmul.mubr.bf16.gmra.mrb[52].mxu1 %v7600_v11  ;;  %v6558_v11 = vld [vmem:[#allocation13 + $0x50] ss:$8 sps:$4 sm:$0xff]  }
 0x2e0   : > { %3968 = vmatprep.mubr.bf16.mxu0 %v7617_v34  ;;  %4260 = vmatprep.mubr.bf16.mxu1 %v7617_v34  ;;  %v6563_v34 = vld [vmem:[#allocation13 + $0x64] ss:$8 sps:$4 sm:$0xff]  }
 0x2e1   : > { %4874 = vmatpush1.bf16.msra.mxu0 %v6549_v45  ;;  %v7719_v45 = vld [vmem:[%s7334_s20 + $0x58] sm:$0xff] }
 0x2e2   : > { %4875 = vmatprep.subr.bf16.mxu0 %v6554_v46 }
 0x2e5   : > { %4876 = vmatpush1.bf16.msra.mxu0 %v6552_v57  ;;  %v6591_v57 = vld [vmem:[#allocation13 + $0x100] ss:$8 sps:$4 sm:$0xff]  }
 0x2e6   : > { %4877 = vmatprep.subr.bf16.mxu0 %v6557_v50 }
 0x2e7   : > { %3969 = vmatmul.mubr.bf16.gmra.mrb[24].mxu0 %v7614_v10  ;;  %4261 = vmatmul.mubr.bf16.gmra.mrb[56].mxu1 %v7614_v10  ;;  %v6569_v10 = vld [vmem:[#allocation13 + $0x84] ss:$8 sps:$4 sm:$0xff]  }
 0x2e8   : > { %3978 = vmatprep.mubr.bf16.mxu0 %v7626_v56  ;;  %4270 = vmatprep.mubr.bf16.mxu1 %v7626_v56  ;;  %v6573_v56 = vld [vmem:[#allocation13 + $0xa0] ss:$8 sps:$4 sm:$0xff]  }
 0x2e9   : > { %4878 = vmatpush1.bf16.msra.mxu0 %v6555_v47 }
 0x2ea   : > { %4879 = vmatprep.subr.bf16.mxu0 %v6560_v27  ;;  %v7726_v27 = vld [vmem:[%s7334_s20 + $0x68] sm:$0xff] }
 0x2ed   : > { %4880 = vmatpush1.bf16.msra.mxu0 %v6558_v11 }
 0x2ee   : > { %4881 = vmatprep.subr.bf16.mxu0 %v6563_v34 }
 0x2ef   : > { %3979 = vmatmul.mubr.bf16.gmra.mrb[28].mxu0 %v7624_v53  ;;  %4271 = vmatmul.mubr.bf16.gmra.mrb[60].mxu1 %v7624_v53  ;;  %v6581_v53 = vld [vmem:[#allocation13 + $0xc4] ss:$8 sps:$4 sm:$0xff]  }
 0x2f1   : > { %4882 = vmatpush1.bf16.msra.mxu0 %v6561_v54 }
 0x2f2   : > { %4883 = vmatprep.subr.bf16.mxu0 %v6566_v49 }
 0x2f5   : > { %4884 = vmatpush1.bf16.msra.mxu0 %v6564_v51  ;;  %v7733_v51 = vld [vmem:[%s7334_s20 + $0x78] sm:$0xff] }
 0x2f6   : > { %4885 = vmatprep.subr.bf16.mxu0 %v6569_v10 }
 0x2f9   : > { %4886 = vmatpush1.bf16.msra.mxu0 %v6567_v52 }
 0x2fa   : > { %4887 = vmatprep.subr.bf16.mxu0 %v6572_v48 }
 0x2fd   : > { %4888 = vmatpush1.bf16.msra.mxu0 %v6570_v32 }
 0x2fe   : > { %4889 = vmatprep.subr.bf16.mxu0 %v6575_v55 }
 0x301   : > { %4890 = vmatpush1.bf16.msra.mxu0 %v6573_v56 }
 0x302   : > { %4891 = vmatprep.subr.bf16.mxu0 %v6578_v58 }
 0x305   : > { %4892 = vmatpush1.bf16.msra.mxu0 %v6576_v33 }
 0x306   : > { %4893 = vmatprep.subr.bf16.mxu0 %v6581_v53 }
 0x309   : > { %4894 = vmatpush1.bf16.msra.mxu0 %v6579_v24 }
 0x30a   : > { %4895 = vmatprep.subr.bf16.mxu0 %v6584_v60 }
 0x30d   : > { %4896 = vmatpush1.bf16.msra.mxu0 %v6582_v18 }
 0x30e   : > { %4897 = vmatprep.subr.bf16.mxu0 %v6587_v63 }
 0x311   : > { %4898 = vmatpush1.bf16.msra.mxu0 %v6585_v0 }
 0x312   : > { %4899 = vmatprep.subr.bf16.mxu0 %v6590_v2 }
 0x315   : > { %4900 = vmatpush1.bf16.msra.mxu0 %v6588_v4 }
 0x316   : > { %4942 = vmatprep.subr.bf16.mxu0 %v6593_v36 }
 0x3aa   : > { %v3950_v10 = vpop.f32.mrb[16].mxu0  ;;  %v4242_v52 = vpop.f32.mrb[48].mxu1 }
 0x3ab   : > { %v5896_v58 = vadd.f32 %v3950_v10, %v7662_v1  ;;  %v5912_v33 = vadd.f32 %v4242_v52, %v7666_v7  ;;  %v3952_v53 = vpop.f32.mrb[17].mxu0  ;;  %v4244_v24 = vpop.f32.mrb[49].mxu1 }
 0x3ac   : > { %v5897_v63 = vadd.f32 %v3952_v53, %v7669_v26  ;;  %v5913_v0 = vadd.f32 %v4244_v24, %v7673_v9  ;;  %v3954_v2 = vpop.f32.mrb[18].mxu0  ;;  %v4246_v4 = vpop.f32.mrb[50].mxu1 }
 0x3ad   : > { %vm4281_vm0 = vcmp.ge.f32.partialorder %v5896_v58, 0.0  ;;  %v4313_v10 = vmul.f32 0.2, %v5896_v58  ;;  %vm4283_vm1 = vcmp.ge.f32.partialorder %v5912_v33, 0.0  ;;  %v4315_v52 = vmul.f32 0.2, %v5912_v33 }
 0x3ae   : > { %vm4282_vm2 = vcmp.ge.f32.partialorder %v5897_v63, 0.0  ;;  %v4314_v56 = vmul.f32 0.2, %v5897_v63  ;;  %vm4284_vm3 = vcmp.ge.f32.partialorder %v5913_v0, 0.0  ;;  %v4316_v60 = vmul.f32 0.2, %v5913_v0 }
 0x3af   : > { %v4345_v55 = vsel %vm4281_vm0, %v5896_v58, %v4313_v10  ;;  %v4347_v18 = vsel %vm4283_vm1, %v5912_v33, %v4315_v52  ;;  %v5898_v53 = vadd.f32 %v3954_v2, %v7662_v1  ;;  %v5914_v24 = vadd.f32 %v4246_v4, %v7666_v7  ;;  %v3956_v32 = vpop.f32.mrb[19].mxu0  ;;  %v4248_v48 = vpop.f32.mrb[51].mxu1 }
 0x3b0   : > { %v7751_v36 = vmul.f32 %v4393_v13, %v4345_v55  ;;  %v7755_v3 = vmul.f32 %v4395_v22, %v4347_v18  ;;  %v4346_v49 = vsel %vm4282_vm2, %v5897_v63, %v4314_v56  ;;  %v4348_v47 = vsel %vm4284_vm3, %v5913_v0, %v4316_v60 }
 0x3b1   : > { %vm4285_vm4 = vcmp.ge.f32.partialorder %v5898_v53, 0.0  ;;  %v4317_v54 = vmul.f32 0.2, %v5898_v53  ;;  %vm4287_vm5 = vcmp.ge.f32.partialorder %v5914_v24, 0.0  ;;  %v4319_v58 = vmul.f32 0.2, %v5914_v24 }
 0x3b2   : > { %v5899_v33 = vadd.f32 %v3956_v32, %v7669_v26  ;;  %v5915_v2 = vadd.f32 %v4248_v48, %v7673_v9  ;;  %v3960_v4 = vpop.f32.mrb[20].mxu0  ;;  %v4252_v10 = vpop.f32.mrb[52].mxu1  ;;  %v7761_v13 = vmul.f32 %v4394_v28, %v4346_v49  ;;  %v7765_v22 = vmul.f32 %v4396_v20, %v4348_v47 }
 0x3b3   : > { %v4349_v55 = vsel %vm4285_vm4, %v5898_v53, %v4317_v54  ;;  %v4351_v56 = vsel %vm4287_vm5, %v5914_v24, %v4319_v58  ;;  %v5900_v60 = vadd.f32 %v3960_v4, %v7662_v1  ;;  %v5916_v18 = vadd.f32 %v4252_v10, %v7666_v7  ;;  %v3962_v63 = vpop.f32.mrb[21].mxu0  ;;  %v4254_v32 = vpop.f32.mrb[53].mxu1 }
 0x3b4   : > { %v7771_v48 = vmul.f32 %v4397_v23, %v4349_v55  ;;  %v7775_v8 = vmul.f32 %v4399_v15, %v4351_v56  ;;  %vm4286_vm6 = vcmp.ge.f32.partialorder %v5899_v33, 0.0  ;;  %v4318_v14 = vmul.f32 0.2, %v5899_v33  ;;  %v3964_v28 = vpop.f32.mrb[22].mxu0  ;;  %v4256_v20 = vpop.f32.mrb[54].mxu1 }
 0x3b5   : > { %vm4288_vm7 = vcmp.ge.f32.partialorder %v5915_v2, 0.0  ;;  %v4320_v47 = vmul.f32 0.2, %v5915_v2  ;;  %vm4289_vm8 = vcmp.ge.f32.partialorder %v5900_v60, 0.0  ;;  %v4321_v54 = vmul.f32 0.2, %v5900_v60 }
 0x3b6   : > { %v4457_v49 = vpack.c.bf16 %v7771_v48, %v7751_v36  ;;  %v4350_v23 = vsel %vm4286_vm6, %v5899_v33, %v4318_v14  ;;  %vm4291_vm9 = vcmp.ge.f32.partialorder %v5916_v18, 0.0  ;;  %v3966_v52 = vpop.f32.mrb[23].mxu0  ;;  %v4258_v53 = vpop.f32.mrb[55].mxu1  ;;  %v4323_v58 = vmul.f32 0.2, %v5916_v18 }
 0x3b7   : > { %v7781_v15 = vsel %vm4288_vm7, %v5915_v2, %v4320_v47  ;;  %v7783_v24 = vsel %vm4289_vm8, %v5900_v60, %v4321_v54  ;;  %v5901_v4 = vadd.f32 %v3962_v63, %v7669_v26  ;;  %v5917_v10 = vadd.f32 %v4254_v32, %v7673_v9 }
 0x3b8   : > { %v5902_v55 = vadd.f32 %v3964_v28, %v7662_v1  ;;  %v5918_v36 = vadd.f32 %v4256_v20, %v7666_v7  ;;  %v5903_v56 = vadd.f32 %v3966_v52, %v7669_v26  ;;  %v7790_v48 = vsel %vm4291_vm9, %v5916_v18, %v4323_v58 }
 0x3b9   : > { %vm4290_vm10 = vcmp.ge.f32.partialorder %v5901_v4, 0.0  ;;  %v4322_v33 = vmul.f32 0.2, %v5901_v4  ;;  %v5919_v2 = vadd.f32 %v4258_v53, %v7673_v9  ;;  %vm4292_vm11 = vcmp.ge.f32.partialorder %v5917_v10, 0.0 }
 0x3ba   : > { %v4324_v60 = vmul.f32 0.2, %v5917_v10  ;;  %vm4293_vm12 = vcmp.ge.f32.partialorder %v5902_v55, 0.0  ;;  %v4325_v14 = vmul.f32 0.2, %v5902_v55  ;;  %vm4295_vm13 = vcmp.ge.f32.partialorder %v5918_v36, 0.0 }
 0x3bb   : > { %v7793_v47 = vsel %vm4290_vm10, %v5901_v4, %v4322_v33  ;;  %v4327_v63 = vmul.f32 0.2, %v5918_v36  ;;  %vm4294_vm14 = vcmp.ge.f32.partialorder %v5903_v56, 0.0  ;;  %v3970_v32 = vpop.f32.mrb[24].mxu0  ;;  %v4262_v28 = vpop.f32.mrb[56].mxu1  ;;  %vm4296_vm15 = vcmp.ge.f32.partialorder %v5919_v2, 0.0 }
 0x3bc   : > { %v7795_v20 = vsel %vm4292_vm11, %v5917_v10, %v4324_v60  ;;  %v7797_v54 = vsel %vm4293_vm12, %v5902_v55, %v4325_v14  ;;  %v4326_v18 = vmul.f32 0.2, %v5903_v56  ;;  %v3972_v52 = vpop.f32.mrb[25].mxu0  ;;  %v4264_v58 = vpop.f32.mrb[57].mxu1  ;;  %v4328_v0 = vmul.f32 0.2, %v5919_v2 }
 0x3bd   : > { %v7799_v53 = vsel %vm4295_vm13, %v5918_v36, %v4327_v63  ;;  %v4430_v4 = vmul.f32 %v4398_v62, %v4350_v23  ;;  %v5904_v33 = vadd.f32 %v3970_v32, %v7662_v1  ;;  %v3974_v50 = vpop.f32.mrb[26].mxu0  ;;  %v4266_v21 = vpop.f32.mrb[58].mxu1  ;;  %v5920_v10 = vadd.f32 %v4262_v28, %v7666_v7  ;;  %v6596_v23 = vld [vmem:[#allocation13 + $0x114] ss:$8 sps:$4 sm:$0xff]  }
 0x3be   : > { %v4358_v34 = vsel %vm4294_vm14, %v5903_v56, %v4326_v18  ;;  %v5905_v55 = vadd.f32 %v3972_v52, %v7669_v26  ;;  %v5921_v60 = vadd.f32 %v4264_v58, %v7673_v9  ;;  %v3976_v14 = vpop.f32.mrb[27].mxu0  ;;  %v4268_v11 = vpop.f32.mrb[59].mxu1  ;;  %v7808_v36 = vsel %vm4296_vm15, %v5919_v2, %v4328_v0 }
 0x3bf   : > { %v4458_v5 = vpack.c.bf16 %v4430_v4, %v7761_v13  ;;  %vm4297_vm0 = vcmp.ge.f32.partialorder %v5904_v33, 0.0  ;;  %v4329_v62 = vmul.f32 0.2, %v5904_v33  ;;  %vm4299_vm1 = vcmp.ge.f32.partialorder %v5920_v10, 0.0  ;;  %v6594_v13 = vld [vmem:[#allocation13 + $0x110] ss:$8 sps:$4 sm:$0xff]  }
 0x3c0   : > { %v4331_v63 = vmul.f32 0.2, %v5920_v10  ;;  %vm4298_vm2 = vcmp.ge.f32.partialorder %v5905_v55, 0.0  ;;  %v4330_v56 = vmul.f32 0.2, %v5905_v55  ;;  %vm4300_vm3 = vcmp.ge.f32.partialorder %v5921_v60, 0.0 }
 0x3c1   : > { %4901 = vmatprep.mubr.bf16.mxu0 %v4458_v5  ;;  %v7811_v32 = vsel %vm4297_vm0, %v5904_v33, %v4329_v62  ;;  %v4332_v28 = vmul.f32 0.2, %v5921_v60  ;;  %v5906_v18 = vadd.f32 %v3974_v50, %v7662_v1  ;;  %v5922_v2 = vadd.f32 %v4266_v21, %v7666_v7  ;;  %v6599_v4 = vld [vmem:[#allocation13 + $0x124] ss:$8 sps:$4 sm:$0xff]  }
 0x3c2   : > { %4902 = vmatmul.mubr.bf16.vlgmr.msra.gmra.mrb[32].mxu0 %v4457_v49  ;;  %v7814_v52 = vsel %vm4299_vm1, %v5920_v10, %v4331_v63  ;;  %v7816_v0 = vsel %vm4298_vm2, %v5905_v55, %v4330_v56  ;;  %v5907_v58 = vadd.f32 %v3976_v14, %v7669_v26  ;;  %v3980_v46 = vpop.f32.mrb[28].mxu0  ;;  %v4272_v43 = vpop.f32.mrb[60].mxu1  ;;  %v5923_v50 = vadd.f32 %v4268_v11, %v7673_v9 }
 0x3c3   : > { %4943 = vmatpush1.bf16.msra.mxu0 %v6591_v57  ;;  %v7820_v33 = vsel %vm4300_vm3, %v5921_v60, %v4332_v28  ;;  %vm4301_vm4 = vcmp.ge.f32.partialorder %v5906_v18, 0.0  ;;  %v4333_v5 = vmul.f32 0.2, %v5906_v18  ;;  %v3982_v49 = vpop.f32.mrb[29].mxu0  ;;  %v4274_v10 = vpop.f32.mrb[61].mxu1  ;;  %vm4303_vm5 = vcmp.ge.f32.partialorder %v5922_v2, 0.0 }
 0x3c4   : > { %4944 = vmatprep.subr.bf16.mxu0 %v6596_v23  ;;  %v4335_v55 = vmul.f32 0.2, %v5922_v2  ;;  %vm4302_vm6 = vcmp.ge.f32.partialorder %v5907_v58, 0.0  ;;  %v4334_v62 = vmul.f32 0.2, %v5907_v58  ;;  %vm4304_vm7 = vcmp.ge.f32.partialorder %v5923_v50, 0.0 }
 0x3c5   : > { %v4365_v21 = vsel %vm4301_vm4, %v5906_v18, %v4333_v5  ;;  %v4336_v14 = vmul.f32 0.2, %v5923_v50  ;;  %v4434_v57 = vmul.f32 %v4402_v25, %v7793_v47  ;;  %v3984_v60 = vpop.f32.mrb[30].mxu0  ;;  %v4276_v63 = vpop.f32.mrb[62].mxu1  ;;  %v4438_v11 = vmul.f32 %v4406_v44, %v4358_v34 }
 0x3c6   : > { %v7826_v56 = vsel %vm4303_vm5, %v5922_v2, %v4335_v55  ;;  %v4366_v28 = vsel %vm4302_vm6, %v5907_v58, %v4334_v62  ;;  %v4433_v23 = vmul.f32 %v4401_v35, %v7783_v24  ;;  %v3986_v38 = vpop.f32.mrb[31].mxu0  ;;  %v4278_v18 = vpop.f32.mrb[63].mxu1  ;;  %v4437_v25 = vmul.f32 %v4405_v37, %v7797_v54  ;;  %v6597_v55 = vld [vmem:[#allocation13 + $0x120] ss:$8 sps:$4 sm:$0xff]  }
 0x3c7   : > { %4945 = vmatpush1.bf16.msra.mxu0 %v6594_v13  ;;  %v7833_v5 = vsel %vm4304_vm7, %v5923_v50, %v4336_v14  ;;  %v5908_v47 = vadd.f32 %v3980_v46, %v7662_v1  ;;  %v5924_v2 = vadd.f32 %v4272_v43, %v7666_v7  ;;  %v4462_v58 = vpack.c.bf16 %v4438_v11, %v4434_v57  ;;  %v6602_v13 = vld [vmem:[#allocation13 + $0x134] ss:$8 sps:$4 sm:$0xff]   ;;  %v6605_v11 = vld [vmem:[#allocation13 + $0x144] ss:$8 sps:$4 sm:$0xff]  }
 0x3c8   : > { %4946 = vmatprep.subr.bf16.mxu0 %v6599_v4  ;;  %v5909_v44 = vadd.f32 %v3982_v49, %v7669_v26  ;;  %v5925_v16 = vadd.f32 %v4274_v10, %v7673_v9  ;;  %v5910_v35 = vadd.f32 %v3984_v60, %v7662_v1  ;;  %v4461_v34 = vpack.c.bf16 %v4437_v25, %v4433_v23  ;;  %v6600_v49 = vld [vmem:[#allocation13 + $0x130] ss:$8 sps:$4 sm:$0xff]  }
 0x3c9   : > { %vm4305_vm8 = vcmp.ge.f32.partialorder %v5908_v47, 0.0  ;;  %v4337_v24 = vmul.f32 0.2, %v5908_v47  ;;  %vm4307_vm9 = vcmp.ge.f32.partialorder %v5924_v2, 0.0  ;;  %4911 = vmatprep.mubr.bf16.mxu0 %v4462_v58  ;;  %v4339_v12 = vmul.f32 0.2, %v5924_v2 }
 0x3ca   : > { %vm4306_vm10 = vcmp.ge.f32.partialorder %v5909_v44, 0.0  ;;  %v4338_v37 = vmul.f32 0.2, %v5909_v44  ;;  %vm4308_vm11 = vcmp.ge.f32.partialorder %v5925_v16, 0.0  ;;  %4912 = vmatmul.mubr.bf16.gmra.mrb[36].mxu0 %v4461_v34  ;;  %v4340_v46 = vmul.f32 0.2, %v5925_v16 }
 0x3cb   : > { %v4369_v43 = vsel %vm4305_vm8, %v5908_v47, %v4337_v24  ;;  %vm4309_vm12 = vcmp.ge.f32.partialorder %v5910_v35, 0.0  ;;  %v4341_v54 = vmul.f32 0.2, %v5910_v35  ;;  %4947 = vmatpush1.bf16.msra.mxu0 %v6597_v55  ;;  %v4371_v4 = vsel %vm4307_vm9, %v5924_v2, %v4339_v12 }
 0x3cc   : > { %v4370_v50 = vsel %vm4306_vm10, %v5909_v44, %v4338_v37  ;;  %v5926_v1 = vadd.f32 %v4276_v63, %v7666_v7  ;;  %v5911_v10 = vadd.f32 %v3986_v38, %v7669_v26  ;;  %v4372_v62 = vsel %vm4308_vm11, %v5925_v16, %v4340_v46  ;;  %4948 = vmatprep.subr.bf16.mxu0 %v6602_v13  ;;  %v6603_v44 = vld [vmem:[#allocation13 + $0x140] ss:$8 sps:$4 sm:$0xff]  }
 0x3cd   : > { %v4373_v14 = vsel %vm4309_vm12, %v5910_v35, %v4341_v54  ;;  %v5927_v57 = vadd.f32 %v4278_v18, %v7673_v9  ;;  %v4442_v60 = vmul.f32 %v4410_v41, %v7816_v0  ;;  %v4446_v7 = vmul.f32 %v4414_v42, %v4366_v28  ;;  %v6608_v35 = vld [vmem:[#allocation13 + $0x154] ss:$8 sps:$4 sm:$0xff]  }
 0x3ce   : > { %vm4311_vm13 = vcmp.ge.f32.partialorder %v5926_v1, 0.0  ;;  %v4343_v23 = vmul.f32 0.2, %v5926_v1  ;;  %vm4310_vm14 = vcmp.ge.f32.partialorder %v5911_v10, 0.0  ;;  %v4342_v25 = vmul.f32 0.2, %v5911_v10 }
 0x3cf   : > { %vm4312_vm15 = vcmp.ge.f32.partialorder %v5927_v57, 0.0  ;;  %v4344_v47 = vmul.f32 0.2, %v5927_v57  ;;  %v8082_v26 = vunpack.c.l.bf16 %v7686_v61  ;;  %4949 = vmatpush1.bf16.msra.mxu0 %v6600_v49  ;;  %v8083_v18 = vunpack.c.l.bf16 %v7689_v17 }
 0x3d0   : > { %v4375_v63 = vsel %vm4311_vm13, %v5926_v1, %v4343_v23  ;;  %v4374_v9 = vsel %vm4310_vm14, %v5911_v10, %v4342_v25  ;;  %v8084_v0 = vunpack.c.h.bf16 %v7694_v19  ;;  %v4466_v55 = vpack.c.bf16 %v4446_v7, %v4442_v60  ;;  %4950 = vmatprep.subr.bf16.mxu0 %v6605_v11 }
 0x3d1   : > { %v4441_v38 = vmul.f32 %v8082_v26, %v7811_v32  ;;  %v4445_v41 = vmul.f32 %v8083_v18, %v4365_v21  ;;  %v4376_v58 = vsel %vm4312_vm15, %v5927_v57, %v4344_v47  ;;  %v8085_v16 = vunpack.c.h.bf16 %v7706_v30  ;;  %v6615_v18 = vld [vmem:[#allocation13 + $0x180] ss:$8 sps:$4 sm:$0xff]  }
 0x3d2   : > { %v4450_v2 = vmul.f32 %v8084_v0, %v4370_v50  ;;  %v8086_v28 = vunpack.c.l.bf16 %v7694_v19  ;;  %v8087_v34 = vunpack.c.l.bf16 %v7706_v30  ;;  %v8088_v17 = vunpack.c.h.bf16 %v7659_v6  ;;  %4921 = vmatprep.mubr.bf16.mxu0 %v4466_v55  ;;  %v6624_v0 = vld [vmem:[#allocation13 + $0x1b0] ss:$8 sps:$4 sm:$0xff]   ;;  %v6632_v55 = vld [vmem:[#allocation13 + $0x1d4] ss:$8 sps:$4 sm:$0xff]  }
 0x3d3   : > { %v4454_v42 = vmul.f32 %v8085_v16, %v4374_v9  ;;  %v4465_v32 = vpack.c.bf16 %v4445_v41, %v4441_v38  ;;  %v8089_v13 = vunpack.c.h.bf16 %v7699_v59  ;;  %v8090_v19 = vunpack.c.h.bf16 %v7709_v40  ;;  %4951 = vmatpush1.bf16.msra.mxu0 %v6603_v44  ;;  %v6609_v38 = vld [vmem:[#allocation13 + $0x160] ss:$8 sps:$4 sm:$0xff]   ;;  %v6626_v41 = vld [vmem:[#allocation13 + $0x1b4] ss:$8 sps:$4 sm:$0xff]   ;;  %v6630_v44 = vld [vmem:[#allocation13 + $0x1d0] ss:$8 sps:$4 sm:$0xff]  }
 0x3d4   : > { %v4449_v61 = vmul.f32 %v8086_v28, %v4369_v43  ;;  %v4453_v24 = vmul.f32 %v8087_v34, %v4373_v14  ;;  %v4432_v21 = vmul.f32 %v8088_v17, %v7781_v15  ;;  %v8091_v30 = vunpack.c.l.bf16 %v7699_v59  ;;  %4952 = vmatprep.subr.bf16.mxu0 %v6608_v35  ;;  %v6635_v16 = vld [vmem:[#allocation13 + $0x1e4] ss:$8 sps:$4 sm:$0xff]   ;;  %v6638_v28 = vld [vmem:[#allocation13 + $0x1f4] ss:$8 sps:$4 sm:$0xff]  }
 0x3d5   : > { %v7870_v12 = vmul.f32 %v8089_v13, %v7795_v20  ;;  %v4470_v37 = vpack.c.bf16 %v4454_v42, %v4450_v2  ;;  %v7875_v43 = vmul.f32 %v8090_v19, %v7808_v36  ;;  %v8092_v6 = vunpack.c.l.bf16 %v7709_v40  ;;  %4922 = vmatmul.mubr.bf16.gmra.mrb[40].mxu0 %v4465_v32  ;;  %v6629_v2 = vld [vmem:[#allocation13 + $0x1c4] ss:$8 sps:$4 sm:$0xff]   ;;  %v6633_v42 = vld [vmem:[#allocation13 + $0x1e0] ss:$8 sps:$4 sm:$0xff]  }
 0x3d6   : > { %v7880_v46 = vmul.f32 %v8091_v30, %v7790_v48  ;;  %v4469_v20 = vpack.c.bf16 %v4453_v24, %v4449_v61  ;;  %v4460_v54 = vpack.c.bf16 %v4432_v21, %v7765_v22  ;;  %v8093_v50 = vunpack.c.h.bf16 %v7716_v39  ;;  %v6606_v48 = vld [vmem:[#allocation13 + $0x150] ss:$8 sps:$4 sm:$0xff]   ;;  %v4537_v35 = vld [vmem:[%s8102_s26] sm:$0x3] }
 0x3d7   : > { %v7885_v15 = vmul.f32 %v8092_v6, %v7799_v53  ;;  %v8094_v36 = vunpack.c.h.bf16 %v7719_v45  ;;  %4931 = vmatprep.mubr.bf16.mxu0 %v4470_v37  ;;  %v4464_v40 = vpack.c.bf16 %v7875_v43, %v7870_v12  ;;  %v8095_v22 = vunpack.c.l.bf16 %v7716_v39  ;;  %4953 = vmatpush1.bf16.msra.mxu0 %v6606_v48  ;;  %v6636_v61 = vld [vmem:[#allocation13 + $0x1f0] ss:$8 sps:$4 sm:$0xff]   ;;  %v5063_v17 = vld [vmem:[%s7336_s29] sm:$0xff]  ;;  %v5064_v12 = vld [vmem:[%s7336_s29 + $0x8] sm:$0xff] }
 0x3d8   : > { %v7891_v49 = vmul.f32 %v8093_v50, %v7820_v33  ;;  %v6611_v33 = vld [vmem:[#allocation13 + $0x164] ss:$8 sps:$4 sm:$0xff]   ;;  %v8097_v57 = vunpack.c.h.bf16 %v7726_v27  ;;  %v8098_v11 = vunpack.c.h.bf16 %v7733_v51  ;;  %v8099_v25 = vunpack.c.l.bf16 %v7726_v27  ;;  %v6620_v27 = vld [vmem:[#allocation13 + $0x194] ss:$8 sps:$4 sm:$0xff]  }
 0x3d9   : > { %v7896_v59 = vmul.f32 %v8094_v36, %v7833_v5  ;;  %v4463_v53 = vpack.c.bf16 %v7885_v15, %v7880_v46  ;;  %v4443_v1 = vmul.f32 %v8095_v22, %v7814_v52  ;;  %v8096_v5 = vunpack.c.l.bf16 %v7719_v45  ;;  %4954 = vmatprep.subr.bf16.mxu0 %v6611_v33  ;;  %v6614_v45 = vld [vmem:[#allocation13 + $0x174] ss:$8 sps:$4 sm:$0xff]  }
 0x3da   : > { %v4452_v60 = vmul.f32 %v8097_v57, %v4372_v62  ;;  %v4456_v23 = vmul.f32 %v8098_v11, %v4376_v58  ;;  %v4451_v47 = vmul.f32 %v8099_v25, %v4371_v4  ;;  %v8100_v39 = vunpack.c.l.bf16 %v7733_v51  ;;  %v6617_v62 = vld [vmem:[#allocation13 + $0x184] ss:$8 sps:$4 sm:$0xff]   ;;  %v6618_v51 = vld [vmem:[#allocation13 + $0x190] ss:$8 sps:$4 sm:$0xff]   ;;  %v6627_v58 = vld [vmem:[#allocation13 + $0x1c0] ss:$8 sps:$4 sm:$0xff]  }
 0x3db   : > { %v4468_v10 = vpack.c.bf16 %v7896_v59, %v7891_v49  ;;  %v4447_v14 = vmul.f32 %v8096_v5, %v7826_v56  ;;  %4955 = vmatpush1.bf16.msra.mxu0 %v6609_v38  ;;  %v6612_v56 = vld [vmem:[#allocation13 + $0x170] ss:$8 sps:$4 sm:$0xff]   ;;  %v6623_v4 = vld [vmem:[#allocation13 + $0x1a4] ss:$8 sps:$4 sm:$0xff]   ;;  %v8101_v32 = vpack.c.bf16 %v7775_v8, %v7755_v3  ;;  %v7925_v34 = vrot.slane %v4537_v35, %v7409_v29  ;;  %v5103_v3 = vld [vmem:[%s8103_s12] sm:$0x3] }
 0x3dc   : > { %v4455_v52 = vmul.f32 %v8100_v39, %v4375_v63  ;;  %v4472_v26 = vpack.c.bf16 %v4456_v23, %v4452_v60  ;;  %4956 = vmatprep.subr.bf16.mxu0 %v6614_v45  ;;  %v6621_v63 = vld [vmem:[#allocation13 + $0x1a0] ss:$8 sps:$4 sm:$0xff]   ;;  %v7928_v24 = vrot.slane %v4537_v35, %v7417_v31  ;;  %v5071_v43 = vunpack.c.l.bf16 %v5063_v17  ;;  %v5066_v5 = vld [vmem:[%s7336_s29 + $0x18] sm:$0xff] }
 0x3dd   : > { %v4467_v7 = vpack.c.bf16 %v4447_v14, %v4443_v1  ;;  %4932 = vmatmul.mubr.bf16.gmra.mrb[44].mxu0 %v4469_v20  ;;  %v5072_v30 = vunpack.c.h.bf16 %v5063_v17  ;;  %v7938_v46 = vrot.slane %v5103_v3, %v7409_v29  ;;  %v5073_v36 = vunpack.c.l.bf16 %v5064_v12  ;;  %v5065_v1 = vld [vmem:[%s7336_s29 + $0x10] sm:$0xff] }
 0x3de   : > { %v4471_v9 = vpack.c.bf16 %v4455_v52, %v4451_v47  ;;  %4974 = vmatprep.mubr.bf16.mxu0 %v4460_v54  ;;  %v7942_v54 = vrot.slane %v5103_v3, %v7417_v31  ;;  %v5074_v29 = vunpack.c.h.bf16 %v5064_v12  ;;  %v5075_v39 = vunpack.c.l.bf16 %v5065_v1 }
 0x3df   : > { %4957 = vmatpush1.bf16.msra.mxu0 %v6612_v56  ;;  %v5076_v38 = vunpack.c.h.bf16 %v5065_v1  ;;  %v5069_v1 = vld [vmem:[%s7336_s29 + $0x30] sm:$0xff] }
 0x3e0   : > { %4958 = vmatprep.subr.bf16.mxu0 %v6617_v62 }
 0x3e3   : > { %4959 = vmatpush1.bf16.msra.mxu0 %v6615_v18 }
 0x3e4   : > { %4960 = vmatprep.subr.bf16.mxu0 %v6620_v27 }
 0x3e7   : > { %4961 = vmatpush1.bf16.msra.mxu0 %v6618_v51 }
 0x3e8   : > { %4962 = vmatprep.subr.bf16.mxu0 %v6623_v4 }
 0x3eb   : > { %4963 = vmatpush1.bf16.msra.mxu0 %v6621_v63 }
 0x3ec   : > { %4964 = vmatprep.subr.bf16.mxu0 %v6626_v41 }
 0x3ef   : > { %4965 = vmatpush1.bf16.msra.mxu0 %v6624_v0  ;;  %v5078_v0 = vunpack.c.h.bf16 %v5066_v5 }
 0x3f0   : > { %4966 = vmatprep.subr.bf16.mxu0 %v6629_v2  ;;  %v5067_v2 = vld [vmem:[%s7336_s29 + $0x20] sm:$0xff] }
 0x3f1   : > { %v5079_v3 = vunpack.c.l.bf16 %v5067_v2 }
 0x3f3   : > { %4967 = vmatpush1.bf16.msra.mxu0 %v6627_v58 }
 0x3f4   : > { %4968 = vmatprep.subr.bf16.mxu0 %v6632_v55 }
 0x3f7   : > { %4969 = vmatpush1.bf16.msra.mxu0 %v6630_v44 }
 0x3f8   : > { %4970 = vmatprep.subr.bf16.mxu0 %v6635_v16 }
 0x3fb   : > { %4971 = vmatpush1.bf16.msra.mxu0 %v6633_v42 }
 0x3fc   : > { %4972 = vmatprep.subr.bf16.mxu0 %v6638_v28 }
 0x3ff   : > { %4973 = vmatpush1.bf16.msra.mxu0 %v6636_v61  ;;  %v5068_v61 = vld [vmem:[%s7336_s29 + $0x28] sm:$0xff] }
 0x402   : > { %4975 = vmatmul.mubr.bf16.vlgmr.msra.gmra.mrb[32].mxu0 %v8101_v32 }
 0x403   : > { %4984 = vmatprep.mubr.bf16.mxu0 %v4464_v40 }
 0x40a   : > { %4985 = vmatmul.mubr.bf16.gmra.mrb[36].mxu0 %v4463_v53 }
 0x40b   : > { %4994 = vmatprep.mubr.bf16.mxu0 %v4468_v10 }
 0x412   : > { %4995 = vmatmul.mubr.bf16.gmra.mrb[40].mxu0 %v4467_v7 }
 0x413   : > { %5004 = vmatprep.mubr.bf16.mxu0 %v4472_v26 }
 0x41a   : > { %5005 = vmatmul.mubr.bf16.gmra.mrb[44].mxu0 %v4471_v9  ;;  %v5077_v9 = vunpack.c.l.bf16 %v5066_v5 }
 0x4d5   : > { %v4976_v8 = vpop.f32.mrb[32].mxu0 }
 0x4d6   : > { %v5928_v21 = vadd.f32 %v4976_v8, %v7925_v34  ;;  %v4978_v13 = vpop.f32.mrb[33].mxu0 }
 0x4d7   : > { %v5929_v37 = vadd.f32 %v4978_v13, %v7928_v24  ;;  %v4980_v19 = vpop.f32.mrb[34].mxu0 }
 0x4d8   : > { %vm5015_vm0 = vcmp.ge.f32.partialorder %v5928_v21, 0.0  ;;  %v5031_v6 = vmul.f32 0.2, %v5928_v21  ;;  %v5930_v15 = vadd.f32 %v4980_v19, %v7925_v34  ;;  %v4982_v20 = vpop.f32.mrb[35].mxu0 }
 0x4d9   : > { %vm5016_vm1 = vcmp.ge.f32.partialorder %v5929_v37, 0.0  ;;  %v5032_v50 = vmul.f32 0.2, %v5929_v37  ;;  %v5931_v49 = vadd.f32 %v4982_v20, %v7928_v24 }
 0x4da   : > { %vm5017_vm2 = vcmp.ge.f32.partialorder %v5930_v15, 0.0  ;;  %v5033_v59 = vmul.f32 0.2, %v5930_v15  ;;  %v5047_v48 = vsel %vm5015_vm0, %v5928_v21, %v5031_v6  ;;  %v5080_v6 = vunpack.c.h.bf16 %v5067_v2 }
 0x4db   : > { %vm5018_vm3 = vcmp.ge.f32.partialorder %v5931_v49, 0.0  ;;  %v5034_v40 = vmul.f32 0.2, %v5931_v49  ;;  %v5048_v53 = vsel %vm5016_vm1, %v5929_v37, %v5032_v50  ;;  %v5087_v22 = vmul.f32 %v5071_v43, %v5047_v48 }
 0x4dc   : > { %v5049_v33 = vsel %vm5017_vm2, %v5930_v15, %v5033_v59  ;;  %v5088_v10 = vmul.f32 %v5072_v30, %v5048_v53  ;;  %v5081_v15 = vunpack.c.l.bf16 %v5068_v61  ;;  %vm5218_vm0 = vcmask 7168  }
 0x4dd   : > { %v5050_v31 = vsel %vm5018_vm3, %v5931_v49, %v5034_v40  ;;  %v4986_v14 = vpop.f32.mrb[36].mxu0  ;;  %v5115_v57 = vmul.f32 %v7938_v46, %v5087_v22  ;;  %v5089_v60 = vmul.f32 %v5073_v36, %v5049_v33  ;;  %v5082_v22 = vunpack.c.h.bf16 %v5068_v61 }
 0x4de   : > { %v5932_v11 = vadd.f32 %v4986_v14, %v7925_v34  ;;  %v4988_v23 = vpop.f32.mrb[37].mxu0  ;;  %v5116_v25 = vmul.f32 %v7942_v54, %v5088_v10  ;;  %v5090_v47 = vmul.f32 %v5074_v29, %v5050_v31 }
 0x4df   : > { %v5933_v52 = vadd.f32 %v4988_v23, %v7928_v24  ;;  %v4990_v7 = vpop.f32.mrb[38].mxu0  ;;  %v5117_v26 = vmul.f32 %v7938_v46, %v5089_v60  ;;  %v5070_v60 = vld [vmem:[%s7336_s29 + $0x38] sm:$0xff] }
 0x4e0   : > { %vm5019_vm4 = vcmp.ge.f32.partialorder %v5932_v11, 0.0  ;;  %v5035_v45 = vmul.f32 0.2, %v5932_v11  ;;  %v5934_v56 = vadd.f32 %v4990_v7, %v7925_v34  ;;  %v4992_v62 = vpop.f32.mrb[39].mxu0  ;;  %v5131_v18 = vadd.f32 %v5116_v25, %v5115_v57 }
 0x4e1   : > { %vm5020_vm5 = vcmp.ge.f32.partialorder %v5933_v52, 0.0  ;;  %v5036_v27 = vmul.f32 0.2, %v5933_v52  ;;  %v5935_v51 = vadd.f32 %v4992_v62, %v7928_v24  ;;  %v5118_v4 = vmul.f32 %v7942_v54, %v5090_v47 }
 0x4e2   : > { %vm5021_vm6 = vcmp.ge.f32.partialorder %v5934_v56, 0.0  ;;  %v5037_v63 = vmul.f32 0.2, %v5934_v56  ;;  %5132 = vadd.xlane.f32.xlu0 %v5131_v18  ;;  %v5051_v41 = vsel %vm5019_vm4, %v5932_v11, %v5035_v45  ;;  %v5083_v47 = vunpack.c.l.bf16 %v5069_v1 }
 0x4e3   : > { %vm5022_vm7 = vcmp.ge.f32.partialorder %v5935_v51, 0.0  ;;  %v5038_v58 = vmul.f32 0.2, %v5935_v51  ;;  %v5134_v55 = vadd.f32 %v5118_v4, %v5117_v26  ;;  %v5052_v44 = vsel %vm5020_vm5, %v5933_v52, %v5036_v27 }
 0x4e4   : > { %v5053_v16 = vsel %vm5021_vm6, %v5934_v56, %v5037_v63  ;;  %v5091_v42 = vmul.f32 %v5075_v39, %v5051_v41  ;;  %v5092_v28 = vmul.f32 %v5076_v38, %v5052_v44  ;;  %v5084_v62 = vunpack.c.h.bf16 %v5069_v1 }
 0x4e5   : > { %v5054_v32 = vsel %vm5022_vm7, %v5935_v51, %v5038_v58  ;;  %v4996_v35 = vpop.f32.mrb[40].mxu0  ;;  %v5093_v17 = vmul.f32 %v5077_v9, %v5053_v16  ;;  %v5085_v18 = vunpack.c.l.bf16 %v5070_v60  ;;  %v5086_v44 = vunpack.c.h.bf16 %v5070_v60 }
 0x4e6   : > { %v5936_v8 = vadd.f32 %v4996_v35, %v7925_v34  ;;  %v4998_v21 = vpop.f32.mrb[41].mxu0  ;;  %5135 = vadd.xlane.f32.xlu0 %v5134_v55  ;;  %v5119_v13 = vmul.f32 %v7938_v46, %v5091_v42  ;;  %v5120_v12 = vmul.f32 %v7942_v54, %v5092_v28  ;;  %v5094_v37 = vmul.f32 %v5078_v0, %v5054_v32 }
 0x4e7   : > { %v5937_v19 = vadd.f32 %v4998_v21, %v7928_v24  ;;  %v5000_v43 = vpop.f32.mrb[42].mxu0  ;;  %v5121_v30 = vmul.f32 %v7938_v46, %v5093_v17 }
 0x4e8   : > { %vm5023_vm8 = vcmp.ge.f32.partialorder %v5936_v8, 0.0  ;;  %v5039_v20 = vmul.f32 0.2, %v5936_v8  ;;  %v5938_v50 = vadd.f32 %v5000_v43, %v7925_v34  ;;  %v5002_v49 = vpop.f32.mrb[43].mxu0  ;;  %v5137_v36 = vadd.f32 %v5120_v12, %v5119_v13 }
 0x4e9   : > { %vm5024_vm9 = vcmp.ge.f32.partialorder %v5937_v19, 0.0  ;;  %v5040_v59 = vmul.f32 0.2, %v5937_v19  ;;  %v5939_v48 = vadd.f32 %v5002_v49, %v7928_v24  ;;  %v5122_v29 = vmul.f32 %v7942_v54, %v5094_v37 }
 0x4ea   : > { %v5055_v40 = vsel %vm5023_vm8, %v5936_v8, %v5039_v20  ;;  %vm5025_vm10 = vcmp.ge.f32.partialorder %v5938_v50, 0.0  ;;  %v5041_v53 = vmul.f32 0.2, %v5938_v50  ;;  %5138 = vadd.xlane.f32.xlu1 %v5137_v36 }
 0x4eb   : > { %v5056_v33 = vsel %vm5024_vm9, %v5937_v19, %v5040_v59  ;;  %vm5026_vm11 = vcmp.ge.f32.partialorder %v5939_v48, 0.0  ;;  %v5042_v10 = vmul.f32 0.2, %v5939_v48  ;;  %v5140_v5 = vadd.f32 %v5122_v29, %v5121_v30  ;;  %v5877_v19 = vld [vmem:[#allocation2] ss:$0 sm:$0xff] }
 0x4ec   : > { %v5057_v31 = vsel %vm5025_vm10, %v5938_v50, %v5041_v53  ;;  %v5095_v14 = vmul.f32 %v5079_v3, %v5055_v40  ;;  %v5096_v57 = vmul.f32 %v5080_v6, %v5056_v33 }
 0x4ed   : > { %v5058_v11 = vsel %vm5026_vm11, %v5939_v48, %v5042_v10  ;;  %v5006_v23 = vpop.f32.mrb[44].mxu0  ;;  %v5097_v25 = vmul.f32 %v5081_v15, %v5057_v31 }
 0x4ee   : > { %v5940_v39 = vadd.f32 %v5006_v23, %v7925_v34  ;;  %v5008_v52 = vpop.f32.mrb[45].mxu0  ;;  %5141 = vadd.xlane.f32.xlu1 %v5140_v5  ;;  %v5123_v7 = vmul.f32 %v7938_v46, %v5095_v14  ;;  %v5124_v26 = vmul.f32 %v7942_v54, %v5096_v57  ;;  %v5098_v38 = vmul.f32 %v5082_v22, %v5058_v11 }
 0x4ef   : > { %v5941_v9 = vadd.f32 %v5008_v52, %v7928_v24  ;;  %v5010_v45 = vpop.f32.mrb[46].mxu0  ;;  %v5125_v56 = vmul.f32 %v7938_v46, %v5097_v25 }
 0x4f0   : > { %vm5027_vm12 = vcmp.ge.f32.partialorder %v5940_v39, 0.0  ;;  %v5043_v27 = vmul.f32 0.2, %v5940_v39  ;;  %v5942_v51 = vadd.f32 %v5010_v45, %v7925_v34  ;;  %v5012_v4 = vpop.f32.mrb[47].mxu0  ;;  %v5143_v63 = vadd.f32 %v5124_v26, %v5123_v7 }
 0x4f1   : > { %vm5028_vm13 = vcmp.ge.f32.partialorder %v5941_v9, 0.0  ;;  %v5044_v41 = vmul.f32 0.2, %v5941_v9  ;;  %v5943_v0 = vadd.f32 %v5012_v4, %v7928_v24  ;;  %v5126_v2 = vmul.f32 %v7942_v54, %v5098_v38 }
 0x4f2   : > { %v5059_v58 = vsel %vm5027_vm12, %v5940_v39, %v5043_v27  ;;  %vm5029_vm14 = vcmp.ge.f32.partialorder %v5942_v51, 0.0  ;;  %v5045_v55 = vmul.f32 0.2, %v5942_v51  ;;  %5144 = vadd.xlane.f32.xlu0 %v5143_v63 }
 0x4f3   : > { %v5060_v16 = vsel %vm5028_vm13, %v5941_v9, %v5044_v41  ;;  %vm5030_vm15 = vcmp.ge.f32.partialorder %v5943_v0, 0.0  ;;  %v5046_v42 = vmul.f32 0.2, %v5943_v0  ;;  %v5146_v28 = vadd.f32 %v5126_v2, %v5125_v56 }
 0x4f4   : > { %v5061_v61 = vsel %vm5029_vm14, %v5942_v51, %v5045_v55  ;;  %v5099_v32 = vmul.f32 %v5083_v47, %v5059_v58  ;;  %v5100_v34 = vmul.f32 %v5084_v62, %v5060_v16 }
 0x4f5   : > { %v5062_v35 = vsel %vm5030_vm15, %v5943_v0, %v5046_v42  ;;  %5147 = vadd.xlane.f32.xlu1 %v5146_v28  ;;  %v5101_v17 = vmul.f32 %v5085_v18, %v5061_v61 }
 0x4f6   : > { %v5127_v3 = vmul.f32 %v7938_v46, %v5099_v32  ;;  %v5128_v24 = vmul.f32 %v7942_v54, %v5100_v34  ;;  %v5102_v8 = vmul.f32 %v5086_v44, %v5062_v35 }
 0x4f7   : > { %v5129_v21 = vmul.f32 %v7938_v46, %v5101_v17 }
 0x4f8   : > { %v5149_v13 = vadd.f32 %v5128_v24, %v5127_v3  ;;  %v5130_v12 = vmul.f32 %v7942_v54, %v5102_v8 }
 0x4fa   : > { %5150 = vadd.xlane.f32.xlu0 %v5149_v13  ;;  %v5152_v37 = vadd.f32 %v5130_v12, %v5129_v21 }
 0x4fc   : > { %5153 = vadd.xlane.f32.xlu1 %v5152_v37 }
 0x56f   : > { %v5133_v43 = vpop.xlane.xlu0 %5132 }
 0x570   : > { %v5162_v30 = vadd.f32 %v5877_v19, %v5133_v43 }
 0x572   : > { %v5878_v6 = vmul.f32 -1.442695, %v5162_v30 }
 0x573   : > { %v5136_v15 = vpop.xlane.xlu0 %5135 }
 0x574   : > { %6639 = vpow2.f32 %v5878_v6  ;;  %v5163_v20 = vadd.f32 %v5877_v19, %v5136_v15 }
 0x576   : > { %v5879_v50 = vmul.f32 -1.442695, %v5163_v20 }
 0x577   : > { %v5139_v49 = vpop.xlane.xlu1 %5138 }
 0x578   : > { %6641 = vpow2.f32 %v5879_v50  ;;  %v5164_v36 = vadd.f32 %v5877_v19, %v5139_v49 }
 0x57a   : > { %v5880_v59 = vmul.f32 -1.442695, %v5164_v36 }
 0x57b   : > { %v5142_v46 = vpop.xlane.xlu1 %5141 }
 0x57c   : > { %6643 = vpow2.f32 %v5880_v59  ;;  %v5165_v54 = vadd.f32 %v5877_v19, %v5142_v46 }
 0x57e   : > { %v6640_v48 = vpop.eup %6639  ;;  %v5881_v29 = vmul.f32 -1.442695, %v5165_v54 }
 0x57f   : > { %v5194_v40 = vadd.f32 1.0, %v6640_v48  ;;  %v5145_v53 = vpop.xlane.xlu0 %5144 }
 0x580   : > { %6645 = vpow2.f32 %v5881_v29  ;;  %v5166_v22 = vadd.f32 %v5877_v19, %v5145_v53 }
 0x581   : > { %6647 = vrcp.f32 %v5194_v40 }
 0x582   : > { %v6642_v1 = vpop.eup %6641  ;;  %v5882_v33 = vmul.f32 -1.442695, %v5166_v22  ;;  %v5148_v10 = vpop.xlane.xlu1 %5147 }
 0x583   : > { %v5195_v5 = vadd.f32 1.0, %v6642_v1  ;;  %v5167_v31 = vadd.f32 %v5877_v19, %v5148_v10 }
 0x584   : > { %6649 = vpow2.f32 %v5882_v33 }
 0x585   : > { %6651 = vrcp.f32 %v5195_v5  ;;  %v5883_v14 = vmul.f32 -1.442695, %v5167_v31 }
 0x586   : > { %v6644_v57 = vpop.eup %6643 }
 0x587   : > { %v5196_v60 = vadd.f32 1.0, %v6644_v57  ;;  %6653 = vpow2.f32 %v5883_v14  ;;  %v5151_v11 = vpop.xlane.xlu0 %5150 }
 0x588   : > { %v5168_v23 = vadd.f32 %v5877_v19, %v5151_v11 }
 0x589   : > { %6655 = vrcp.f32 %v5196_v60  ;;  %v5154_v25 = vpop.xlane.xlu1 %5153 }
 0x58a   : > { %v6646_v47 = vpop.eup %6645  ;;  %v5884_v39 = vmul.f32 -1.442695, %v5168_v23  ;;  %v5169_v52 = vadd.f32 %v5877_v19, %v5154_v25 }
 0x58b   : > { %v6648_v7 = vpop.eup %6647  ;;  %v5197_v26 = vadd.f32 1.0, %v6646_v47 }
 0x58c   : > { %5219 = vst.msk [vmem:[%s7983_s30] sm:$0xff] %vm5218_vm0, %v6648_v7  ;;  %6657 = vpow2.f32 %v5884_v39  ;;  %v5885_v38 = vmul.f32 -1.442695, %v5169_v52 }
 0x58d   : > { %6659 = vrcp.f32 %v5197_v26 }
 0x58e   : > { %v6650_v9 = vpop.eup %6649  ;;  %6661 = vpow2.f32 %v5885_v38 }
 0x58f   : > { %v6652_v45 = vpop.eup %6651  ;;  %v5198_v56 = vadd.f32 1.0, %v6650_v9 }
 0x590   : > { %5220 = vst.msk [vmem:[%s7983_s30 + $0x8] sm:$0xff] %vm5218_vm0, %v6652_v45 }
 0x591   : > { %v6654_v62 = vpop.eup %6653  ;;  %6663 = vrcp.f32 %v5198_v56 }
 0x592   : > { %v5199_v18 = vadd.f32 1.0, %v6654_v62 }
 0x593   : > { %v6656_v27 = vpop.eup %6655 }
 0x594   : > { %5221 = vst.msk [vmem:[%s7983_s30 + $0x10] sm:$0xff] %vm5218_vm0, %v6656_v27  ;;  %6665 = vrcp.f32 %v5199_v18 }
 0x596   : > { %v6658_v51 = vpop.eup %6657 }
 0x597   : > { %v6660_v4 = vpop.eup %6659  ;;  %v5200_v63 = vadd.f32 1.0, %v6658_v51 }
 0x598   : > { %v6662_v41 = vpop.eup %6661  ;;  %5222 = vst.msk [vmem:[%s7983_s30 + $0x18] sm:$0xff] %vm5218_vm0, %v6660_v4 }
 0x599   : > { %6667 = vrcp.f32 %v5200_v63  ;;  %v5201_v0 = vadd.f32 1.0, %v6662_v41 }
 0x59b   : > { %v6664_v2 = vpop.eup %6663  ;;  %6669 = vrcp.f32 %v5201_v0 }
 0x59c   : > { %5223 = vst.msk [vmem:[%s7983_s30 + $0x20] sm:$0xff] %vm5218_vm0, %v6664_v2 }
 0x59e   : > { %v6666_v58 = vpop.eup %6665 }
 0x59f   : > { %5224 = vst.msk [vmem:[%s7983_s30 + $0x28] sm:$0xff] %vm5218_vm0, %v6666_v58 }
 0x5a3   : > { %v6668_v55 = vpop.eup %6667 }
 0x5a4   : > { %5225 = vst.msk [vmem:[%s7983_s30 + $0x30] sm:$0xff] %vm5218_vm0, %v6668_v55 }
 0x5a5   : > { %v6670_v44 = vpop.eup %6669 }
 0x5a6   : > { %5226 = vst.msk [vmem:[%s7983_s30 + $0x38] sm:$0xff] %vm5218_vm0, %v6670_v44 }
 0x5a7 PF: > { %s8105_s26 = sld [smem:[#allocation19_spill]]  ;;  %s8106_s4 = sld [smem:[#allocation20_spill]] }
 0x5a8   : > { %s8107_s23 = smov %s6925_s24  ;;  %s8108_s24 = smov %s6929_s25 }
 0x5ad   : > { %p31_p10 = scmp.ge.s32.totalorder %s8105_s26, 4   ;;  %s8109_s25 = smov %s8106_s4 }
 0x5af   :  { %33 = sbr.rel (!%p31_p10) target bundleno = 16 (0x10), region = 157 }
 0x5b6   :  { %5249 = vsyncpa [#allocation4], 1 }
 0x5b7   :  { %5251 = vsyncpa [#allocation4 + $0x1], 1 }
 0x5b8   :  { %5252 = vsyncpa [#allocation6], 1 }
 0x5b9   :  { %5254 = vsyncpa [#allocation6 + $0x1], 1 }
 0x5ba   :  { %5255 = vsyncpa [#allocation9], 1 }
 0x5bb   :  { %5257 = vsyncpa [#allocation9 + $0x1], 1 }
 0x5bc   :  { %5258 = vsyncpa [#allocation12], 1 }

</bundles_post_ra>
